<compile_context>
chip_gen: v7x
topology: tpu7x:2x2x1
jax: 0.10.0
libtpu: 0.0.40
codegen_flags: <defaults>
</compile_context>

<pallas_src>
import math

import jax
import jax.numpy as jnp
from jax import lax
from jax.experimental import pallas as pl
from jax.experimental.pallas import tpu as pltpu

# ----- Hyperparameters (deterministic choices for this synthetic module) -----
NUM_FEATURES = 8
EMBEDDING_SIZE = 16
D_MODEL = 32
DIM_FEEDFORWARD = 64
NHEAD = 4
HEAD_DIM = D_MODEL // NHEAD
NUM_LAYERS = 2
B = 2
T = 8
LN_EPS = 1e-5

_VMEM = pl.BlockSpec(memory_space=pltpu.MemorySpace.VMEM)


def _layer_norm(y, w, b):
    mu = jnp.mean(y, axis=-1, keepdims=True)
    var = jnp.mean((y - mu) ** 2, axis=-1, keepdims=True)
    return (y - mu) * lax.rsqrt(var + LN_EPS) * w + b


# ============================ fused kernel ============================
def fused_kernel(x_ref, len_ref,
                 gru_wih_ref, gru_whh_ref, gru_bi_ref, gru_bhn_ref,
                 wqkv_ref, bqkv_ref, wo_ref, ob_ref,
                 ln1w_ref, ln1b_ref, ff1w_ref, ff1b_ref, ff2w_ref, ff2b_ref,
                 ln2w_ref, ln2b_ref,
                 hw1_ref, hb1_ref, hw2_ref, hb2_ref,
                 o_ref, rnn_scr):
    Bn, Tn, F = x_ref.shape
    H = D_MODEL
    HD = HEAD_DIM

    # ---- mask / key-padding bias (computed & broadcast ONCE, reused) ----
    lengths = len_ref[...]                                             # (B, 1) f32
    t_idx = lax.broadcasted_iota(jnp.int32, (Bn, Tn), 1).astype(jnp.float32)
    mask = (t_idx < lengths).astype(jnp.float32)                       # (B, T), 1 = valid
    # NOTE: assumes lengths >= 1 (a fully-padded row would give NaN, like the ref).
    key_bias3 = ((1.0 - mask) * jnp.float32(-1e30)).reshape(Bn, 1, Tn)  # hoisted (B,1,T)
    mask3 = mask[:, :, None]                                            # (B, T, 1)

    # ---- GRU: input projection hoisted out of the serial recurrence ----
    x2 = x_ref[...].reshape(Bn * Tn, F)
    gi_all = (jnp.dot(x2, gru_wih_ref[...], preferred_element_type=jnp.float32)
              + gru_bi_ref[...]).reshape(Bn, Tn, 3 * H)                # r/z biases pre-folded
    w_hh = gru_whh_ref[...]                                            # (H, 3H)
    b_hn = gru_bhn_ref[...]                                            # (1, H)

    h = jnp.zeros((Bn, H), jnp.float32)
    for t in range(Tn):                         # T is static -> fully unrolled recurrence
        gi = gi_all[:, t, :]                                           # (B, 3H)
        gh = jnp.dot(h, w_hh, preferred_element_type=jnp.float32)      # (B, 3H)
        r = jax.nn.sigmoid(gi[:, 0:H] + gh[:, 0:H])
        z = jax.nn.sigmoid(gi[:, H:2 * H] + gh[:, H:2 * H])
        n = jnp.tanh(gi[:, 2 * H:3 * H] + r * (gh[:, 2 * H:3 * H] + b_hn))
        h = (1.0 - z) * n + z * h
        rnn_scr[:, t:t + 1, :] = h[:, None, :]

    x2 = rnn_scr[...].reshape(Bn * Tn, H)                              # (B*T, D)

    # ---- transformer encoder layers (post-norm, ReLU FFN) ----
    for l in range(NUM_LAYERS):
        attn = ob_ref[l]                                               # (1, D) out-proj bias
        for hi in range(NHEAD):
            # per-head q/k/v fused into ONE matmul; weights pre-split/packed on
            # the host -> only 2-D matmuls + static lane slices in-kernel.
            qkv = (jnp.dot(x2, wqkv_ref[l, hi], preferred_element_type=jnp.float32)
                   + bqkv_ref[l, hi])                                  # (B*T, 3*HD)
            q3 = qkv[:, 0:HD].reshape(Bn, Tn, HD)                      # (already / sqrt(hd))
            k3 = qkv[:, HD:2 * HD].reshape(Bn, Tn, HD)
            v3 = qkv[:, 2 * HD:3 * HD].reshape(Bn, Tn, HD)
            s = jnp.einsum('bqd,bkd->bqk', q3, k3,
                           preferred_element_type=jnp.float32)
            s = s + key_bias3
            p = jnp.exp(s - jnp.max(s, axis=-1, keepdims=True))
            p = p * pl.reciprocal(jnp.sum(p, axis=-1, keepdims=True), approx=True)
            ctx = jnp.einsum('bqk,bkd->bqd', p, v3,
                             preferred_element_type=jnp.float32)       # (B, T, hd)
            attn = attn + jnp.dot(ctx.reshape(Bn * Tn, HD), wo_ref[l, hi],
                                  preferred_element_type=jnp.float32)

        y = _layer_norm(x2 + attn, ln1w_ref[l], ln1b_ref[l])
        ff = jnp.maximum(
            jnp.dot(y, ff1w_ref[l], preferred_element_type=jnp.float32) + ff1b_ref[l], 0.0)
        ff = jnp.dot(ff, ff2w_ref[l], preferred_element_type=jnp.float32) + ff2b_ref[l]
        x2 = _layer_norm(y + ff, ln2w_ref[l], ln2b_ref[l])

    # ---- masked mean pooling + output MLP ----
    xs = x2.reshape(Bn, Tn, H) * mask3
    pooled = jnp.sum(xs, axis=1) / lengths                             # (B, D), exact div
    hm = jnp.maximum(
        jnp.dot(pooled, hw1_ref[...], preferred_element_type=jnp.float32) + hb1_ref[...], 0.0)
    o_ref[...] = (jnp.dot(hm, hw2_ref[...], preferred_element_type=jnp.float32)
                  + hb2_ref[...]).astype(o_ref.dtype)


# ============================ host wrapper ============================
def rnn_transformer_forward(x, lengths, kp):
    Bn, Tn, _ = x.shape
    lengths_f = lengths.astype(jnp.float32).reshape(Bn, 1)
    return pl.pallas_call(
        fused_kernel,
        out_shape=jax.ShapeDtypeStruct((Bn, EMBEDDING_SIZE), jnp.float32),
        in_specs=[_VMEM] * 22,
        out_specs=_VMEM,
        scratch_shapes=[pltpu.VMEM((Bn, Tn, D_MODEL), jnp.float32)],
    )(x, lengths_f,
      kp["gru_wih"], kp["gru_whh"], kp["gru_bi"], kp["gru_bhn"],
      kp["wqkv"], kp["bqkv"], kp["wo"], kp["ob"],
      kp["ln1w"], kp["ln1b"], kp["ff1w"], kp["ff1b"], kp["ff2w"], kp["ff2b"],
      kp["ln2w"], kp["ln2b"],
      kp["hw1"], kp["hb1"], kp["hw2"], kp["hb2"])


rnn_transformer_forward = jax.jit(rnn_transformer_forward)


# ================= deterministic PyTorch-style parameters =================
def init_torch_style_params(key):
    keys = iter(jax.random.split(key, 128))

    def w(shape, scale=0.1):
        return (scale * jax.random.normal(next(keys), shape)).astype(jnp.float32)

    p = {}
    p["gru"] = dict(                                   # PyTorch GRU layouts / gate order r,z,n
        weight_ih=w((3 * D_MODEL, NUM_FEATURES)),
        weight_hh=w((3 * D_MODEL, D_MODEL)),
        bias_ih=w((3 * D_MODEL,), 0.05),
        bias_hh=w((3 * D_MODEL,), 0.05),
    )
    layers = []
    for _ in range(NUM_LAYERS):
        layers.append(dict(
            in_proj_weight=w((3 * D_MODEL, D_MODEL)),
            in_proj_bias=w((3 * D_MODEL,), 0.05),
            out_proj_weight=w((D_MODEL, D_MODEL)),
            out_proj_bias=w((D_MODEL,), 0.05),
            ln1_w=jnp.ones((D_MODEL,), jnp.float32),
            ln1_b=jnp.zeros((D_MODEL,), jnp.float32),
            lin1_w=w((DIM_FEEDFORWARD, D_MODEL)),
            lin1_b=w((DIM_FEEDFORWARD,), 0.05),
            lin2_w=w((D_MODEL, DIM_FEEDFORWARD)),
            lin2_b=w((D_MODEL,), 0.05),
            ln2_w=jnp.ones((D_MODEL,), jnp.float32),
            ln2_b=jnp.zeros((D_MODEL,), jnp.float32),
        ))
    p["layers"] = layers
    p["head"] = dict(
        w1=w((D_MODEL, D_MODEL)), b1=w((D_MODEL,), 0.05),
        w2=w((EMBEDDING_SIZE, D_MODEL)), b2=w((EMBEDDING_SIZE,), 0.05),
    )
    return p


def prepare_kernel_params(p):
    """Host-side one-time repack: transpose, per-head split+fuse, bias/scale folding."""
    H, HD = D_MODEL, HEAD_DIM
    g = p["gru"]
    # r/z biases of b_hh folded into the hoisted input-projection bias; b_hn kept
    # separate because it sits inside the r-gated term.
    b_i = g["bias_ih"] + jnp.concatenate([g["bias_hh"][:2 * H], jnp.zeros((H,), jnp.float32)])
    kp = dict(
        gru_wih=g["weight_ih"].T,                                   # (F, 3H)
        gru_whh=g["weight_hh"].T,                                   # (H, 3H)
        gru_bi=b_i.reshape(1, 3 * H),
        gru_bhn=g["bias_hh"][2 * H:].reshape(1, H),
    )

    scale = 1.0 / math.sqrt(HD)
    acc = {k: [] for k in ("wqkv", "bqkv", "wo", "ob",
                           "ln1w", "ln1b", "ff1w", "ff1b", "ff2w", "ff2b", "ln2w", "ln2b")}
    for lp in p["layers"]:
        Wq, Wk, Wv = (lp["in_proj_weight"][i * H:(i + 1) * H] for i in range(3))
        bq, bk, bv = (lp["in_proj_bias"][i * H:(i + 1) * H] for i in range(3))
        Wo = lp["out_proj_weight"]
        wqkv_h, bqkv_h, wo_h = [], [], []
        for h in range(NHEAD):
            sl = slice(h * HD, (h + 1) * HD)
            wqkv_h.append(jnp.concatenate(
                [Wq[sl].T * scale, Wk[sl].T, Wv[sl].T], axis=1))     # (D, 3*HD), q pre-scaled
            bqkv_h.append(jnp.concatenate(
                [bq[sl] * scale, bk[sl], bv[sl]]).reshape(1, 3 * HD))
            wo_h.append(Wo[:, sl].T)                                 # (HD, D)
        acc["wqkv"].append(jnp.stack(wqkv_h))                        # (NH, D, 3*HD)
        acc["bqkv"].append(jnp.stack(bqkv_h))                        # (NH, 1, 3*HD)
        acc["wo"].append(jnp.stack(wo_h))                            # (NH, HD, D)
        acc["ob"].append(lp["out_proj_bias"].reshape(1, H))
        acc["ln1w"].append(lp["ln1_w"].reshape(1, H)); acc["ln1b"].append(lp["ln1_b"].reshape(1, H))
        acc["ff1w"].append(lp["lin1_w"].T); acc["ff1b"].append(lp["lin1_b"].reshape(1, DIM_FEEDFORWARD))
        acc["ff2w"].append(lp["lin2_w"].T); acc["ff2b"].append(lp["lin2_b"].reshape(1, H))
        acc["ln2w"].append(lp["ln2_w"].reshape(1, H)); acc["ln2b"].append(lp["ln2_b"].reshape(1, H))
    for k, v in acc.items():
        kp[k] = jnp.stack(v)                                        # leading layer axis

    hd = p["head"]
    kp.update(hw1=hd["w1"].T, hb1=hd["b1"].reshape(1, D_MODEL),
              hw2=hd["w2"].T, hb2=hd["b2"].reshape(1, EMBEDDING_SIZE))
    return kp


if __name__ == "__main__":
    key = jax.random.PRNGKey(0)
    k_x, k_p = jax.random.split(key)
    x = jax.random.normal(k_x, (B, T, NUM_FEATURES), dtype=jnp.float32)
    lengths = jnp.array([T, 5], dtype=jnp.int32)

    torch_style = init_torch_style_params(k_p)
    kparams = prepare_kernel_params(torch_style)

    out = rnn_transformer_forward(x, lengths, kparams)
    out = jax.block_until_ready(out)
    assert out.shape == (B, EMBEDDING_SIZE) and out.dtype == jnp.float32
    assert bool(jnp.all(jnp.isfinite(out)))
    print("KERNEL_OK")
</pallas_src>

<mosaic_0001>
module attributes {stable_mosaic.version = 11 : i64} {
  func.func @fused_kernel(%arg0: memref<2x8x8xf32, #tpu.memory_space<vmem>>, %arg1: memref<2x1xf32, #tpu.memory_space<vmem>>, %arg2: memref<8x96xf32, #tpu.memory_space<vmem>>, %arg3: memref<32x96xf32, #tpu.memory_space<vmem>>, %arg4: memref<1x96xf32, #tpu.memory_space<vmem>>, %arg5: memref<1x32xf32, #tpu.memory_space<vmem>>, %arg6: memref<2x4x32x24xf32, #tpu.memory_space<vmem>>, %arg7: memref<2x4x1x24xf32, #tpu.memory_space<vmem>>, %arg8: memref<2x4x8x32xf32, #tpu.memory_space<vmem>>, %arg9: memref<2x1x32xf32, #tpu.memory_space<vmem>>, %arg10: memref<2x1x32xf32, #tpu.memory_space<vmem>>, %arg11: memref<2x1x32xf32, #tpu.memory_space<vmem>>, %arg12: memref<2x32x64xf32, #tpu.memory_space<vmem>>, %arg13: memref<2x1x64xf32, #tpu.memory_space<vmem>>, %arg14: memref<2x64x32xf32, #tpu.memory_space<vmem>>, %arg15: memref<2x1x32xf32, #tpu.memory_space<vmem>>, %arg16: memref<2x1x32xf32, #tpu.memory_space<vmem>>, %arg17: memref<2x1x32xf32, #tpu.memory_space<vmem>>, %arg18: memref<32x32xf32, #tpu.memory_space<vmem>>, %arg19: memref<1x32xf32, #tpu.memory_space<vmem>>, %arg20: memref<32x16xf32, #tpu.memory_space<vmem>>, %arg21: memref<1x16xf32, #tpu.memory_space<vmem>>, %arg22: memref<2x16xf32, #tpu.memory_space<vmem>>, %arg23: memref<2x8x32xf32, #tpu.memory_space<vmem>>) attributes {dimension_semantics = [], scalar_prefetch = 0 : i64, scratch_operands = 1 : i64, tpu.core_type = #tpu.core_type<tc>} {
    %c0 = arith.constant 0 : index
    %c0_0 = arith.constant 0 : index
    %0 = vector.load %arg1[%c0, %c0_0] : memref<2x1xf32, #tpu.memory_space<vmem>>, vector<2x1xf32>
    %1 = tpu.iota {dimensions = array<i32: 1>} : vector<2x8xi32>
    %2 = arith.sitofp %1 : vector<2x8xi32> to vector<2x8xf32>
    %3 = vector.broadcast %0 : vector<2x1xf32> to vector<2x8xf32>
    %4 = arith.cmpf olt, %2, %3 : vector<2x8xf32>
    %5 = arith.extui %4 : vector<2x8xi1> to vector<2x8xi32>
    %6 = arith.sitofp %5 : vector<2x8xi32> to vector<2x8xf32>
    %cst = arith.constant 1.000000e+00 : f32
    %7 = vector.broadcast %cst : f32 to vector<2x8xf32>
    %8 = arith.subf %7, %6 : vector<2x8xf32>
    %cst_1 = arith.constant -1.000000e+30 : f32
    %9 = vector.broadcast %cst_1 : f32 to vector<2x8xf32>
    %10 = arith.mulf %8, %9 : vector<2x8xf32>
    %11 = vector.shape_cast %10 : vector<2x8xf32> to vector<2x1x8xf32>
    %12 = vector.shape_cast %6 : vector<2x8xf32> to vector<2x8x1xf32>
    %c0_2 = arith.constant 0 : index
    %c0_3 = arith.constant 0 : index
    %c0_4 = arith.constant 0 : index
    %13 = vector.load %arg0[%c0_2, %c0_3, %c0_4] : memref<2x8x8xf32, #tpu.memory_space<vmem>>, vector<2x8x8xf32>
    %14 = vector.shape_cast %13 : vector<2x8x8xf32> to vector<16x8xf32>
    %c0_5 = arith.constant 0 : index
    %c0_6 = arith.constant 0 : index
    %15 = vector.load %arg2[%c0_5, %c0_6] : memref<8x96xf32, #tpu.memory_space<vmem>>, vector<8x96xf32>
    %cst_7 = arith.constant dense<0.000000e+00> : vector<16x96xf32>
    %16 = tpu.matmul %14, %15, %cst_7 {dimension_numbers = #tpu.dot_dimension_numbers<[1], [0], [0], [1], [0, 0, 1, 1], [], []>} : vector<16x8xf32>, vector<8x96xf32>, vector<16x96xf32> -> vector<16x96xf32>
    %c0_8 = arith.constant 0 : index
    %c0_9 = arith.constant 0 : index
    %17 = vector.load %arg4[%c0_8, %c0_9] : memref<1x96xf32, #tpu.memory_space<vmem>>, vector<1x96xf32>
    %18 = vector.broadcast %17 : vector<1x96xf32> to vector<16x96xf32>
    %19 = arith.addf %16, %18 : vector<16x96xf32>
    %20 = vector.shape_cast %19 : vector<16x96xf32> to vector<2x8x96xf32>
    %c0_10 = arith.constant 0 : index
    %c0_11 = arith.constant 0 : index
    %21 = vector.load %arg3[%c0_10, %c0_11] : memref<32x96xf32, #tpu.memory_space<vmem>>, vector<32x96xf32>
    %c0_12 = arith.constant 0 : index
    %c0_13 = arith.constant 0 : index
    %22 = vector.load %arg5[%c0_12, %c0_13] : memref<1x32xf32, #tpu.memory_space<vmem>>, vector<1x32xf32>
    %cst_14 = arith.constant 0.000000e+00 : f32
    %23 = vector.broadcast %cst_14 : f32 to vector<2x32xf32>
    %24 = vector.extract_strided_slice %20 {offsets = [0, 0, 0], sizes = [2, 1, 96], strides = [1, 1, 1]} : vector<2x8x96xf32> to vector<2x1x96xf32>
    %25 = vector.shape_cast %24 : vector<2x1x96xf32> to vector<2x96xf32>
    %cst_15 = arith.constant dense<0.000000e+00> : vector<2x96xf32>
    %26 = tpu.matmul %23, %21, %cst_15 {dimension_numbers = #tpu.dot_dimension_numbers<[1], [0], [0], [1], [0, 0, 1, 1], [], []>} : vector<2x32xf32>, vector<32x96xf32>, vector<2x96xf32> -> vector<2x96xf32>
    %27 = vector.extract_strided_slice %25 {offsets = [0, 0], sizes = [2, 32], strides = [1, 1]} : vector<2x96xf32> to vector<2x32xf32>
    %28 = vector.extract_strided_slice %26 {offsets = [0, 0], sizes = [2, 32], strides = [1, 1]} : vector<2x96xf32> to vector<2x32xf32>
    %29 = arith.addf %27, %28 : vector<2x32xf32>
    %30 = arith.negf %29 : vector<2x32xf32>
    %31 = math.exp %30 : vector<2x32xf32>
    %cst_16 = arith.constant 1.000000e+00 : f32
    %32 = vector.broadcast %cst_16 : f32 to vector<2x32xf32>
    %33 = arith.addf %32, %31 : vector<2x32xf32>
    %34 = arith.divf %32, %33 : vector<2x32xf32>
    %35 = vector.extract_strided_slice %25 {offsets = [0, 32], sizes = [2, 32], strides = [1, 1]} : vector<2x96xf32> to vector<2x32xf32>
    %36 = vector.extract_strided_slice %26 {offsets = [0, 32], sizes = [2, 32], strides = [1, 1]} : vector<2x96xf32> to vector<2x32xf32>
    %37 = arith.addf %35, %36 : vector<2x32xf32>
    %38 = arith.negf %37 : vector<2x32xf32>
    %39 = math.exp %38 : vector<2x32xf32>
    %cst_17 = arith.constant 1.000000e+00 : f32
    %40 = vector.broadcast %cst_17 : f32 to vector<2x32xf32>
    %41 = arith.addf %40, %39 : vector<2x32xf32>
    %42 = arith.divf %40, %41 : vector<2x32xf32>
    %43 = vector.extract_strided_slice %25 {offsets = [0, 64], sizes = [2, 32], strides = [1, 1]} : vector<2x96xf32> to vector<2x32xf32>
    %44 = vector.extract_strided_slice %26 {offsets = [0, 64], sizes = [2, 32], strides = [1, 1]} : vector<2x96xf32> to vector<2x32xf32>
    %45 = vector.broadcast %22 : vector<1x32xf32> to vector<2x32xf32>
    %46 = arith.addf %44, %45 : vector<2x32xf32>
    %47 = arith.mulf %34, %46 : vector<2x32xf32>
    %48 = arith.addf %43, %47 : vector<2x32xf32>
    %49 = math.tanh %48 : vector<2x32xf32>
    %cst_18 = arith.constant 1.000000e+00 : f32
    %50 = vector.broadcast %cst_18 : f32 to vector<2x32xf32>
    %51 = arith.subf %50, %42 : vector<2x32xf32>
    %52 = arith.mulf %51, %49 : vector<2x32xf32>
    %53 = arith.mulf %42, %23 : vector<2x32xf32>
    %54 = arith.addf %52, %53 : vector<2x32xf32>
    %55 = vector.shape_cast %54 : vector<2x32xf32> to vector<2x1x32xf32>
    %c0_19 = arith.constant 0 : index
    %c0_20 = arith.constant 0 : index
    %c0_21 = arith.constant 0 : index
    %56 = vector.load %arg23[%c0_19, %c0_20, %c0_21] : memref<2x8x32xf32, #tpu.memory_space<vmem>>, vector<2x1x32xf32>
    tpu.vector_store %arg23[%c0_19, %c0_20, %c0_21], %55 {strides = array<i32>} : memref<2x8x32xf32, #tpu.memory_space<vmem>>, vector<2x1x32xf32>,
    %57 = vector.extract_strided_slice %20 {offsets = [0, 1, 0], sizes = [2, 1, 96], strides = [1, 1, 1]} : vector<2x8x96xf32> to vector<2x1x96xf32>
    %58 = vector.shape_cast %57 : vector<2x1x96xf32> to vector<2x96xf32>
    %cst_22 = arith.constant dense<0.000000e+00> : vector<2x96xf32>
    %59 = tpu.matmul %54, %21, %cst_22 {dimension_numbers = #tpu.dot_dimension_numbers<[1], [0], [0], [1], [0, 0, 1, 1], [], []>} : vector<2x32xf32>, vector<32x96xf32>, vector<2x96xf32> -> vector<2x96xf32>
    %60 = vector.extract_strided_slice %58 {offsets = [0, 0], sizes = [2, 32], strides = [1, 1]} : vector<2x96xf32> to vector<2x32xf32>
    %61 = vector.extract_strided_slice %59 {offsets = [0, 0], sizes = [2, 32], strides = [1, 1]} : vector<2x96xf32> to vector<2x32xf32>
    %62 = arith.addf %60, %61 : vector<2x32xf32>
    %63 = arith.negf %62 : vector<2x32xf32>
    %64 = math.exp %63 : vector<2x32xf32>
    %cst_23 = arith.constant 1.000000e+00 : f32
    %65 = vector.broadcast %cst_23 : f32 to vector<2x32xf32>
    %66 = arith.addf %65, %64 : vector<2x32xf32>
    %67 = arith.divf %65, %66 : vector<2x32xf32>
    %68 = vector.extract_strided_slice %58 {offsets = [0, 32], sizes = [2, 32], strides = [1, 1]} : vector<2x96xf32> to vector<2x32xf32>
    %69 = vector.extract_strided_slice %59 {offsets = [0, 32], sizes = [2, 32], strides = [1, 1]} : vector<2x96xf32> to vector<2x32xf32>
    %70 = arith.addf %68, %69 : vector<2x32xf32>
    %71 = arith.negf %70 : vector<2x32xf32>
    %72 = math.exp %71 : vector<2x32xf32>
    %cst_24 = arith.constant 1.000000e+00 : f32
    %73 = vector.broadcast %cst_24 : f32 to vector<2x32xf32>
    %74 = arith.addf %73, %72 : vector<2x32xf32>
    %75 = arith.divf %73, %74 : vector<2x32xf32>
    %76 = vector.extract_strided_slice %58 {offsets = [0, 64], sizes = [2, 32], strides = [1, 1]} : vector<2x96xf32> to vector<2x32xf32>
    %77 = vector.extract_strided_slice %59 {offsets = [0, 64], sizes = [2, 32], strides = [1, 1]} : vector<2x96xf32> to vector<2x32xf32>
    %78 = vector.broadcast %22 : vector<1x32xf32> to vector<2x32xf32>
    %79 = arith.addf %77, %78 : vector<2x32xf32>
    %80 = arith.mulf %67, %79 : vector<2x32xf32>
    %81 = arith.addf %76, %80 : vector<2x32xf32>
    %82 = math.tanh %81 : vector<2x32xf32>
    %cst_25 = arith.constant 1.000000e+00 : f32
    %83 = vector.broadcast %cst_25 : f32 to vector<2x32xf32>
    %84 = arith.subf %83, %75 : vector<2x32xf32>
    %85 = arith.mulf %84, %82 : vector<2x32xf32>
    %86 = arith.mulf %75, %54 : vector<2x32xf32>
    %87 = arith.addf %85, %86 : vector<2x32xf32>
    %88 = vector.shape_cast %87 : vector<2x32xf32> to vector<2x1x32xf32>
    %c0_26 = arith.constant 0 : index
    %c1 = arith.constant 1 : index
    %c0_27 = arith.constant 0 : index
    %89 = vector.load %arg23[%c0_26, %c1, %c0_27] : memref<2x8x32xf32, #tpu.memory_space<vmem>>, vector<2x1x32xf32>
    tpu.vector_store %arg23[%c0_26, %c1, %c0_27], %88 {strides = array<i32>} : memref<2x8x32xf32, #tpu.memory_space<vmem>>, vector<2x1x32xf32>,
    %90 = vector.extract_strided_slice %20 {offsets = [0, 2, 0], sizes = [2, 1, 96], strides = [1, 1, 1]} : vector<2x8x96xf32> to vector<2x1x96xf32>
    %91 = vector.shape_cast %90 : vector<2x1x96xf32> to vector<2x96xf32>
    %cst_28 = arith.constant dense<0.000000e+00> : vector<2x96xf32>
    %92 = tpu.matmul %87, %21, %cst_28 {dimension_numbers = #tpu.dot_dimension_numbers<[1], [0], [0], [1], [0, 0, 1, 1], [], []>} : vector<2x32xf32>, vector<32x96xf32>, vector<2x96xf32> -> vector<2x96xf32>
    %93 = vector.extract_strided_slice %91 {offsets = [0, 0], sizes = [2, 32], strides = [1, 1]} : vector<2x96xf32> to vector<2x32xf32>
    %94 = vector.extract_strided_slice %92 {offsets = [0, 0], sizes = [2, 32], strides = [1, 1]} : vector<2x96xf32> to vector<2x32xf32>
    %95 = arith.addf %93, %94 : vector<2x32xf32>
    %96 = arith.negf %95 : vector<2x32xf32>
    %97 = math.exp %96 : vector<2x32xf32>
    %cst_29 = arith.constant 1.000000e+00 : f32
    %98 = vector.broadcast %cst_29 : f32 to vector<2x32xf32>
    %99 = arith.addf %98, %97 : vector<2x32xf32>
    %100 = arith.divf %98, %99 : vector<2x32xf32>
    %101 = vector.extract_strided_slice %91 {offsets = [0, 32], sizes = [2, 32], strides = [1, 1]} : vector<2x96xf32> to vector<2x32xf32>
    %102 = vector.extract_strided_slice %92 {offsets = [0, 32], sizes = [2, 32], strides = [1, 1]} : vector<2x96xf32> to vector<2x32xf32>
    %103 = arith.addf %101, %102 : vector<2x32xf32>
    %104 = arith.negf %103 : vector<2x32xf32>
    %105 = math.exp %104 : vector<2x32xf32>
    %cst_30 = arith.constant 1.000000e+00 : f32
    %106 = vector.broadcast %cst_30 : f32 to vector<2x32xf32>
    %107 = arith.addf %106, %105 : vector<2x32xf32>
    %108 = arith.divf %106, %107 : vector<2x32xf32>
    %109 = vector.extract_strided_slice %91 {offsets = [0, 64], sizes = [2, 32], strides = [1, 1]} : vector<2x96xf32> to vector<2x32xf32>
    %110 = vector.extract_strided_slice %92 {offsets = [0, 64], sizes = [2, 32], strides = [1, 1]} : vector<2x96xf32> to vector<2x32xf32>
    %111 = vector.broadcast %22 : vector<1x32xf32> to vector<2x32xf32>
    %112 = arith.addf %110, %111 : vector<2x32xf32>
    %113 = arith.mulf %100, %112 : vector<2x32xf32>
    %114 = arith.addf %109, %113 : vector<2x32xf32>
    %115 = math.tanh %114 : vector<2x32xf32>
    %cst_31 = arith.constant 1.000000e+00 : f32
    %116 = vector.broadcast %cst_31 : f32 to vector<2x32xf32>
    %117 = arith.subf %116, %108 : vector<2x32xf32>
    %118 = arith.mulf %117, %115 : vector<2x32xf32>
    %119 = arith.mulf %108, %87 : vector<2x32xf32>
    %120 = arith.addf %118, %119 : vector<2x32xf32>
    %121 = vector.shape_cast %120 : vector<2x32xf32> to vector<2x1x32xf32>
    %c0_32 = arith.constant 0 : index
    %c2 = arith.constant 2 : index
    %c0_33 = arith.constant 0 : index
    %122 = vector.load %arg23[%c0_32, %c2, %c0_33] : memref<2x8x32xf32, #tpu.memory_space<vmem>>, vector<2x1x32xf32>
    tpu.vector_store %arg23[%c0_32, %c2, %c0_33], %121 {strides = array<i32>} : memref<2x8x32xf32, #tpu.memory_space<vmem>>, vector<2x1x32xf32>,
    %123 = vector.extract_strided_slice %20 {offsets = [0, 3, 0], sizes = [2, 1, 96], strides = [1, 1, 1]} : vector<2x8x96xf32> to vector<2x1x96xf32>
    %124 = vector.shape_cast %123 : vector<2x1x96xf32> to vector<2x96xf32>
    %cst_34 = arith.constant dense<0.000000e+00> : vector<2x96xf32>
    %125 = tpu.matmul %120, %21, %cst_34 {dimension_numbers = #tpu.dot_dimension_numbers<[1], [0], [0], [1], [0, 0, 1, 1], [], []>} : vector<2x32xf32>, vector<32x96xf32>, vector<2x96xf32> -> vector<2x96xf32>
    %126 = vector.extract_strided_slice %124 {offsets = [0, 0], sizes = [2, 32], strides = [1, 1]} : vector<2x96xf32> to vector<2x32xf32>
    %127 = vector.extract_strided_slice %125 {offsets = [0, 0], sizes = [2, 32], strides = [1, 1]} : vector<2x96xf32> to vector<2x32xf32>
    %128 = arith.addf %126, %127 : vector<2x32xf32>
    %129 = arith.negf %128 : vector<2x32xf32>
    %130 = math.exp %129 : vector<2x32xf32>
    %cst_35 = arith.constant 1.000000e+00 : f32
    %131 = vector.broadcast %cst_35 : f32 to vector<2x32xf32>
    %132 = arith.addf %131, %130 : vector<2x32xf32>
    %133 = arith.divf %131, %132 : vector<2x32xf32>
    %134 = vector.extract_strided_slice %124 {offsets = [0, 32], sizes = [2, 32], strides = [1, 1]} : vector<2x96xf32> to vector<2x32xf32>
    %135 = vector.extract_strided_slice %125 {offsets = [0, 32], sizes = [2, 32], strides = [1, 1]} : vector<2x96xf32> to vector<2x32xf32>
    %136 = arith.addf %134, %135 : vector<2x32xf32>
    %137 = arith.negf %136 : vector<2x32xf32>
    %138 = math.exp %137 : vector<2x32xf32>
    %cst_36 = arith.constant 1.000000e+00 : f32
    %139 = vector.broadcast %cst_36 : f32 to vector<2x32xf32>
    %140 = arith.addf %139, %138 : vector<2x32xf32>
    %141 = arith.divf %139, %140 : vector<2x32xf32>
    %142 = vector.extract_strided_slice %124 {offsets = [0, 64], sizes = [2, 32], strides = [1, 1]} : vector<2x96xf32> to vector<2x32xf32>
    %143 = vector.extract_strided_slice %125 {offsets = [0, 64], sizes = [2, 32], strides = [1, 1]} : vector<2x96xf32> to vector<2x32xf32>
    %144 = vector.broadcast %22 : vector<1x32xf32> to vector<2x32xf32>
    %145 = arith.addf %143, %144 : vector<2x32xf32>
    %146 = arith.mulf %133, %145 : vector<2x32xf32>
    %147 = arith.addf %142, %146 : vector<2x32xf32>
    %148 = math.tanh %147 : vector<2x32xf32>
    %cst_37 = arith.constant 1.000000e+00 : f32
    %149 = vector.broadcast %cst_37 : f32 to vector<2x32xf32>
    %150 = arith.subf %149, %141 : vector<2x32xf32>
    %151 = arith.mulf %150, %148 : vector<2x32xf32>
    %152 = arith.mulf %141, %120 : vector<2x32xf32>
    %153 = arith.addf %151, %152 : vector<2x32xf32>
    %154 = vector.shape_cast %153 : vector<2x32xf32> to vector<2x1x32xf32>
    %c0_38 = arith.constant 0 : index
    %c3 = arith.constant 3 : index
    %c0_39 = arith.constant 0 : index
    %155 = vector.load %arg23[%c0_38, %c3, %c0_39] : memref<2x8x32xf32, #tpu.memory_space<vmem>>, vector<2x1x32xf32>
    tpu.vector_store %arg23[%c0_38, %c3, %c0_39], %154 {strides = array<i32>} : memref<2x8x32xf32, #tpu.memory_space<vmem>>, vector<2x1x32xf32>,
    %156 = vector.extract_strided_slice %20 {offsets = [0, 4, 0], sizes = [2, 1, 96], strides = [1, 1, 1]} : vector<2x8x96xf32> to vector<2x1x96xf32>
    %157 = vector.shape_cast %156 : vector<2x1x96xf32> to vector<2x96xf32>
    %cst_40 = arith.constant dense<0.000000e+00> : vector<2x96xf32>
    %158 = tpu.matmul %153, %21, %cst_40 {dimension_numbers = #tpu.dot_dimension_numbers<[1], [0], [0], [1], [0, 0, 1, 1], [], []>} : vector<2x32xf32>, vector<32x96xf32>, vector<2x96xf32> -> vector<2x96xf32>
    %159 = vector.extract_strided_slice %157 {offsets = [0, 0], sizes = [2, 32], strides = [1, 1]} : vector<2x96xf32> to vector<2x32xf32>
    %160 = vector.extract_strided_slice %158 {offsets = [0, 0], sizes = [2, 32], strides = [1, 1]} : vector<2x96xf32> to vector<2x32xf32>
    %161 = arith.addf %159, %160 : vector<2x32xf32>
    %162 = arith.negf %161 : vector<2x32xf32>
    %163 = math.exp %162 : vector<2x32xf32>
    %cst_41 = arith.constant 1.000000e+00 : f32
    %164 = vector.broadcast %cst_41 : f32 to vector<2x32xf32>
    %165 = arith.addf %164, %163 : vector<2x32xf32>
    %166 = arith.divf %164, %165 : vector<2x32xf32>
    %167 = vector.extract_strided_slice %157 {offsets = [0, 32], sizes = [2, 32], strides = [1, 1]} : vector<2x96xf32> to vector<2x32xf32>
    %168 = vector.extract_strided_slice %158 {offsets = [0, 32], sizes = [2, 32], strides = [1, 1]} : vector<2x96xf32> to vector<2x32xf32>
    %169 = arith.addf %167, %168 : vector<2x32xf32>
    %170 = arith.negf %169 : vector<2x32xf32>
    %171 = math.exp %170 : vector<2x32xf32>
    %cst_42 = arith.constant 1.000000e+00 : f32
    %172 = vector.broadcast %cst_42 : f32 to vector<2x32xf32>
    %173 = arith.addf %172, %171 : vector<2x32xf32>
    %174 = arith.divf %172, %173 : vector<2x32xf32>
    %175 = vector.extract_strided_slice %157 {offsets = [0, 64], sizes = [2, 32], strides = [1, 1]} : vector<2x96xf32> to vector<2x32xf32>
    %176 = vector.extract_strided_slice %158 {offsets = [0, 64], sizes = [2, 32], strides = [1, 1]} : vector<2x96xf32> to vector<2x32xf32>
    %177 = vector.broadcast %22 : vector<1x32xf32> to vector<2x32xf32>
    %178 = arith.addf %176, %177 : vector<2x32xf32>
    %179 = arith.mulf %166, %178 : vector<2x32xf32>
    %180 = arith.addf %175, %179 : vector<2x32xf32>
    %181 = math.tanh %180 : vector<2x32xf32>
    %cst_43 = arith.constant 1.000000e+00 : f32
    %182 = vector.broadcast %cst_43 : f32 to vector<2x32xf32>
    %183 = arith.subf %182, %174 : vector<2x32xf32>
    %184 = arith.mulf %183, %181 : vector<2x32xf32>
    %185 = arith.mulf %174, %153 : vector<2x32xf32>
    %186 = arith.addf %184, %185 : vector<2x32xf32>
    %187 = vector.shape_cast %186 : vector<2x32xf32> to vector<2x1x32xf32>
    %c0_44 = arith.constant 0 : index
    %c4 = arith.constant 4 : index
    %c0_45 = arith.constant 0 : index
    %188 = vector.load %arg23[%c0_44, %c4, %c0_45] : memref<2x8x32xf32, #tpu.memory_space<vmem>>, vector<2x1x32xf32>
    tpu.vector_store %arg23[%c0_44, %c4, %c0_45], %187 {strides = array<i32>} : memref<2x8x32xf32, #tpu.memory_space<vmem>>, vector<2x1x32xf32>,
    %189 = vector.extract_strided_slice %20 {offsets = [0, 5, 0], sizes = [2, 1, 96], strides = [1, 1, 1]} : vector<2x8x96xf32> to vector<2x1x96xf32>
    %190 = vector.shape_cast %189 : vector<2x1x96xf32> to vector<2x96xf32>
    %cst_46 = arith.constant dense<0.000000e+00> : vector<2x96xf32>
    %191 = tpu.matmul %186, %21, %cst_46 {dimension_numbers = #tpu.dot_dimension_numbers<[1], [0], [0], [1], [0, 0, 1, 1], [], []>} : vector<2x32xf32>, vector<32x96xf32>, vector<2x96xf32> -> vector<2x96xf32>
    %192 = vector.extract_strided_slice %190 {offsets = [0, 0], sizes = [2, 32], strides = [1, 1]} : vector<2x96xf32> to vector<2x32xf32>
    %193 = vector.extract_strided_slice %191 {offsets = [0, 0], sizes = [2, 32], strides = [1, 1]} : vector<2x96xf32> to vector<2x32xf32>
    %194 = arith.addf %192, %193 : vector<2x32xf32>
    %195 = arith.negf %194 : vector<2x32xf32>
    %196 = math.exp %195 : vector<2x32xf32>
    %cst_47 = arith.constant 1.000000e+00 : f32
    %197 = vector.broadcast %cst_47 : f32 to vector<2x32xf32>
    %198 = arith.addf %197, %196 : vector<2x32xf32>
    %199 = arith.divf %197, %198 : vector<2x32xf32>
    %200 = vector.extract_strided_slice %190 {offsets = [0, 32], sizes = [2, 32], strides = [1, 1]} : vector<2x96xf32> to vector<2x32xf32>
    %201 = vector.extract_strided_slice %191 {offsets = [0, 32], sizes = [2, 32], strides = [1, 1]} : vector<2x96xf32> to vector<2x32xf32>
    %202 = arith.addf %200, %201 : vector<2x32xf32>
    %203 = arith.negf %202 : vector<2x32xf32>
    %204 = math.exp %203 : vector<2x32xf32>
    %cst_48 = arith.constant 1.000000e+00 : f32
    %205 = vector.broadcast %cst_48 : f32 to vector<2x32xf32>
    %206 = arith.addf %205, %204 : vector<2x32xf32>
    %207 = arith.divf %205, %206 : vector<2x32xf32>
    %208 = vector.extract_strided_slice %190 {offsets = [0, 64], sizes = [2, 32], strides = [1, 1]} : vector<2x96xf32> to vector<2x32xf32>
    %209 = vector.extract_strided_slice %191 {offsets = [0, 64], sizes = [2, 32], strides = [1, 1]} : vector<2x96xf32> to vector<2x32xf32>
    %210 = vector.broadcast %22 : vector<1x32xf32> to vector<2x32xf32>
    %211 = arith.addf %209, %210 : vector<2x32xf32>
    %212 = arith.mulf %199, %211 : vector<2x32xf32>
    %213 = arith.addf %208, %212 : vector<2x32xf32>
    %214 = math.tanh %213 : vector<2x32xf32>
    %cst_49 = arith.constant 1.000000e+00 : f32
    %215 = vector.broadcast %cst_49 : f32 to vector<2x32xf32>
    %216 = arith.subf %215, %207 : vector<2x32xf32>
    %217 = arith.mulf %216, %214 : vector<2x32xf32>
    %218 = arith.mulf %207, %186 : vector<2x32xf32>
    %219 = arith.addf %217, %218 : vector<2x32xf32>
    %220 = vector.shape_cast %219 : vector<2x32xf32> to vector<2x1x32xf32>
    %c0_50 = arith.constant 0 : index
    %c5 = arith.constant 5 : index
    %c0_51 = arith.constant 0 : index
    %221 = vector.load %arg23[%c0_50, %c5, %c0_51] : memref<2x8x32xf32, #tpu.memory_space<vmem>>, vector<2x1x32xf32>
    tpu.vector_store %arg23[%c0_50, %c5, %c0_51], %220 {strides = array<i32>} : memref<2x8x32xf32, #tpu.memory_space<vmem>>, vector<2x1x32xf32>,
    %222 = vector.extract_strided_slice %20 {offsets = [0, 6, 0], sizes = [2, 1, 96], strides = [1, 1, 1]} : vector<2x8x96xf32> to vector<2x1x96xf32>
    %223 = vector.shape_cast %222 : vector<2x1x96xf32> to vector<2x96xf32>
    %cst_52 = arith.constant dense<0.000000e+00> : vector<2x96xf32>
    %224 = tpu.matmul %219, %21, %cst_52 {dimension_numbers = #tpu.dot_dimension_numbers<[1], [0], [0], [1], [0, 0, 1, 1], [], []>} : vector<2x32xf32>, vector<32x96xf32>, vector<2x96xf32> -> vector<2x96xf32>
    %225 = vector.extract_strided_slice %223 {offsets = [0, 0], sizes = [2, 32], strides = [1, 1]} : vector<2x96xf32> to vector<2x32xf32>
    %226 = vector.extract_strided_slice %224 {offsets = [0, 0], sizes = [2, 32], strides = [1, 1]} : vector<2x96xf32> to vector<2x32xf32>
    %227 = arith.addf %225, %226 : vector<2x32xf32>
    %228 = arith.negf %227 : vector<2x32xf32>
    %229 = math.exp %228 : vector<2x32xf32>
    %cst_53 = arith.constant 1.000000e+00 : f32
    %230 = vector.broadcast %cst_53 : f32 to vector<2x32xf32>
    %231 = arith.addf %230, %229 : vector<2x32xf32>
    %232 = arith.divf %230, %231 : vector<2x32xf32>
    %233 = vector.extract_strided_slice %223 {offsets = [0, 32], sizes = [2, 32], strides = [1, 1]} : vector<2x96xf32> to vector<2x32xf32>
    %234 = vector.extract_strided_slice %224 {offsets = [0, 32], sizes = [2, 32], strides = [1, 1]} : vector<2x96xf32> to vector<2x32xf32>
    %235 = arith.addf %233, %234 : vector<2x32xf32>
    %236 = arith.negf %235 : vector<2x32xf32>
    %237 = math.exp %236 : vector<2x32xf32>
    %cst_54 = arith.constant 1.000000e+00 : f32
    %238 = vector.broadcast %cst_54 : f32 to vector<2x32xf32>
    %239 = arith.addf %238, %237 : vector<2x32xf32>
    %240 = arith.divf %238, %239 : vector<2x32xf32>
    %241 = vector.extract_strided_slice %223 {offsets = [0, 64], sizes = [2, 32], strides = [1, 1]} : vector<2x96xf32> to vector<2x32xf32>
    %242 = vector.extract_strided_slice %224 {offsets = [0, 64], sizes = [2, 32], strides = [1, 1]} : vector<2x96xf32> to vector<2x32xf32>
    %243 = vector.broadcast %22 : vector<1x32xf32> to vector<2x32xf32>
    %244 = arith.addf %242, %243 : vector<2x32xf32>
    %245 = arith.mulf %232, %244 : vector<2x32xf32>
    %246 = arith.addf %241, %245 : vector<2x32xf32>
    %247 = math.tanh %246 : vector<2x32xf32>
    %cst_55 = arith.constant 1.000000e+00 : f32
    %248 = vector.broadcast %cst_55 : f32 to vector<2x32xf32>
    %249 = arith.subf %248, %240 : vector<2x32xf32>
    %250 = arith.mulf %249, %247 : vector<2x32xf32>
    %251 = arith.mulf %240, %219 : vector<2x32xf32>
    %252 = arith.addf %250, %251 : vector<2x32xf32>
    %253 = vector.shape_cast %252 : vector<2x32xf32> to vector<2x1x32xf32>
    %c0_56 = arith.constant 0 : index
    %c6 = arith.constant 6 : index
    %c0_57 = arith.constant 0 : index
    %254 = vector.load %arg23[%c0_56, %c6, %c0_57] : memref<2x8x32xf32, #tpu.memory_space<vmem>>, vector<2x1x32xf32>
    tpu.vector_store %arg23[%c0_56, %c6, %c0_57], %253 {strides = array<i32>} : memref<2x8x32xf32, #tpu.memory_space<vmem>>, vector<2x1x32xf32>,
    %255 = vector.extract_strided_slice %20 {offsets = [0, 7, 0], sizes = [2, 1, 96], strides = [1, 1, 1]} : vector<2x8x96xf32> to vector<2x1x96xf32>
    %256 = vector.shape_cast %255 : vector<2x1x96xf32> to vector<2x96xf32>
    %cst_58 = arith.constant dense<0.000000e+00> : vector<2x96xf32>
    %257 = tpu.matmul %252, %21, %cst_58 {dimension_numbers = #tpu.dot_dimension_numbers<[1], [0], [0], [1], [0, 0, 1, 1], [], []>} : vector<2x32xf32>, vector<32x96xf32>, vector<2x96xf32> -> vector<2x96xf32>
    %258 = vector.extract_strided_slice %256 {offsets = [0, 0], sizes = [2, 32], strides = [1, 1]} : vector<2x96xf32> to vector<2x32xf32>
    %259 = vector.extract_strided_slice %257 {offsets = [0, 0], sizes = [2, 32], strides = [1, 1]} : vector<2x96xf32> to vector<2x32xf32>
    %260 = arith.addf %258, %259 : vector<2x32xf32>
    %261 = arith.negf %260 : vector<2x32xf32>
    %262 = math.exp %261 : vector<2x32xf32>
    %cst_59 = arith.constant 1.000000e+00 : f32
    %263 = vector.broadcast %cst_59 : f32 to vector<2x32xf32>
    %264 = arith.addf %263, %262 : vector<2x32xf32>
    %265 = arith.divf %263, %264 : vector<2x32xf32>
    %266 = vector.extract_strided_slice %256 {offsets = [0, 32], sizes = [2, 32], strides = [1, 1]} : vector<2x96xf32> to vector<2x32xf32>
    %267 = vector.extract_strided_slice %257 {offsets = [0, 32], sizes = [2, 32], strides = [1, 1]} : vector<2x96xf32> to vector<2x32xf32>
    %268 = arith.addf %266, %267 : vector<2x32xf32>
    %269 = arith.negf %268 : vector<2x32xf32>
    %270 = math.exp %269 : vector<2x32xf32>
    %cst_60 = arith.constant 1.000000e+00 : f32
    %271 = vector.broadcast %cst_60 : f32 to vector<2x32xf32>
    %272 = arith.addf %271, %270 : vector<2x32xf32>
    %273 = arith.divf %271, %272 : vector<2x32xf32>
    %274 = vector.extract_strided_slice %256 {offsets = [0, 64], sizes = [2, 32], strides = [1, 1]} : vector<2x96xf32> to vector<2x32xf32>
    %275 = vector.extract_strided_slice %257 {offsets = [0, 64], sizes = [2, 32], strides = [1, 1]} : vector<2x96xf32> to vector<2x32xf32>
    %276 = vector.broadcast %22 : vector<1x32xf32> to vector<2x32xf32>
    %277 = arith.addf %275, %276 : vector<2x32xf32>
    %278 = arith.mulf %265, %277 : vector<2x32xf32>
    %279 = arith.addf %274, %278 : vector<2x32xf32>
    %280 = math.tanh %279 : vector<2x32xf32>
    %cst_61 = arith.constant 1.000000e+00 : f32
    %281 = vector.broadcast %cst_61 : f32 to vector<2x32xf32>
    %282 = arith.subf %281, %273 : vector<2x32xf32>
    %283 = arith.mulf %282, %280 : vector<2x32xf32>
    %284 = arith.mulf %273, %252 : vector<2x32xf32>
    %285 = arith.addf %283, %284 : vector<2x32xf32>
    %286 = vector.shape_cast %285 : vector<2x32xf32> to vector<2x1x32xf32>
    %c0_62 = arith.constant 0 : index
    %c7 = arith.constant 7 : index
    %c0_63 = arith.constant 0 : index
    %287 = vector.load %arg23[%c0_62, %c7, %c0_63] : memref<2x8x32xf32, #tpu.memory_space<vmem>>, vector<2x1x32xf32>
    tpu.vector_store %arg23[%c0_62, %c7, %c0_63], %286 {strides = array<i32>} : memref<2x8x32xf32, #tpu.memory_space<vmem>>, vector<2x1x32xf32>,
    %c0_64 = arith.constant 0 : index
    %c0_65 = arith.constant 0 : index
    %c0_66 = arith.constant 0 : index
    %288 = vector.load %arg23[%c0_64, %c0_65, %c0_66] : memref<2x8x32xf32, #tpu.memory_space<vmem>>, vector<2x8x32xf32>
    %289 = vector.shape_cast %288 : vector<2x8x32xf32> to vector<16x32xf32>
    %c0_67 = arith.constant 0 : index
    %c0_68 = arith.constant 0 : index
    %c0_69 = arith.constant 0 : index
    %290 = vector.load %arg9[%c0_67, %c0_68, %c0_69] : memref<2x1x32xf32, #tpu.memory_space<vmem>>, vector<1x1x32xf32>
    %291 = vector.shape_cast %290 : vector<1x1x32xf32> to vector<1x32xf32>
    %c0_70 = arith.constant 0 : index
    %c0_71 = arith.constant 0 : index
    %c0_72 = arith.constant 0 : index
    %c0_73 = arith.constant 0 : index
    %292 = vector.load %arg6[%c0_70, %c0_71, %c0_72, %c0_73] : memref<2x4x32x24xf32, #tpu.memory_space<vmem>>, vector<1x1x32x24xf32>
    %293 = vector.shape_cast %292 : vector<1x1x32x24xf32> to vector<32x24xf32>
    %cst_74 = arith.constant dense<0.000000e+00> : vector<16x24xf32>
    %294 = tpu.matmul %289, %293, %cst_74 {dimension_numbers = #tpu.dot_dimension_numbers<[1], [0], [0], [1], [0, 0, 1, 1], [], []>} : vector<16x32xf32>, vector<32x24xf32>, vector<16x24xf32> -> vector<16x24xf32>
    %c0_75 = arith.constant 0 : index
    %c0_76 = arith.constant 0 : index
    %c0_77 = arith.constant 0 : index
    %c0_78 = arith.constant 0 : index
    %295 = vector.load %arg7[%c0_75, %c0_76, %c0_77, %c0_78] : memref<2x4x1x24xf32, #tpu.memory_space<vmem>>, vector<1x1x1x24xf32>
    %296 = vector.shape_cast %295 : vector<1x1x1x24xf32> to vector<1x24xf32>
    %297 = vector.broadcast %296 : vector<1x24xf32> to vector<16x24xf32>
    %298 = arith.addf %294, %297 : vector<16x24xf32>
    %299 = vector.extract_strided_slice %298 {offsets = [0, 0], sizes = [16, 8], strides = [1, 1]} : vector<16x24xf32> to vector<16x8xf32>
    %300 = vector.shape_cast %299 : vector<16x8xf32> to vector<2x8x8xf32>
    %301 = vector.extract_strided_slice %298 {offsets = [0, 8], sizes = [16, 8], strides = [1, 1]} : vector<16x24xf32> to vector<16x8xf32>
    %302 = vector.shape_cast %301 : vector<16x8xf32> to vector<2x8x8xf32>
    %303 = vector.extract_strided_slice %298 {offsets = [0, 16], sizes = [16, 8], strides = [1, 1]} : vector<16x24xf32> to vector<16x8xf32>
    %304 = vector.shape_cast %303 : vector<16x8xf32> to vector<2x8x8xf32>
    "tpu.trace_start"() <{level = 10 : i32, message = "bqd,bkd->bqk"}> : () -> ()
    %cst_79 = arith.constant dense<0.000000e+00> : vector<2x8x8xf32>
    %305 = tpu.matmul %300, %302, %cst_79 {dimension_numbers = #tpu.dot_dimension_numbers<[2], [2], [1], [1], [0, 0, 0, 1, 1, 1], [0], [0]>} : vector<2x8x8xf32>, vector<2x8x8xf32>, vector<2x8x8xf32> -> vector<2x8x8xf32>
    "tpu.trace_stop"() : () -> ()
    %306 = vector.broadcast %11 : vector<2x1x8xf32> to vector<2x8x8xf32>
    %307 = arith.addf %305, %306 : vector<2x8x8xf32>
    %cst_80 = arith.constant dense<0xFF800000> : vector<2x8xf32>
    %308 = vector.multi_reduction <maximumf>, %307, %cst_80 [2] : vector<2x8x8xf32> to vector<2x8xf32>
    %309 = vector.shape_cast %308 : vector<2x8xf32> to vector<2x8x1xf32>
    %310 = vector.broadcast %309 : vector<2x8x1xf32> to vector<2x8x8xf32>
    %311 = arith.subf %307, %310 : vector<2x8x8xf32>
    %312 = math.exp %311 : vector<2x8x8xf32>
    %cst_81 = arith.constant dense<0.000000e+00> : vector<2x8xf32>
    %313 = vector.multi_reduction <add>, %312, %cst_81 [2] : vector<2x8x8xf32> to vector<2x8xf32>
    %314 = vector.shape_cast %313 : vector<2x8xf32> to vector<2x8x1xf32>
    %315 = tpu.reciprocal %314 {approx = true} : vector<2x8x1xf32> -> vector<2x8x1xf32>
    %316 = vector.broadcast %315 : vector<2x8x1xf32> to vector<2x8x8xf32>
    %317 = arith.mulf %312, %316 : vector<2x8x8xf32>
    "tpu.trace_start"() <{level = 10 : i32, message = "bqk,bkd->bqd"}> : () -> ()
    %cst_82 = arith.constant dense<0.000000e+00> : vector<2x8x8xf32>
    %318 = tpu.matmul %317, %304, %cst_82 {dimension_numbers = #tpu.dot_dimension_numbers<[2], [1], [1], [2], [0, 0, 0, 1, 1, 2], [0], [0]>} : vector<2x8x8xf32>, vector<2x8x8xf32>, vector<2x8x8xf32> -> vector<2x8x8xf32>
    "tpu.trace_stop"() : () -> ()
    %319 = vector.shape_cast %318 : vector<2x8x8xf32> to vector<16x8xf32>
    %c0_83 = arith.constant 0 : index
    %c0_84 = arith.constant 0 : index
    %c0_85 = arith.constant 0 : index
    %c0_86 = arith.constant 0 : index
    %320 = vector.load %arg8[%c0_83, %c0_84, %c0_85, %c0_86] : memref<2x4x8x32xf32, #tpu.memory_space<vmem>>, vector<1x1x8x32xf32>
    %321 = vector.shape_cast %320 : vector<1x1x8x32xf32> to vector<8x32xf32>
    %cst_87 = arith.constant dense<0.000000e+00> : vector<16x32xf32>
    %322 = tpu.matmul %319, %321, %cst_87 {dimension_numbers = #tpu.dot_dimension_numbers<[1], [0], [0], [1], [0, 0, 1, 1], [], []>} : vector<16x8xf32>, vector<8x32xf32>, vector<16x32xf32> -> vector<16x32xf32>
    %323 = vector.broadcast %291 : vector<1x32xf32> to vector<16x32xf32>
    %324 = arith.addf %323, %322 : vector<16x32xf32>
    %c0_88 = arith.constant 0 : index
    %c1_89 = arith.constant 1 : index
    %c0_90 = arith.constant 0 : index
    %c0_91 = arith.constant 0 : index
    %325 = vector.load %arg6[%c0_88, %c1_89, %c0_90, %c0_91] : memref<2x4x32x24xf32, #tpu.memory_space<vmem>>, vector<1x1x32x24xf32>
    %326 = vector.shape_cast %325 : vector<1x1x32x24xf32> to vector<32x24xf32>
    %cst_92 = arith.constant dense<0.000000e+00> : vector<16x24xf32>
    %327 = tpu.matmul %289, %326, %cst_92 {dimension_numbers = #tpu.dot_dimension_numbers<[1], [0], [0], [1], [0, 0, 1, 1], [], []>} : vector<16x32xf32>, vector<32x24xf32>, vector<16x24xf32> -> vector<16x24xf32>
    %c0_93 = arith.constant 0 : index
    %c1_94 = arith.constant 1 : index
    %c0_95 = arith.constant 0 : index
    %c0_96 = arith.constant 0 : index
    %328 = vector.load %arg7[%c0_93, %c1_94, %c0_95, %c0_96] : memref<2x4x1x24xf32, #tpu.memory_space<vmem>>, vector<1x1x1x24xf32>
    %329 = vector.shape_cast %328 : vector<1x1x1x24xf32> to vector<1x24xf32>
    %330 = vector.broadcast %329 : vector<1x24xf32> to vector<16x24xf32>
    %331 = arith.addf %327, %330 : vector<16x24xf32>
    %332 = vector.extract_strided_slice %331 {offsets = [0, 0], sizes = [16, 8], strides = [1, 1]} : vector<16x24xf32> to vector<16x8xf32>
    %333 = vector.shape_cast %332 : vector<16x8xf32> to vector<2x8x8xf32>
    %334 = vector.extract_strided_slice %331 {offsets = [0, 8], sizes = [16, 8], strides = [1, 1]} : vector<16x24xf32> to vector<16x8xf32>
    %335 = vector.shape_cast %334 : vector<16x8xf32> to vector<2x8x8xf32>
    %336 = vector.extract_strided_slice %331 {offsets = [0, 16], sizes = [16, 8], strides = [1, 1]} : vector<16x24xf32> to vector<16x8xf32>
    %337 = vector.shape_cast %336 : vector<16x8xf32> to vector<2x8x8xf32>
    "tpu.trace_start"() <{level = 10 : i32, message = "bqd,bkd->bqk"}> : () -> ()
    %cst_97 = arith.constant dense<0.000000e+00> : vector<2x8x8xf32>
    %338 = tpu.matmul %333, %335, %cst_97 {dimension_numbers = #tpu.dot_dimension_numbers<[2], [2], [1], [1], [0, 0, 0, 1, 1, 1], [0], [0]>} : vector<2x8x8xf32>, vector<2x8x8xf32>, vector<2x8x8xf32> -> vector<2x8x8xf32>
    "tpu.trace_stop"() : () -> ()
    %339 = vector.broadcast %11 : vector<2x1x8xf32> to vector<2x8x8xf32>
    %340 = arith.addf %338, %339 : vector<2x8x8xf32>
    %cst_98 = arith.constant dense<0xFF800000> : vector<2x8xf32>
    %341 = vector.multi_reduction <maximumf>, %340, %cst_98 [2] : vector<2x8x8xf32> to vector<2x8xf32>
    %342 = vector.shape_cast %341 : vector<2x8xf32> to vector<2x8x1xf32>
    %343 = vector.broadcast %342 : vector<2x8x1xf32> to vector<2x8x8xf32>
    %344 = arith.subf %340, %343 : vector<2x8x8xf32>
    %345 = math.exp %344 : vector<2x8x8xf32>
    %cst_99 = arith.constant dense<0.000000e+00> : vector<2x8xf32>
    %346 = vector.multi_reduction <add>, %345, %cst_99 [2] : vector<2x8x8xf32> to vector<2x8xf32>
    %347 = vector.shape_cast %346 : vector<2x8xf32> to vector<2x8x1xf32>
    %348 = tpu.reciprocal %347 {approx = true} : vector<2x8x1xf32> -> vector<2x8x1xf32>
    %349 = vector.broadcast %348 : vector<2x8x1xf32> to vector<2x8x8xf32>
    %350 = arith.mulf %345, %349 : vector<2x8x8xf32>
    "tpu.trace_start"() <{level = 10 : i32, message = "bqk,bkd->bqd"}> : () -> ()
    %cst_100 = arith.constant dense<0.000000e+00> : vector<2x8x8xf32>
    %351 = tpu.matmul %350, %337, %cst_100 {dimension_numbers = #tpu.dot_dimension_numbers<[2], [1], [1], [2], [0, 0, 0, 1, 1, 2], [0], [0]>} : vector<2x8x8xf32>, vector<2x8x8xf32>, vector<2x8x8xf32> -> vector<2x8x8xf32>
    "tpu.trace_stop"() : () -> ()
    %352 = vector.shape_cast %351 : vector<2x8x8xf32> to vector<16x8xf32>
    %c0_101 = arith.constant 0 : index
    %c1_102 = arith.constant 1 : index
    %c0_103 = arith.constant 0 : index
    %c0_104 = arith.constant 0 : index
    %353 = vector.load %arg8[%c0_101, %c1_102, %c0_103, %c0_104] : memref<2x4x8x32xf32, #tpu.memory_space<vmem>>, vector<1x1x8x32xf32>
    %354 = vector.shape_cast %353 : vector<1x1x8x32xf32> to vector<8x32xf32>
    %cst_105 = arith.constant dense<0.000000e+00> : vector<16x32xf32>
    %355 = tpu.matmul %352, %354, %cst_105 {dimension_numbers = #tpu.dot_dimension_numbers<[1], [0], [0], [1], [0, 0, 1, 1], [], []>} : vector<16x8xf32>, vector<8x32xf32>, vector<16x32xf32> -> vector<16x32xf32>
    %356 = arith.addf %324, %355 : vector<16x32xf32>
    %c0_106 = arith.constant 0 : index
    %c2_107 = arith.constant 2 : index
    %c0_108 = arith.constant 0 : index
    %c0_109 = arith.constant 0 : index
    %357 = vector.load %arg6[%c0_106, %c2_107, %c0_108, %c0_109] : memref<2x4x32x24xf32, #tpu.memory_space<vmem>>, vector<1x1x32x24xf32>
    %358 = vector.shape_cast %357 : vector<1x1x32x24xf32> to vector<32x24xf32>
    %cst_110 = arith.constant dense<0.000000e+00> : vector<16x24xf32>
    %359 = tpu.matmul %289, %358, %cst_110 {dimension_numbers = #tpu.dot_dimension_numbers<[1], [0], [0], [1], [0, 0, 1, 1], [], []>} : vector<16x32xf32>, vector<32x24xf32>, vector<16x24xf32> -> vector<16x24xf32>
    %c0_111 = arith.constant 0 : index
    %c2_112 = arith.constant 2 : index
    %c0_113 = arith.constant 0 : index
    %c0_114 = arith.constant 0 : index
    %360 = vector.load %arg7[%c0_111, %c2_112, %c0_113, %c0_114] : memref<2x4x1x24xf32, #tpu.memory_space<vmem>>, vector<1x1x1x24xf32>
    %361 = vector.shape_cast %360 : vector<1x1x1x24xf32> to vector<1x24xf32>
    %362 = vector.broadcast %361 : vector<1x24xf32> to vector<16x24xf32>
    %363 = arith.addf %359, %362 : vector<16x24xf32>
    %364 = vector.extract_strided_slice %363 {offsets = [0, 0], sizes = [16, 8], strides = [1, 1]} : vector<16x24xf32> to vector<16x8xf32>
    %365 = vector.shape_cast %364 : vector<16x8xf32> to vector<2x8x8xf32>
    %366 = vector.extract_strided_slice %363 {offsets = [0, 8], sizes = [16, 8], strides = [1, 1]} : vector<16x24xf32> to vector<16x8xf32>
    %367 = vector.shape_cast %366 : vector<16x8xf32> to vector<2x8x8xf32>
    %368 = vector.extract_strided_slice %363 {offsets = [0, 16], sizes = [16, 8], strides = [1, 1]} : vector<16x24xf32> to vector<16x8xf32>
    %369 = vector.shape_cast %368 : vector<16x8xf32> to vector<2x8x8xf32>
    "tpu.trace_start"() <{level = 10 : i32, message = "bqd,bkd->bqk"}> : () -> ()
    %cst_115 = arith.constant dense<0.000000e+00> : vector<2x8x8xf32>
    %370 = tpu.matmul %365, %367, %cst_115 {dimension_numbers = #tpu.dot_dimension_numbers<[2], [2], [1], [1], [0, 0, 0, 1, 1, 1], [0], [0]>} : vector<2x8x8xf32>, vector<2x8x8xf32>, vector<2x8x8xf32> -> vector<2x8x8xf32>
    "tpu.trace_stop"() : () -> ()
    %371 = vector.broadcast %11 : vector<2x1x8xf32> to vector<2x8x8xf32>
    %372 = arith.addf %370, %371 : vector<2x8x8xf32>
    %cst_116 = arith.constant dense<0xFF800000> : vector<2x8xf32>
    %373 = vector.multi_reduction <maximumf>, %372, %cst_116 [2] : vector<2x8x8xf32> to vector<2x8xf32>
    %374 = vector.shape_cast %373 : vector<2x8xf32> to vector<2x8x1xf32>
    %375 = vector.broadcast %374 : vector<2x8x1xf32> to vector<2x8x8xf32>
    %376 = arith.subf %372, %375 : vector<2x8x8xf32>
    %377 = math.exp %376 : vector<2x8x8xf32>
    %cst_117 = arith.constant dense<0.000000e+00> : vector<2x8xf32>
    %378 = vector.multi_reduction <add>, %377, %cst_117 [2] : vector<2x8x8xf32> to vector<2x8xf32>
    %379 = vector.shape_cast %378 : vector<2x8xf32> to vector<2x8x1xf32>
    %380 = tpu.reciprocal %379 {approx = true} : vector<2x8x1xf32> -> vector<2x8x1xf32>
    %381 = vector.broadcast %380 : vector<2x8x1xf32> to vector<2x8x8xf32>
    %382 = arith.mulf %377, %381 : vector<2x8x8xf32>
    "tpu.trace_start"() <{level = 10 : i32, message = "bqk,bkd->bqd"}> : () -> ()
    %cst_118 = arith.constant dense<0.000000e+00> : vector<2x8x8xf32>
    %383 = tpu.matmul %382, %369, %cst_118 {dimension_numbers = #tpu.dot_dimension_numbers<[2], [1], [1], [2], [0, 0, 0, 1, 1, 2], [0], [0]>} : vector<2x8x8xf32>, vector<2x8x8xf32>, vector<2x8x8xf32> -> vector<2x8x8xf32>
    "tpu.trace_stop"() : () -> ()
    %384 = vector.shape_cast %383 : vector<2x8x8xf32> to vector<16x8xf32>
    %c0_119 = arith.constant 0 : index
    %c2_120 = arith.constant 2 : index
    %c0_121 = arith.constant 0 : index
    %c0_122 = arith.constant 0 : index
    %385 = vector.load %arg8[%c0_119, %c2_120, %c0_121, %c0_122] : memref<2x4x8x32xf32, #tpu.memory_space<vmem>>, vector<1x1x8x32xf32>
    %386 = vector.shape_cast %385 : vector<1x1x8x32xf32> to vector<8x32xf32>
    %cst_123 = arith.constant dense<0.000000e+00> : vector<16x32xf32>
    %387 = tpu.matmul %384, %386, %cst_123 {dimension_numbers = #tpu.dot_dimension_numbers<[1], [0], [0], [1], [0, 0, 1, 1], [], []>} : vector<16x8xf32>, vector<8x32xf32>, vector<16x32xf32> -> vector<16x32xf32>
    %388 = arith.addf %356, %387 : vector<16x32xf32>
    %c0_124 = arith.constant 0 : index
    %c3_125 = arith.constant 3 : index
    %c0_126 = arith.constant 0 : index
    %c0_127 = arith.constant 0 : index
    %389 = vector.load %arg6[%c0_124, %c3_125, %c0_126, %c0_127] : memref<2x4x32x24xf32, #tpu.memory_space<vmem>>, vector<1x1x32x24xf32>
    %390 = vector.shape_cast %389 : vector<1x1x32x24xf32> to vector<32x24xf32>
    %cst_128 = arith.constant dense<0.000000e+00> : vector<16x24xf32>
    %391 = tpu.matmul %289, %390, %cst_128 {dimension_numbers = #tpu.dot_dimension_numbers<[1], [0], [0], [1], [0, 0, 1, 1], [], []>} : vector<16x32xf32>, vector<32x24xf32>, vector<16x24xf32> -> vector<16x24xf32>
    %c0_129 = arith.constant 0 : index
    %c3_130 = arith.constant 3 : index
    %c0_131 = arith.constant 0 : index
    %c0_132 = arith.constant 0 : index
    %392 = vector.load %arg7[%c0_129, %c3_130, %c0_131, %c0_132] : memref<2x4x1x24xf32, #tpu.memory_space<vmem>>, vector<1x1x1x24xf32>
    %393 = vector.shape_cast %392 : vector<1x1x1x24xf32> to vector<1x24xf32>
    %394 = vector.broadcast %393 : vector<1x24xf32> to vector<16x24xf32>
    %395 = arith.addf %391, %394 : vector<16x24xf32>
    %396 = vector.extract_strided_slice %395 {offsets = [0, 0], sizes = [16, 8], strides = [1, 1]} : vector<16x24xf32> to vector<16x8xf32>
    %397 = vector.shape_cast %396 : vector<16x8xf32> to vector<2x8x8xf32>
    %398 = vector.extract_strided_slice %395 {offsets = [0, 8], sizes = [16, 8], strides = [1, 1]} : vector<16x24xf32> to vector<16x8xf32>
    %399 = vector.shape_cast %398 : vector<16x8xf32> to vector<2x8x8xf32>
    %400 = vector.extract_strided_slice %395 {offsets = [0, 16], sizes = [16, 8], strides = [1, 1]} : vector<16x24xf32> to vector<16x8xf32>
    %401 = vector.shape_cast %400 : vector<16x8xf32> to vector<2x8x8xf32>
    "tpu.trace_start"() <{level = 10 : i32, message = "bqd,bkd->bqk"}> : () -> ()
    %cst_133 = arith.constant dense<0.000000e+00> : vector<2x8x8xf32>
    %402 = tpu.matmul %397, %399, %cst_133 {dimension_numbers = #tpu.dot_dimension_numbers<[2], [2], [1], [1], [0, 0, 0, 1, 1, 1], [0], [0]>} : vector<2x8x8xf32>, vector<2x8x8xf32>, vector<2x8x8xf32> -> vector<2x8x8xf32>
    "tpu.trace_stop"() : () -> ()
    %403 = vector.broadcast %11 : vector<2x1x8xf32> to vector<2x8x8xf32>
    %404 = arith.addf %402, %403 : vector<2x8x8xf32>
    %cst_134 = arith.constant dense<0xFF800000> : vector<2x8xf32>
    %405 = vector.multi_reduction <maximumf>, %404, %cst_134 [2] : vector<2x8x8xf32> to vector<2x8xf32>
    %406 = vector.shape_cast %405 : vector<2x8xf32> to vector<2x8x1xf32>
    %407 = vector.broadcast %406 : vector<2x8x1xf32> to vector<2x8x8xf32>
    %408 = arith.subf %404, %407 : vector<2x8x8xf32>
    %409 = math.exp %408 : vector<2x8x8xf32>
    %cst_135 = arith.constant dense<0.000000e+00> : vector<2x8xf32>
    %410 = vector.multi_reduction <add>, %409, %cst_135 [2] : vector<2x8x8xf32> to vector<2x8xf32>
    %411 = vector.shape_cast %410 : vector<2x8xf32> to vector<2x8x1xf32>
    %412 = tpu.reciprocal %411 {approx = true} : vector<2x8x1xf32> -> vector<2x8x1xf32>
    %413 = vector.broadcast %412 : vector<2x8x1xf32> to vector<2x8x8xf32>
    %414 = arith.mulf %409, %413 : vector<2x8x8xf32>
    "tpu.trace_start"() <{level = 10 : i32, message = "bqk,bkd->bqd"}> : () -> ()
    %cst_136 = arith.constant dense<0.000000e+00> : vector<2x8x8xf32>
    %415 = tpu.matmul %414, %401, %cst_136 {dimension_numbers = #tpu.dot_dimension_numbers<[2], [1], [1], [2], [0, 0, 0, 1, 1, 2], [0], [0]>} : vector<2x8x8xf32>, vector<2x8x8xf32>, vector<2x8x8xf32> -> vector<2x8x8xf32>
    "tpu.trace_stop"() : () -> ()
    %416 = vector.shape_cast %415 : vector<2x8x8xf32> to vector<16x8xf32>
    %c0_137 = arith.constant 0 : index
    %c3_138 = arith.constant 3 : index
    %c0_139 = arith.constant 0 : index
    %c0_140 = arith.constant 0 : index
    %417 = vector.load %arg8[%c0_137, %c3_138, %c0_139, %c0_140] : memref<2x4x8x32xf32, #tpu.memory_space<vmem>>, vector<1x1x8x32xf32>
    %418 = vector.shape_cast %417 : vector<1x1x8x32xf32> to vector<8x32xf32>
    %cst_141 = arith.constant dense<0.000000e+00> : vector<16x32xf32>
    %419 = tpu.matmul %416, %418, %cst_141 {dimension_numbers = #tpu.dot_dimension_numbers<[1], [0], [0], [1], [0, 0, 1, 1], [], []>} : vector<16x8xf32>, vector<8x32xf32>, vector<16x32xf32> -> vector<16x32xf32>
    %420 = arith.addf %388, %419 : vector<16x32xf32>
    %421 = arith.addf %289, %420 : vector<16x32xf32>
    %c0_142 = arith.constant 0 : index
    %c0_143 = arith.constant 0 : index
    %c0_144 = arith.constant 0 : index
    %422 = vector.load %arg10[%c0_142, %c0_143, %c0_144] : memref<2x1x32xf32, #tpu.memory_space<vmem>>, vector<1x1x32xf32>
    %423 = vector.shape_cast %422 : vector<1x1x32xf32> to vector<1x32xf32>
    %c0_145 = arith.constant 0 : index
    %c0_146 = arith.constant 0 : index
    %c0_147 = arith.constant 0 : index
    %424 = vector.load %arg11[%c0_145, %c0_146, %c0_147] : memref<2x1x32xf32, #tpu.memory_space<vmem>>, vector<1x1x32xf32>
    %425 = vector.shape_cast %424 : vector<1x1x32xf32> to vector<1x32xf32>
    %cst_148 = arith.constant dense<0.000000e+00> : vector<16xf32>
    %426 = vector.multi_reduction <add>, %421, %cst_148 [1] : vector<16x32xf32> to vector<16xf32>
    %427 = vector.shape_cast %426 : vector<16xf32> to vector<16x1xf32>
    %cst_149 = arith.constant 3.200000e+01 : f32
    %428 = vector.broadcast %cst_149 : f32 to vector<16x1xf32>
    %429 = arith.divf %427, %428 : vector<16x1xf32>
    %430 = vector.broadcast %429 : vector<16x1xf32> to vector<16x32xf32>
    %431 = arith.subf %421, %430 : vector<16x32xf32>
    %432 = arith.mulf %431, %431 : vector<16x32xf32>
    %cst_150 = arith.constant dense<0.000000e+00> : vector<16xf32>
    %433 = vector.multi_reduction <add>, %432, %cst_150 [1] : vector<16x32xf32> to vector<16xf32>
    %434 = vector.shape_cast %433 : vector<16xf32> to vector<16x1xf32>
    %cst_151 = arith.constant 3.200000e+01 : f32
    %435 = vector.broadcast %cst_151 : f32 to vector<16x1xf32>
    %436 = arith.divf %434, %435 : vector<16x1xf32>
    %437 = vector.broadcast %429 : vector<16x1xf32> to vector<16x32xf32>
    %438 = arith.subf %421, %437 : vector<16x32xf32>
    %cst_152 = arith.constant 9.99999974E-6 : f32
    %439 = vector.broadcast %cst_152 : f32 to vector<16x1xf32>
    %440 = arith.addf %436, %439 : vector<16x1xf32>
    %441 = math.rsqrt %440 : vector<16x1xf32>
    %442 = vector.broadcast %441 : vector<16x1xf32> to vector<16x32xf32>
    %443 = arith.mulf %438, %442 : vector<16x32xf32>
    %444 = vector.broadcast %423 : vector<1x32xf32> to vector<16x32xf32>
    %445 = arith.mulf %443, %444 : vector<16x32xf32>
    %446 = vector.broadcast %425 : vector<1x32xf32> to vector<16x32xf32>
    %447 = arith.addf %445, %446 : vector<16x32xf32>
    %c0_153 = arith.constant 0 : index
    %c0_154 = arith.constant 0 : index
    %c0_155 = arith.constant 0 : index
    %448 = vector.load %arg12[%c0_153, %c0_154, %c0_155] : memref<2x32x64xf32, #tpu.memory_space<vmem>>, vector<1x32x64xf32>
    %449 = vector.shape_cast %448 : vector<1x32x64xf32> to vector<32x64xf32>
    %cst_156 = arith.constant dense<0.000000e+00> : vector<16x64xf32>
    %450 = tpu.matmul %447, %449, %cst_156 {dimension_numbers = #tpu.dot_dimension_numbers<[1], [0], [0], [1], [0, 0, 1, 1], [], []>} : vector<16x32xf32>, vector<32x64xf32>, vector<16x64xf32> -> vector<16x64xf32>
    %c0_157 = arith.constant 0 : index
    %c0_158 = arith.constant 0 : index
    %c0_159 = arith.constant 0 : index
    %451 = vector.load %arg13[%c0_157, %c0_158, %c0_159] : memref<2x1x64xf32, #tpu.memory_space<vmem>>, vector<1x1x64xf32>
    %452 = vector.shape_cast %451 : vector<1x1x64xf32> to vector<1x64xf32>
    %453 = vector.broadcast %452 : vector<1x64xf32> to vector<16x64xf32>
    %454 = arith.addf %450, %453 : vector<16x64xf32>
    %cst_160 = arith.constant 0.000000e+00 : f32
    %455 = vector.broadcast %cst_160 : f32 to vector<16x64xf32>
    %456 = arith.maximumf %454, %455 : vector<16x64xf32>
    %c0_161 = arith.constant 0 : index
    %c0_162 = arith.constant 0 : index
    %c0_163 = arith.constant 0 : index
    %457 = vector.load %arg14[%c0_161, %c0_162, %c0_163] : memref<2x64x32xf32, #tpu.memory_space<vmem>>, vector<1x64x32xf32>
    %458 = vector.shape_cast %457 : vector<1x64x32xf32> to vector<64x32xf32>
    %cst_164 = arith.constant dense<0.000000e+00> : vector<16x32xf32>
    %459 = tpu.matmul %456, %458, %cst_164 {dimension_numbers = #tpu.dot_dimension_numbers<[1], [0], [0], [1], [0, 0, 1, 1], [], []>} : vector<16x64xf32>, vector<64x32xf32>, vector<16x32xf32> -> vector<16x32xf32>
    %c0_165 = arith.constant 0 : index
    %c0_166 = arith.constant 0 : index
    %c0_167 = arith.constant 0 : index
    %460 = vector.load %arg15[%c0_165, %c0_166, %c0_167] : memref<2x1x32xf32, #tpu.memory_space<vmem>>, vector<1x1x32xf32>
    %461 = vector.shape_cast %460 : vector<1x1x32xf32> to vector<1x32xf32>
    %462 = vector.broadcast %461 : vector<1x32xf32> to vector<16x32xf32>
    %463 = arith.addf %459, %462 : vector<16x32xf32>
    %464 = arith.addf %447, %463 : vector<16x32xf32>
    %c0_168 = arith.constant 0 : index
    %c0_169 = arith.constant 0 : index
    %c0_170 = arith.constant 0 : index
    %465 = vector.load %arg16[%c0_168, %c0_169, %c0_170] : memref<2x1x32xf32, #tpu.memory_space<vmem>>, vector<1x1x32xf32>
    %466 = vector.shape_cast %465 : vector<1x1x32xf32> to vector<1x32xf32>
    %c0_171 = arith.constant 0 : index
    %c0_172 = arith.constant 0 : index
    %c0_173 = arith.constant 0 : index
    %467 = vector.load %arg17[%c0_171, %c0_172, %c0_173] : memref<2x1x32xf32, #tpu.memory_space<vmem>>, vector<1x1x32xf32>
    %468 = vector.shape_cast %467 : vector<1x1x32xf32> to vector<1x32xf32>
    %cst_174 = arith.constant dense<0.000000e+00> : vector<16xf32>
    %469 = vector.multi_reduction <add>, %464, %cst_174 [1] : vector<16x32xf32> to vector<16xf32>
    %470 = vector.shape_cast %469 : vector<16xf32> to vector<16x1xf32>
    %cst_175 = arith.constant 3.200000e+01 : f32
    %471 = vector.broadcast %cst_175 : f32 to vector<16x1xf32>
    %472 = arith.divf %470, %471 : vector<16x1xf32>
    %473 = vector.broadcast %472 : vector<16x1xf32> to vector<16x32xf32>
    %474 = arith.subf %464, %473 : vector<16x32xf32>
    %475 = arith.mulf %474, %474 : vector<16x32xf32>
    %cst_176 = arith.constant dense<0.000000e+00> : vector<16xf32>
    %476 = vector.multi_reduction <add>, %475, %cst_176 [1] : vector<16x32xf32> to vector<16xf32>
    %477 = vector.shape_cast %476 : vector<16xf32> to vector<16x1xf32>
    %cst_177 = arith.constant 3.200000e+01 : f32
    %478 = vector.broadcast %cst_177 : f32 to vector<16x1xf32>
    %479 = arith.divf %477, %478 : vector<16x1xf32>
    %480 = vector.broadcast %472 : vector<16x1xf32> to vector<16x32xf32>
    %481 = arith.subf %464, %480 : vector<16x32xf32>
    %cst_178 = arith.constant 9.99999974E-6 : f32
    %482 = vector.broadcast %cst_178 : f32 to vector<16x1xf32>
    %483 = arith.addf %479, %482 : vector<16x1xf32>
    %484 = math.rsqrt %483 : vector<16x1xf32>
    %485 = vector.broadcast %484 : vector<16x1xf32> to vector<16x32xf32>
    %486 = arith.mulf %481, %485 : vector<16x32xf32>
    %487 = vector.broadcast %466 : vector<1x32xf32> to vector<16x32xf32>
    %488 = arith.mulf %486, %487 : vector<16x32xf32>
    %489 = vector.broadcast %468 : vector<1x32xf32> to vector<16x32xf32>
    %490 = arith.addf %488, %489 : vector<16x32xf32>
    %c1_179 = arith.constant 1 : index
    %c0_180 = arith.constant 0 : index
    %c0_181 = arith.constant 0 : index
    %491 = vector.load %arg9[%c1_179, %c0_180, %c0_181] : memref<2x1x32xf32, #tpu.memory_space<vmem>>, vector<1x1x32xf32>
    %492 = vector.shape_cast %491 : vector<1x1x32xf32> to vector<1x32xf32>
    %c1_182 = arith.constant 1 : index
    %c0_183 = arith.constant 0 : index
    %c0_184 = arith.constant 0 : index
    %c0_185 = arith.constant 0 : index
    %493 = vector.load %arg6[%c1_182, %c0_183, %c0_184, %c0_185] : memref<2x4x32x24xf32, #tpu.memory_space<vmem>>, vector<1x1x32x24xf32>
    %494 = vector.shape_cast %493 : vector<1x1x32x24xf32> to vector<32x24xf32>
    %cst_186 = arith.constant dense<0.000000e+00> : vector<16x24xf32>
    %495 = tpu.matmul %490, %494, %cst_186 {dimension_numbers = #tpu.dot_dimension_numbers<[1], [0], [0], [1], [0, 0, 1, 1], [], []>} : vector<16x32xf32>, vector<32x24xf32>, vector<16x24xf32> -> vector<16x24xf32>
    %c1_187 = arith.constant 1 : index
    %c0_188 = arith.constant 0 : index
    %c0_189 = arith.constant 0 : index
    %c0_190 = arith.constant 0 : index
    %496 = vector.load %arg7[%c1_187, %c0_188, %c0_189, %c0_190] : memref<2x4x1x24xf32, #tpu.memory_space<vmem>>, vector<1x1x1x24xf32>
    %497 = vector.shape_cast %496 : vector<1x1x1x24xf32> to vector<1x24xf32>
    %498 = vector.broadcast %497 : vector<1x24xf32> to vector<16x24xf32>
    %499 = arith.addf %495, %498 : vector<16x24xf32>
    %500 = vector.extract_strided_slice %499 {offsets = [0, 0], sizes = [16, 8], strides = [1, 1]} : vector<16x24xf32> to vector<16x8xf32>
    %501 = vector.shape_cast %500 : vector<16x8xf32> to vector<2x8x8xf32>
    %502 = vector.extract_strided_slice %499 {offsets = [0, 8], sizes = [16, 8], strides = [1, 1]} : vector<16x24xf32> to vector<16x8xf32>
    %503 = vector.shape_cast %502 : vector<16x8xf32> to vector<2x8x8xf32>
    %504 = vector.extract_strided_slice %499 {offsets = [0, 16], sizes = [16, 8], strides = [1, 1]} : vector<16x24xf32> to vector<16x8xf32>
    %505 = vector.shape_cast %504 : vector<16x8xf32> to vector<2x8x8xf32>
    "tpu.trace_start"() <{level = 10 : i32, message = "bqd,bkd->bqk"}> : () -> ()
    %cst_191 = arith.constant dense<0.000000e+00> : vector<2x8x8xf32>
    %506 = tpu.matmul %501, %503, %cst_191 {dimension_numbers = #tpu.dot_dimension_numbers<[2], [2], [1], [1], [0, 0, 0, 1, 1, 1], [0], [0]>} : vector<2x8x8xf32>, vector<2x8x8xf32>, vector<2x8x8xf32> -> vector<2x8x8xf32>
    "tpu.trace_stop"() : () -> ()
    %507 = vector.broadcast %11 : vector<2x1x8xf32> to vector<2x8x8xf32>
    %508 = arith.addf %506, %507 : vector<2x8x8xf32>
    %cst_192 = arith.constant dense<0xFF800000> : vector<2x8xf32>
    %509 = vector.multi_reduction <maximumf>, %508, %cst_192 [2] : vector<2x8x8xf32> to vector<2x8xf32>
    %510 = vector.shape_cast %509 : vector<2x8xf32> to vector<2x8x1xf32>
    %511 = vector.broadcast %510 : vector<2x8x1xf32> to vector<2x8x8xf32>
    %512 = arith.subf %508, %511 : vector<2x8x8xf32>
    %513 = math.exp %512 : vector<2x8x8xf32>
    %cst_193 = arith.constant dense<0.000000e+00> : vector<2x8xf32>
    %514 = vector.multi_reduction <add>, %513, %cst_193 [2] : vector<2x8x8xf32> to vector<2x8xf32>
    %515 = vector.shape_cast %514 : vector<2x8xf32> to vector<2x8x1xf32>
    %516 = tpu.reciprocal %515 {approx = true} : vector<2x8x1xf32> -> vector<2x8x1xf32>
    %517 = vector.broadcast %516 : vector<2x8x1xf32> to vector<2x8x8xf32>
    %518 = arith.mulf %513, %517 : vector<2x8x8xf32>
    "tpu.trace_start"() <{level = 10 : i32, message = "bqk,bkd->bqd"}> : () -> ()
    %cst_194 = arith.constant dense<0.000000e+00> : vector<2x8x8xf32>
    %519 = tpu.matmul %518, %505, %cst_194 {dimension_numbers = #tpu.dot_dimension_numbers<[2], [1], [1], [2], [0, 0, 0, 1, 1, 2], [0], [0]>} : vector<2x8x8xf32>, vector<2x8x8xf32>, vector<2x8x8xf32> -> vector<2x8x8xf32>
    "tpu.trace_stop"() : () -> ()
    %520 = vector.shape_cast %519 : vector<2x8x8xf32> to vector<16x8xf32>
    %c1_195 = arith.constant 1 : index
    %c0_196 = arith.constant 0 : index
    %c0_197 = arith.constant 0 : index
    %c0_198 = arith.constant 0 : index
    %521 = vector.load %arg8[%c1_195, %c0_196, %c0_197, %c0_198] : memref<2x4x8x32xf32, #tpu.memory_space<vmem>>, vector<1x1x8x32xf32>
    %522 = vector.shape_cast %521 : vector<1x1x8x32xf32> to vector<8x32xf32>
    %cst_199 = arith.constant dense<0.000000e+00> : vector<16x32xf32>
    %523 = tpu.matmul %520, %522, %cst_199 {dimension_numbers = #tpu.dot_dimension_numbers<[1], [0], [0], [1], [0, 0, 1, 1], [], []>} : vector<16x8xf32>, vector<8x32xf32>, vector<16x32xf32> -> vector<16x32xf32>
    %524 = vector.broadcast %492 : vector<1x32xf32> to vector<16x32xf32>
    %525 = arith.addf %524, %523 : vector<16x32xf32>
    %c1_200 = arith.constant 1 : index
    %c1_201 = arith.constant 1 : index
    %c0_202 = arith.constant 0 : index
    %c0_203 = arith.constant 0 : index
    %526 = vector.load %arg6[%c1_200, %c1_201, %c0_202, %c0_203] : memref<2x4x32x24xf32, #tpu.memory_space<vmem>>, vector<1x1x32x24xf32>
    %527 = vector.shape_cast %526 : vector<1x1x32x24xf32> to vector<32x24xf32>
    %cst_204 = arith.constant dense<0.000000e+00> : vector<16x24xf32>
    %528 = tpu.matmul %490, %527, %cst_204 {dimension_numbers = #tpu.dot_dimension_numbers<[1], [0], [0], [1], [0, 0, 1, 1], [], []>} : vector<16x32xf32>, vector<32x24xf32>, vector<16x24xf32> -> vector<16x24xf32>
    %c1_205 = arith.constant 1 : index
    %c1_206 = arith.constant 1 : index
    %c0_207 = arith.constant 0 : index
    %c0_208 = arith.constant 0 : index
    %529 = vector.load %arg7[%c1_205, %c1_206, %c0_207, %c0_208] : memref<2x4x1x24xf32, #tpu.memory_space<vmem>>, vector<1x1x1x24xf32>
    %530 = vector.shape_cast %529 : vector<1x1x1x24xf32> to vector<1x24xf32>
    %531 = vector.broadcast %530 : vector<1x24xf32> to vector<16x24xf32>
    %532 = arith.addf %528, %531 : vector<16x24xf32>
    %533 = vector.extract_strided_slice %532 {offsets = [0, 0], sizes = [16, 8], strides = [1, 1]} : vector<16x24xf32> to vector<16x8xf32>
    %534 = vector.shape_cast %533 : vector<16x8xf32> to vector<2x8x8xf32>
    %535 = vector.extract_strided_slice %532 {offsets = [0, 8], sizes = [16, 8], strides = [1, 1]} : vector<16x24xf32> to vector<16x8xf32>
    %536 = vector.shape_cast %535 : vector<16x8xf32> to vector<2x8x8xf32>
    %537 = vector.extract_strided_slice %532 {offsets = [0, 16], sizes = [16, 8], strides = [1, 1]} : vector<16x24xf32> to vector<16x8xf32>
    %538 = vector.shape_cast %537 : vector<16x8xf32> to vector<2x8x8xf32>
    "tpu.trace_start"() <{level = 10 : i32, message = "bqd,bkd->bqk"}> : () -> ()
    %cst_209 = arith.constant dense<0.000000e+00> : vector<2x8x8xf32>
    %539 = tpu.matmul %534, %536, %cst_209 {dimension_numbers = #tpu.dot_dimension_numbers<[2], [2], [1], [1], [0, 0, 0, 1, 1, 1], [0], [0]>} : vector<2x8x8xf32>, vector<2x8x8xf32>, vector<2x8x8xf32> -> vector<2x8x8xf32>
    "tpu.trace_stop"() : () -> ()
    %540 = vector.broadcast %11 : vector<2x1x8xf32> to vector<2x8x8xf32>
    %541 = arith.addf %539, %540 : vector<2x8x8xf32>
    %cst_210 = arith.constant dense<0xFF800000> : vector<2x8xf32>
    %542 = vector.multi_reduction <maximumf>, %541, %cst_210 [2] : vector<2x8x8xf32> to vector<2x8xf32>
    %543 = vector.shape_cast %542 : vector<2x8xf32> to vector<2x8x1xf32>
    %544 = vector.broadcast %543 : vector<2x8x1xf32> to vector<2x8x8xf32>
    %545 = arith.subf %541, %544 : vector<2x8x8xf32>
    %546 = math.exp %545 : vector<2x8x8xf32>
    %cst_211 = arith.constant dense<0.000000e+00> : vector<2x8xf32>
    %547 = vector.multi_reduction <add>, %546, %cst_211 [2] : vector<2x8x8xf32> to vector<2x8xf32>
    %548 = vector.shape_cast %547 : vector<2x8xf32> to vector<2x8x1xf32>
    %549 = tpu.reciprocal %548 {approx = true} : vector<2x8x1xf32> -> vector<2x8x1xf32>
    %550 = vector.broadcast %549 : vector<2x8x1xf32> to vector<2x8x8xf32>
    %551 = arith.mulf %546, %550 : vector<2x8x8xf32>
    "tpu.trace_start"() <{level = 10 : i32, message = "bqk,bkd->bqd"}> : () -> ()
    %cst_212 = arith.constant dense<0.000000e+00> : vector<2x8x8xf32>
    %552 = tpu.matmul %551, %538, %cst_212 {dimension_numbers = #tpu.dot_dimension_numbers<[2], [1], [1], [2], [0, 0, 0, 1, 1, 2], [0], [0]>} : vector<2x8x8xf32>, vector<2x8x8xf32>, vector<2x8x8xf32> -> vector<2x8x8xf32>
    "tpu.trace_stop"() : () -> ()
    %553 = vector.shape_cast %552 : vector<2x8x8xf32> to vector<16x8xf32>
    %c1_213 = arith.constant 1 : index
    %c1_214 = arith.constant 1 : index
    %c0_215 = arith.constant 0 : index
    %c0_216 = arith.constant 0 : index
    %554 = vector.load %arg8[%c1_213, %c1_214, %c0_215, %c0_216] : memref<2x4x8x32xf32, #tpu.memory_space<vmem>>, vector<1x1x8x32xf32>
    %555 = vector.shape_cast %554 : vector<1x1x8x32xf32> to vector<8x32xf32>
    %cst_217 = arith.constant dense<0.000000e+00> : vector<16x32xf32>
    %556 = tpu.matmul %553, %555, %cst_217 {dimension_numbers = #tpu.dot_dimension_numbers<[1], [0], [0], [1], [0, 0, 1, 1], [], []>} : vector<16x8xf32>, vector<8x32xf32>, vector<16x32xf32> -> vector<16x32xf32>
    %557 = arith.addf %525, %556 : vector<16x32xf32>
    %c1_218 = arith.constant 1 : index
    %c2_219 = arith.constant 2 : index
    %c0_220 = arith.constant 0 : index
    %c0_221 = arith.constant 0 : index
    %558 = vector.load %arg6[%c1_218, %c2_219, %c0_220, %c0_221] : memref<2x4x32x24xf32, #tpu.memory_space<vmem>>, vector<1x1x32x24xf32>
    %559 = vector.shape_cast %558 : vector<1x1x32x24xf32> to vector<32x24xf32>
    %cst_222 = arith.constant dense<0.000000e+00> : vector<16x24xf32>
    %560 = tpu.matmul %490, %559, %cst_222 {dimension_numbers = #tpu.dot_dimension_numbers<[1], [0], [0], [1], [0, 0, 1, 1], [], []>} : vector<16x32xf32>, vector<32x24xf32>, vector<16x24xf32> -> vector<16x24xf32>
    %c1_223 = arith.constant 1 : index
    %c2_224 = arith.constant 2 : index
    %c0_225 = arith.constant 0 : index
    %c0_226 = arith.constant 0 : index
    %561 = vector.load %arg7[%c1_223, %c2_224, %c0_225, %c0_226] : memref<2x4x1x24xf32, #tpu.memory_space<vmem>>, vector<1x1x1x24xf32>
    %562 = vector.shape_cast %561 : vector<1x1x1x24xf32> to vector<1x24xf32>
    %563 = vector.broadcast %562 : vector<1x24xf32> to vector<16x24xf32>
    %564 = arith.addf %560, %563 : vector<16x24xf32>
    %565 = vector.extract_strided_slice %564 {offsets = [0, 0], sizes = [16, 8], strides = [1, 1]} : vector<16x24xf32> to vector<16x8xf32>
    %566 = vector.shape_cast %565 : vector<16x8xf32> to vector<2x8x8xf32>
    %567 = vector.extract_strided_slice %564 {offsets = [0, 8], sizes = [16, 8], strides = [1, 1]} : vector<16x24xf32> to vector<16x8xf32>
    %568 = vector.shape_cast %567 : vector<16x8xf32> to vector<2x8x8xf32>
    %569 = vector.extract_strided_slice %564 {offsets = [0, 16], sizes = [16, 8], strides = [1, 1]} : vector<16x24xf32> to vector<16x8xf32>
    %570 = vector.shape_cast %569 : vector<16x8xf32> to vector<2x8x8xf32>
    "tpu.trace_start"() <{level = 10 : i32, message = "bqd,bkd->bqk"}> : () -> ()
    %cst_227 = arith.constant dense<0.000000e+00> : vector<2x8x8xf32>
    %571 = tpu.matmul %566, %568, %cst_227 {dimension_numbers = #tpu.dot_dimension_numbers<[2], [2], [1], [1], [0, 0, 0, 1, 1, 1], [0], [0]>} : vector<2x8x8xf32>, vector<2x8x8xf32>, vector<2x8x8xf32> -> vector<2x8x8xf32>
    "tpu.trace_stop"() : () -> ()
    %572 = vector.broadcast %11 : vector<2x1x8xf32> to vector<2x8x8xf32>
    %573 = arith.addf %571, %572 : vector<2x8x8xf32>
    %cst_228 = arith.constant dense<0xFF800000> : vector<2x8xf32>
    %574 = vector.multi_reduction <maximumf>, %573, %cst_228 [2] : vector<2x8x8xf32> to vector<2x8xf32>
    %575 = vector.shape_cast %574 : vector<2x8xf32> to vector<2x8x1xf32>
    %576 = vector.broadcast %575 : vector<2x8x1xf32> to vector<2x8x8xf32>
    %577 = arith.subf %573, %576 : vector<2x8x8xf32>
    %578 = math.exp %577 : vector<2x8x8xf32>
    %cst_229 = arith.constant dense<0.000000e+00> : vector<2x8xf32>
    %579 = vector.multi_reduction <add>, %578, %cst_229 [2] : vector<2x8x8xf32> to vector<2x8xf32>
    %580 = vector.shape_cast %579 : vector<2x8xf32> to vector<2x8x1xf32>
    %581 = tpu.reciprocal %580 {approx = true} : vector<2x8x1xf32> -> vector<2x8x1xf32>
    %582 = vector.broadcast %581 : vector<2x8x1xf32> to vector<2x8x8xf32>
    %583 = arith.mulf %578, %582 : vector<2x8x8xf32>
    "tpu.trace_start"() <{level = 10 : i32, message = "bqk,bkd->bqd"}> : () -> ()
    %cst_230 = arith.constant dense<0.000000e+00> : vector<2x8x8xf32>
    %584 = tpu.matmul %583, %570, %cst_230 {dimension_numbers = #tpu.dot_dimension_numbers<[2], [1], [1], [2], [0, 0, 0, 1, 1, 2], [0], [0]>} : vector<2x8x8xf32>, vector<2x8x8xf32>, vector<2x8x8xf32> -> vector<2x8x8xf32>
    "tpu.trace_stop"() : () -> ()
    %585 = vector.shape_cast %584 : vector<2x8x8xf32> to vector<16x8xf32>
    %c1_231 = arith.constant 1 : index
    %c2_232 = arith.constant 2 : index
    %c0_233 = arith.constant 0 : index
    %c0_234 = arith.constant 0 : index
    %586 = vector.load %arg8[%c1_231, %c2_232, %c0_233, %c0_234] : memref<2x4x8x32xf32, #tpu.memory_space<vmem>>, vector<1x1x8x32xf32>
    %587 = vector.shape_cast %586 : vector<1x1x8x32xf32> to vector<8x32xf32>
    %cst_235 = arith.constant dense<0.000000e+00> : vector<16x32xf32>
    %588 = tpu.matmul %585, %587, %cst_235 {dimension_numbers = #tpu.dot_dimension_numbers<[1], [0], [0], [1], [0, 0, 1, 1], [], []>} : vector<16x8xf32>, vector<8x32xf32>, vector<16x32xf32> -> vector<16x32xf32>
    %589 = arith.addf %557, %588 : vector<16x32xf32>
    %c1_236 = arith.constant 1 : index
    %c3_237 = arith.constant 3 : index
    %c0_238 = arith.constant 0 : index
    %c0_239 = arith.constant 0 : index
    %590 = vector.load %arg6[%c1_236, %c3_237, %c0_238, %c0_239] : memref<2x4x32x24xf32, #tpu.memory_space<vmem>>, vector<1x1x32x24xf32>
    %591 = vector.shape_cast %590 : vector<1x1x32x24xf32> to vector<32x24xf32>
    %cst_240 = arith.constant dense<0.000000e+00> : vector<16x24xf32>
    %592 = tpu.matmul %490, %591, %cst_240 {dimension_numbers = #tpu.dot_dimension_numbers<[1], [0], [0], [1], [0, 0, 1, 1], [], []>} : vector<16x32xf32>, vector<32x24xf32>, vector<16x24xf32> -> vector<16x24xf32>
    %c1_241 = arith.constant 1 : index
    %c3_242 = arith.constant 3 : index
    %c0_243 = arith.constant 0 : index
    %c0_244 = arith.constant 0 : index
    %593 = vector.load %arg7[%c1_241, %c3_242, %c0_243, %c0_244] : memref<2x4x1x24xf32, #tpu.memory_space<vmem>>, vector<1x1x1x24xf32>
    %594 = vector.shape_cast %593 : vector<1x1x1x24xf32> to vector<1x24xf32>
    %595 = vector.broadcast %594 : vector<1x24xf32> to vector<16x24xf32>
    %596 = arith.addf %592, %595 : vector<16x24xf32>
    %597 = vector.extract_strided_slice %596 {offsets = [0, 0], sizes = [16, 8], strides = [1, 1]} : vector<16x24xf32> to vector<16x8xf32>
    %598 = vector.shape_cast %597 : vector<16x8xf32> to vector<2x8x8xf32>
    %599 = vector.extract_strided_slice %596 {offsets = [0, 8], sizes = [16, 8], strides = [1, 1]} : vector<16x24xf32> to vector<16x8xf32>
    %600 = vector.shape_cast %599 : vector<16x8xf32> to vector<2x8x8xf32>
    %601 = vector.extract_strided_slice %596 {offsets = [0, 16], sizes = [16, 8], strides = [1, 1]} : vector<16x24xf32> to vector<16x8xf32>
    %602 = vector.shape_cast %601 : vector<16x8xf32> to vector<2x8x8xf32>
    "tpu.trace_start"() <{level = 10 : i32, message = "bqd,bkd->bqk"}> : () -> ()
    %cst_245 = arith.constant dense<0.000000e+00> : vector<2x8x8xf32>
    %603 = tpu.matmul %598, %600, %cst_245 {dimension_numbers = #tpu.dot_dimension_numbers<[2], [2], [1], [1], [0, 0, 0, 1, 1, 1], [0], [0]>} : vector<2x8x8xf32>, vector<2x8x8xf32>, vector<2x8x8xf32> -> vector<2x8x8xf32>
    "tpu.trace_stop"() : () -> ()
    %604 = vector.broadcast %11 : vector<2x1x8xf32> to vector<2x8x8xf32>
    %605 = arith.addf %603, %604 : vector<2x8x8xf32>
    %cst_246 = arith.constant dense<0xFF800000> : vector<2x8xf32>
    %606 = vector.multi_reduction <maximumf>, %605, %cst_246 [2] : vector<2x8x8xf32> to vector<2x8xf32>
    %607 = vector.shape_cast %606 : vector<2x8xf32> to vector<2x8x1xf32>
    %608 = vector.broadcast %607 : vector<2x8x1xf32> to vector<2x8x8xf32>
    %609 = arith.subf %605, %608 : vector<2x8x8xf32>
    %610 = math.exp %609 : vector<2x8x8xf32>
    %cst_247 = arith.constant dense<0.000000e+00> : vector<2x8xf32>
    %611 = vector.multi_reduction <add>, %610, %cst_247 [2] : vector<2x8x8xf32> to vector<2x8xf32>
    %612 = vector.shape_cast %611 : vector<2x8xf32> to vector<2x8x1xf32>
    %613 = tpu.reciprocal %612 {approx = true} : vector<2x8x1xf32> -> vector<2x8x1xf32>
    %614 = vector.broadcast %613 : vector<2x8x1xf32> to vector<2x8x8xf32>
    %615 = arith.mulf %610, %614 : vector<2x8x8xf32>
    "tpu.trace_start"() <{level = 10 : i32, message = "bqk,bkd->bqd"}> : () -> ()
    %cst_248 = arith.constant dense<0.000000e+00> : vector<2x8x8xf32>
    %616 = tpu.matmul %615, %602, %cst_248 {dimension_numbers = #tpu.dot_dimension_numbers<[2], [1], [1], [2], [0, 0, 0, 1, 1, 2], [0], [0]>} : vector<2x8x8xf32>, vector<2x8x8xf32>, vector<2x8x8xf32> -> vector<2x8x8xf32>
    "tpu.trace_stop"() : () -> ()
    %617 = vector.shape_cast %616 : vector<2x8x8xf32> to vector<16x8xf32>
    %c1_249 = arith.constant 1 : index
    %c3_250 = arith.constant 3 : index
    %c0_251 = arith.constant 0 : index
    %c0_252 = arith.constant 0 : index
    %618 = vector.load %arg8[%c1_249, %c3_250, %c0_251, %c0_252] : memref<2x4x8x32xf32, #tpu.memory_space<vmem>>, vector<1x1x8x32xf32>
    %619 = vector.shape_cast %618 : vector<1x1x8x32xf32> to vector<8x32xf32>
    %cst_253 = arith.constant dense<0.000000e+00> : vector<16x32xf32>
    %620 = tpu.matmul %617, %619, %cst_253 {dimension_numbers = #tpu.dot_dimension_numbers<[1], [0], [0], [1], [0, 0, 1, 1], [], []>} : vector<16x8xf32>, vector<8x32xf32>, vector<16x32xf32> -> vector<16x32xf32>
    %621 = arith.addf %589, %620 : vector<16x32xf32>
    %622 = arith.addf %490, %621 : vector<16x32xf32>
    %c1_254 = arith.constant 1 : index
    %c0_255 = arith.constant 0 : index
    %c0_256 = arith.constant 0 : index
    %623 = vector.load %arg10[%c1_254, %c0_255, %c0_256] : memref<2x1x32xf32, #tpu.memory_space<vmem>>, vector<1x1x32xf32>
    %624 = vector.shape_cast %623 : vector<1x1x32xf32> to vector<1x32xf32>
    %c1_257 = arith.constant 1 : index
    %c0_258 = arith.constant 0 : index
    %c0_259 = arith.constant 0 : index
    %625 = vector.load %arg11[%c1_257, %c0_258, %c0_259] : memref<2x1x32xf32, #tpu.memory_space<vmem>>, vector<1x1x32xf32>
    %626 = vector.shape_cast %625 : vector<1x1x32xf32> to vector<1x32xf32>
    %cst_260 = arith.constant dense<0.000000e+00> : vector<16xf32>
    %627 = vector.multi_reduction <add>, %622, %cst_260 [1] : vector<16x32xf32> to vector<16xf32>
    %628 = vector.shape_cast %627 : vector<16xf32> to vector<16x1xf32>
    %cst_261 = arith.constant 3.200000e+01 : f32
    %629 = vector.broadcast %cst_261 : f32 to vector<16x1xf32>
    %630 = arith.divf %628, %629 : vector<16x1xf32>
    %631 = vector.broadcast %630 : vector<16x1xf32> to vector<16x32xf32>
    %632 = arith.subf %622, %631 : vector<16x32xf32>
    %633 = arith.mulf %632, %632 : vector<16x32xf32>
    %cst_262 = arith.constant dense<0.000000e+00> : vector<16xf32>
    %634 = vector.multi_reduction <add>, %633, %cst_262 [1] : vector<16x32xf32> to vector<16xf32>
    %635 = vector.shape_cast %634 : vector<16xf32> to vector<16x1xf32>
    %cst_263 = arith.constant 3.200000e+01 : f32
    %636 = vector.broadcast %cst_263 : f32 to vector<16x1xf32>
    %637 = arith.divf %635, %636 : vector<16x1xf32>
    %638 = vector.broadcast %630 : vector<16x1xf32> to vector<16x32xf32>
    %639 = arith.subf %622, %638 : vector<16x32xf32>
    %cst_264 = arith.constant 9.99999974E-6 : f32
    %640 = vector.broadcast %cst_264 : f32 to vector<16x1xf32>
    %641 = arith.addf %637, %640 : vector<16x1xf32>
    %642 = math.rsqrt %641 : vector<16x1xf32>
    %643 = vector.broadcast %642 : vector<16x1xf32> to vector<16x32xf32>
    %644 = arith.mulf %639, %643 : vector<16x32xf32>
    %645 = vector.broadcast %624 : vector<1x32xf32> to vector<16x32xf32>
    %646 = arith.mulf %644, %645 : vector<16x32xf32>
    %647 = vector.broadcast %626 : vector<1x32xf32> to vector<16x32xf32>
    %648 = arith.addf %646, %647 : vector<16x32xf32>
    %c1_265 = arith.constant 1 : index
    %c0_266 = arith.constant 0 : index
    %c0_267 = arith.constant 0 : index
    %649 = vector.load %arg12[%c1_265, %c0_266, %c0_267] : memref<2x32x64xf32, #tpu.memory_space<vmem>>, vector<1x32x64xf32>
    %650 = vector.shape_cast %649 : vector<1x32x64xf32> to vector<32x64xf32>
    %cst_268 = arith.constant dense<0.000000e+00> : vector<16x64xf32>
    %651 = tpu.matmul %648, %650, %cst_268 {dimension_numbers = #tpu.dot_dimension_numbers<[1], [0], [0], [1], [0, 0, 1, 1], [], []>} : vector<16x32xf32>, vector<32x64xf32>, vector<16x64xf32> -> vector<16x64xf32>
    %c1_269 = arith.constant 1 : index
    %c0_270 = arith.constant 0 : index
    %c0_271 = arith.constant 0 : index
    %652 = vector.load %arg13[%c1_269, %c0_270, %c0_271] : memref<2x1x64xf32, #tpu.memory_space<vmem>>, vector<1x1x64xf32>
    %653 = vector.shape_cast %652 : vector<1x1x64xf32> to vector<1x64xf32>
    %654 = vector.broadcast %653 : vector<1x64xf32> to vector<16x64xf32>
    %655 = arith.addf %651, %654 : vector<16x64xf32>
    %cst_272 = arith.constant 0.000000e+00 : f32
    %656 = vector.broadcast %cst_272 : f32 to vector<16x64xf32>
    %657 = arith.maximumf %655, %656 : vector<16x64xf32>
    %c1_273 = arith.constant 1 : index
    %c0_274 = arith.constant 0 : index
    %c0_275 = arith.constant 0 : index
    %658 = vector.load %arg14[%c1_273, %c0_274, %c0_275] : memref<2x64x32xf32, #tpu.memory_space<vmem>>, vector<1x64x32xf32>
    %659 = vector.shape_cast %658 : vector<1x64x32xf32> to vector<64x32xf32>
    %cst_276 = arith.constant dense<0.000000e+00> : vector<16x32xf32>
    %660 = tpu.matmul %657, %659, %cst_276 {dimension_numbers = #tpu.dot_dimension_numbers<[1], [0], [0], [1], [0, 0, 1, 1], [], []>} : vector<16x64xf32>, vector<64x32xf32>, vector<16x32xf32> -> vector<16x32xf32>
    %c1_277 = arith.constant 1 : index
    %c0_278 = arith.constant 0 : index
    %c0_279 = arith.constant 0 : index
    %661 = vector.load %arg15[%c1_277, %c0_278, %c0_279] : memref<2x1x32xf32, #tpu.memory_space<vmem>>, vector<1x1x32xf32>
    %662 = vector.shape_cast %661 : vector<1x1x32xf32> to vector<1x32xf32>
    %663 = vector.broadcast %662 : vector<1x32xf32> to vector<16x32xf32>
    %664 = arith.addf %660, %663 : vector<16x32xf32>
    %665 = arith.addf %648, %664 : vector<16x32xf32>
    %c1_280 = arith.constant 1 : index
    %c0_281 = arith.constant 0 : index
    %c0_282 = arith.constant 0 : index
    %666 = vector.load %arg16[%c1_280, %c0_281, %c0_282] : memref<2x1x32xf32, #tpu.memory_space<vmem>>, vector<1x1x32xf32>
    %667 = vector.shape_cast %666 : vector<1x1x32xf32> to vector<1x32xf32>
    %c1_283 = arith.constant 1 : index
    %c0_284 = arith.constant 0 : index
    %c0_285 = arith.constant 0 : index
    %668 = vector.load %arg17[%c1_283, %c0_284, %c0_285] : memref<2x1x32xf32, #tpu.memory_space<vmem>>, vector<1x1x32xf32>
    %669 = vector.shape_cast %668 : vector<1x1x32xf32> to vector<1x32xf32>
    %cst_286 = arith.constant dense<0.000000e+00> : vector<16xf32>
    %670 = vector.multi_reduction <add>, %665, %cst_286 [1] : vector<16x32xf32> to vector<16xf32>
    %671 = vector.shape_cast %670 : vector<16xf32> to vector<16x1xf32>
    %cst_287 = arith.constant 3.200000e+01 : f32
    %672 = vector.broadcast %cst_287 : f32 to vector<16x1xf32>
    %673 = arith.divf %671, %672 : vector<16x1xf32>
    %674 = vector.broadcast %673 : vector<16x1xf32> to vector<16x32xf32>
    %675 = arith.subf %665, %674 : vector<16x32xf32>
    %676 = arith.mulf %675, %675 : vector<16x32xf32>
    %cst_288 = arith.constant dense<0.000000e+00> : vector<16xf32>
    %677 = vector.multi_reduction <add>, %676, %cst_288 [1] : vector<16x32xf32> to vector<16xf32>
    %678 = vector.shape_cast %677 : vector<16xf32> to vector<16x1xf32>
    %cst_289 = arith.constant 3.200000e+01 : f32
    %679 = vector.broadcast %cst_289 : f32 to vector<16x1xf32>
    %680 = arith.divf %678, %679 : vector<16x1xf32>
    %681 = vector.broadcast %673 : vector<16x1xf32> to vector<16x32xf32>
    %682 = arith.subf %665, %681 : vector<16x32xf32>
    %cst_290 = arith.constant 9.99999974E-6 : f32
    %683 = vector.broadcast %cst_290 : f32 to vector<16x1xf32>
    %684 = arith.addf %680, %683 : vector<16x1xf32>
    %685 = math.rsqrt %684 : vector<16x1xf32>
    %686 = vector.broadcast %685 : vector<16x1xf32> to vector<16x32xf32>
    %687 = arith.mulf %682, %686 : vector<16x32xf32>
    %688 = vector.broadcast %667 : vector<1x32xf32> to vector<16x32xf32>
    %689 = arith.mulf %687, %688 : vector<16x32xf32>
    %690 = vector.broadcast %669 : vector<1x32xf32> to vector<16x32xf32>
    %691 = arith.addf %689, %690 : vector<16x32xf32>
    %692 = vector.shape_cast %691 : vector<16x32xf32> to vector<2x8x32xf32>
    %693 = vector.broadcast %12 : vector<2x8x1xf32> to vector<2x8x32xf32>
    %694 = arith.mulf %692, %693 : vector<2x8x32xf32>
    %cst_291 = arith.constant dense<0.000000e+00> : vector<2x32xf32>
    %695 = vector.multi_reduction <add>, %694, %cst_291 [1] : vector<2x8x32xf32> to vector<2x32xf32>
    %696 = vector.broadcast %0 : vector<2x1xf32> to vector<2x32xf32>
    %697 = arith.divf %695, %696 : vector<2x32xf32>
    %c0_292 = arith.constant 0 : index
    %c0_293 = arith.constant 0 : index
    %698 = vector.load %arg18[%c0_292, %c0_293] : memref<32x32xf32, #tpu.memory_space<vmem>>, vector<32x32xf32>
    %cst_294 = arith.constant dense<0.000000e+00> : vector<2x32xf32>
    %699 = tpu.matmul %697, %698, %cst_294 {dimension_numbers = #tpu.dot_dimension_numbers<[1], [0], [0], [1], [0, 0, 1, 1], [], []>} : vector<2x32xf32>, vector<32x32xf32>, vector<2x32xf32> -> vector<2x32xf32>
    %c0_295 = arith.constant 0 : index
    %c0_296 = arith.constant 0 : index
    %700 = vector.load %arg19[%c0_295, %c0_296] : memref<1x32xf32, #tpu.memory_space<vmem>>, vector<1x32xf32>
    %701 = vector.broadcast %700 : vector<1x32xf32> to vector<2x32xf32>
    %702 = arith.addf %699, %701 : vector<2x32xf32>
    %cst_297 = arith.constant 0.000000e+00 : f32
    %703 = vector.broadcast %cst_297 : f32 to vector<2x32xf32>
    %704 = arith.maximumf %702, %703 : vector<2x32xf32>
    %c0_298 = arith.constant 0 : index
    %c0_299 = arith.constant 0 : index
    %705 = vector.load %arg20[%c0_298, %c0_299] : memref<32x16xf32, #tpu.memory_space<vmem>>, vector<32x16xf32>
    %cst_300 = arith.constant dense<0.000000e+00> : vector<2x16xf32>
    %706 = tpu.matmul %704, %705, %cst_300 {dimension_numbers = #tpu.dot_dimension_numbers<[1], [0], [0], [1], [0, 0, 1, 1], [], []>} : vector<2x32xf32>, vector<32x16xf32>, vector<2x16xf32> -> vector<2x16xf32>
    %c0_301 = arith.constant 0 : index
    %c0_302 = arith.constant 0 : index
    %707 = vector.load %arg21[%c0_301, %c0_302] : memref<1x16xf32, #tpu.memory_space<vmem>>, vector<1x16xf32>
    %708 = vector.broadcast %707 : vector<1x16xf32> to vector<2x16xf32>
    %709 = arith.addf %706, %708 : vector<2x16xf32>
    %c0_303 = arith.constant 0 : index
    %c0_304 = arith.constant 0 : index
    %710 = vector.load %arg22[%c0_303, %c0_304] : memref<2x16xf32, #tpu.memory_space<vmem>>, vector<2x16xf32>
    tpu.vector_store %arg22[%c0_303, %c0_304], %709 {strides = array<i32>} : memref<2x16xf32, #tpu.memory_space<vmem>>, vector<2x16xf32>,
    return
  }
}

</mosaic_0001>

<bundles_post_ra>
// kernel: rnn_transformer_forward.1
= control target key start
LH: loop header
LB: loop body
LE: loop exit
PB: predicated region body
PF: predicated region fallthrough
CT: control target
= control target key end

     0   :  { %s8617_s0 = inlined_call_operand.vmem [shape: f32[2,8,8], index: 0, kind: input, shape index: {}]   ;;  %s8618_s1 = inlined_call_operand.vmem [shape: f32[2,1], index: 1, kind: input, shape index: {}]   ;;  %s8619_s2 = inlined_call_operand.vmem [shape: f32[8,96], index: 2, kind: input, shape index: {}]   ;;  %s8620_s3 = inlined_call_operand.vmem [shape: f32[32,96], index: 3, kind: input, shape index: {}]   ;;  %s8621_s4 = inlined_call_operand.vmem [shape: f32[1,96], index: 4, kind: input, shape index: {}]   ;;  %s8622_s5 = inlined_call_operand.vmem [shape: f32[1,32], index: 5, kind: input, shape index: {}]   ;;  %s8623_s6 = inlined_call_operand.vmem [shape: f32[2,4,32,24], index: 6, kind: input, shape index: {}]   ;;  %s8624_s7 = inlined_call_operand.vmem [shape: f32[2,4,1,24], index: 7, kind: input, shape index: {}]   ;;  %s8625_s8 = inlined_call_operand.vmem [shape: f32[2,4,8,32], index: 8, kind: input, shape index: {}]   ;;  %s8626_s9 = inlined_call_operand.vmem [shape: f32[2,1,32], index: 9, kind: input, shape index: {}]   ;;  %s8627_s10 = inlined_call_operand.vmem [shape: f32[2,1,32], index: 10, kind: input, shape index: {}]   ;;  %s8628_s11 = inlined_call_operand.vmem [shape: f32[2,1,32], index: 11, kind: input, shape index: {}]   ;;  %s8629_s12 = inlined_call_operand.vmem [shape: f32[2,32,64], index: 12, kind: input, shape index: {}]   ;;  %s8630_s13 = inlined_call_operand.vmem [shape: f32[2,1,64], index: 13, kind: input, shape index: {}]   ;;  %s8631_s14 = inlined_call_operand.vmem [shape: f32[2,64,32], index: 14, kind: input, shape index: {}]   ;;  %s8632_s15 = inlined_call_operand.vmem [shape: f32[2,1,32], index: 15, kind: input, shape index: {}]   ;;  %s8633_s16 = inlined_call_operand.vmem [shape: f32[2,1,32], index: 16, kind: input, shape index: {}]   ;;  %s8634_s17 = inlined_call_operand.vmem [shape: f32[2,1,32], index: 17, kind: input, shape index: {}]   ;;  %s8635_s18 = inlined_call_operand.vmem [shape: f32[32,32], index: 18, kind: input, shape index: {}]   ;;  %s8636_s19 = inlined_call_operand.vmem [shape: f32[1,32], index: 19, kind: input, shape index: {}]   ;;  %s8637_s20 = inlined_call_operand.vmem [shape: f32[32,16], index: 20, kind: input, shape index: {}]   ;;  %s8638_s21 = inlined_call_operand.vmem [shape: f32[1,16], index: 21, kind: input, shape index: {}]   ;;  %s8639_s22 = inlined_call_operand.hbm [shape: f32[2,16], index: 22, kind: output, shape index: {}]  }
   0x1   :  { %8643 = sst [smem:[#allocation6_spill]] %s8617_s0 }
   0x2   :  { %8644 = sst [smem:[#allocation7_spill]] %s8618_s1 }
   0x3   :  { %8645 = sst [smem:[#allocation8_spill]] %s8619_s2 }
   0x4   :  { %8646 = sst [smem:[#allocation9_spill]] %s8620_s3 }
   0x5   :  { %8647 = sst [smem:[#allocation10_spill]] %s8621_s4 }
   0x6   :  { %8648 = sst [smem:[#allocation11_spill]] %s8622_s5 }
   0x7   :  { %8649 = sst [smem:[#allocation12_spill]] %s8623_s6 }
   0x8   :  { %s8650_s29 = sld [smem:[#allocation9_spill]]  ;;  %s8651_s1 = sld [smem:[#allocation8_spill]]  ;;  %vm133_vm0 = vcmask 64512   ;;  %v7541_v3 = vmov 0.0|0.0  }
   0x9   :  { %7138 = vmatprep.subr.bf16.mxu1 %v7541_v3  ;;  %s8652_s6 = sld [smem:[#allocation6_spill]]  ;;  %s8653_s0 = sld [smem:[#allocation11_spill]] }
   0xe   :  { %v215_v0 = vld [vmem:[%s8650_s29] sm:$0xff]  ;;  %v216_v1 = vld [vmem:[%s8650_s29 + $0x8] sm:$0xff]  ;;  %v217_v7 = vld [vmem:[%s8650_s29 + $0x10] sm:$0xff] }
   0xf   :  { %v125_v2 = vld [vmem:[%s8651_s1] sm:$0xff]  ;;  %v7676_v4 = vpack.c.bf16 %v216_v1, %v215_v0  ;;  %v124_v6 = vld [vmem:[%s8652_s6 + $0x8] sm:$0xff]  ;;  %v218_v8 = vld [vmem:[%s8650_s29 + $0x18] sm:$0xff] }
  0x10   :  { %6675 = vmatprep.subr.mxu0 %v125_v2  ;;  %v123_v5 = vld [vmem:[%s8652_s6] sm:$0xff] }
  0x11   :  { %6676 = vmatpush3.msra.mxu0 %v125_v2  ;;  %6677 = vmatprep.mubr.msk.f32.mxu0 %vm133_vm0, %v123_v5  ;;  %v6257_v9 = vld [vmem:[%s8653_s0] ss:$0 sm:$0xff] }
  0x12   :  { %27 = vsyncpa [#allocation4], 0  ;;  %7140 = vmatpush3.bf16.msra.mxu1 %v7676_v4  ;;  %6678 = vmatmul.mubr.msk.f32.vlgmr.msra.gmra.mrb[0].mxu0 %vm133_vm0, %v124_v6  ;;  %v7696_v10 = vpack.c.bf16 %v218_v8, %v217_v7  ;;  %vm7542_vm1 = vmmov 0   ;;  %v7543_v11 = vmov 0.0   ;;  %s7544_s23 = smov 64   ;;  %s8654_s5 = sld [smem:[#allocation10_spill]] }
  0x13   :  { %7141 = vmatprep.subr.bf16.mxu1 %v7541_v3  ;;  %6688 = vmatprep.mubr.msk.f32.mxu1 %vm7542_vm1, %v7543_v11  ;;  %s7545_s24 = smov 96   ;;  %vm371_vm2 = vcmask 1041409   ;;  %vm220_vm3 = vcmask 261120   ;;  %s8655_s26 = sld [smem:[#allocation12_spill]]  ;;  %vm515_vm4 = vcmask 254977   ;;  %vm367_vm5 = vcmask 253952  }
  0x14   :  { %317 = vrot.lane.b32.xlu0 %v6257_v9, %s7544_s23  ;;  %7144 = vmatprep.subr.bf16.mxu0 %v7541_v3  ;;  %vm816_vm6 = vcmask 257027   ;;  %vm665_vm7 = vcmask 256002   ;;  %vm1118_vm8 = vcmask 259077   ;;  %vm967_vm9 = vcmask 258052   ;;  %s7547_s29 = smov 120   ;;  %s7549_s6 = smov 112  }
  0x15   :  { %7146 = vmatpush3.bf16.msra.mxu0 %v7676_v4  ;;  %6699 = vmatprep.mubr.msk.f32.mxu0 %vm7542_vm1, %v7543_v11  ;;  %vm1269_vm10 = vcmask 260102   ;;  %vm1420_vm11 = vcmask 261127   ;;  %vm3605_vm13 = vcmask 523264   ;;  %vm6235_vm14 = vcmask 123904  }
  0x16   :  { %7143 = vmatpush3.bf16.msra.mxu1 %v7696_v10  ;;  %7147 = vmatprep.subr.bf16.mxu0 %v7541_v3 }
  0x17   :  { %7150 = vmatprep.subr.bf16.mxu1 %v7541_v3 }
  0x18   :  { %v6252_v19 = vld [vmem:[%s8654_s5] ss:$0 sm:$0xff] }
  0x19   :  { %6689 = vmatmul.mubr.f32.vlgmr.msra.gmra.mrb[0].mxu1 %v7543_v11  ;;  %7149 = vmatpush3.bf16.msra.mxu0 %v7696_v10 }
  0x1a   :  { %7152 = vmatpush3.bf16.msra.mxu1 %v7676_v4  ;;  %6710 = vmatprep.mubr.msk.f32.mxu1 %vm7542_vm1, %v7543_v11 }
  0x1b   :  { %7153 = vmatprep.subr.bf16.mxu1 %v7541_v3  ;;  %7156 = vmatprep.subr.bf16.mxu0 %v7541_v3 }
  0x1e   :  { %7155 = vmatpush3.bf16.msra.mxu1 %v7696_v10 }
  0x1f   :  { %7162 = vmatprep.subr.bf16.mxu1 %v7541_v3 }
  0x86   :  { %v7718_v14 = vpop.permute.xlu0 %317 }
  0xe5   :  { %v6679_v12 = vpop.f32.mrb[0].mxu0 }
  0xe6   :  { %v206_v13 = vpop.f32.mrb[1].mxu0  ;;  %v7728_v21 = vadd.f32 %v6679_v12, %v6252_v19 }
  0xe7   :  { %v7726_v20 = vadd.f32 %v6252_v19, %v206_v13 }
  0xec   :  { %v290_v15 = vpop.f32.mrb[0].mxu1 }
  0xed   :  { %v6690_v16 = vpop.f32.mrb[1].mxu1  ;;  %v320_v17 = vadd.f32 %v7718_v14, %v290_v15  ;;  %v295_v22 = vrot.slane %v290_v15, 1  ;;  %v298_v23 = vadd.f32 %v290_v15, %v7726_v20 }
  0xef   :  { %323 = vrot.lane.b32.xlu1 %v320_v17, %s7544_s23  ;;  %v322_v18 = vrot.slane %v320_v17, 1  ;;  %v299_v24 = vadd.f32 %v295_v22, %v7728_v21  ;;  %v6255_v25 = vmul.f32 -1.442695, %v298_v23 }
  0xf1   :  { %325 = vrot.lane.b32.xlu0 %v322_v18, %s7544_s23  ;;  %v6256_v26 = vmul.f32 -1.442695, %v299_v24  ;;  %7337 = vpow2.f32 %v6255_v25 }
  0xf3   :  { %7339 = vpow2.f32 %v6256_v26 }
  0xfb   :  { %v7338_v27 = vpop.eup %7337 }
  0xfc   :  { %v306_v29 = vadd.f32 1.0, %v7338_v27 }
  0xfd   :  { %v7340_v28 = vpop.eup %7339 }
  0xfe   :  { %v307_v30 = vadd.f32 1.0, %v7340_v28  ;;  %7341 = vrcp.f32 %v306_v29 }
 0x100   :  { %7343 = vrcp.f32 %v307_v30 }
 0x108   :  { %v7342_v31 = vpop.eup %7341 }
 0x109   :  { %v343_v44 = vsub.f32 1.0, %v7342_v31  ;;  %v355_v50 = vmul.f32 0.0, %v7342_v31 }
 0x10a   :  { %v7344_v34 = vpop.eup %7343 }
 0x10b   :  { %v344_v45 = vsub.f32 1.0, %v7344_v34  ;;  %v356_v48 = vmul.f32 0.0, %v7344_v34 }
 0x161   :  { %v324_v32 = vpop.permute.xlu1 %323 }
 0x162   :  { %v329_v33 = vmul.f32 %v7342_v31, %v324_v32 }
 0x163   :  { %v326_v35 = vpop.permute.xlu0 %325 }
 0x164   :  { %v330_v36 = vmul.f32 %v7344_v34, %v326_v35  ;;  %333 = vrot.lane.b32.xlu0 %v329_v33, %s7544_s23 }
 0x166   :  { %335 = vrot.lane.b32.xlu1 %v330_v36, %s7544_s23 }
 0x1d6   :  { %v334_v37 = vpop.permute.xlu0 %333 }
 0x1d7   :  { %v339_v38 = vadd.f32 %v334_v37, %v7726_v20 }
 0x1d8   :  { %v336_v39 = vpop.permute.xlu1 %335 }
 0x1d9   :  { %7345 = vtanh.f32 %v339_v38  ;;  %v340_v40 = vadd.f32 %v336_v39, %v7728_v21 }
 0x1db   :  { %7347 = vtanh.f32 %v340_v40 }
 0x1e3   :  { %v7346_v41 = vpop.eup %7345 }
 0x1e4   :  { %347 = vrot.lane.b32.xlu0 %v7346_v41, %s7545_s24 }
 0x1e5   :  { %v7348_v42 = vpop.eup %7347 }
 0x1e6   :  { %349 = vrot.lane.b32.xlu1 %v7348_v42, %s7545_s24 }
 0x256   :  { %v348_v43 = vpop.permute.xlu0 %347 }
 0x257   :  { %v353_v47 = vmul.f32 %v348_v43, %v343_v44 }
 0x258   :  { %v350_v46 = vpop.permute.xlu1 %349 }
 0x259   :  { %v354_v49 = vmul.f32 %v350_v46, %v344_v45  ;;  %v7740_v52 = vadd.f32 %v355_v50, %v353_v47 }
 0x25b   :  { %v7738_v51 = vadd.f32 %v356_v48, %v354_v49  ;;  %v500_v27 = vrot.slane %v7740_v52, 7 }
 0x25d   :  { %v370_v53 = vrot.slane %v7738_v51, 7 }
 0x25f   :  { %v372_v54 = vsel %vm371_vm2, %v370_v53, %v7740_v52 }
 0x260   :  { %373 = vrot.lane.b32.xlu1 %v372_v54, %s7545_s24 }
 0x2d2   :  { %v374_v55 = vpop.permute.xlu1 %373 }
 0x2d3   :  { %6700 = vmatmul.mubr.msk.f32.vlgmr.msra.gmra.mrb[2].mxu0 %vm220_vm3, %v374_v55 }
 0x2d4   :  { %7158 = vmatpush3.bf16.msra.mxu0 %v7676_v4  ;;  %6721 = vmatprep.mubr.msk.f32.mxu0 %vm7542_vm1, %v7543_v11 }
 0x2d5   :  { %7159 = vmatprep.subr.bf16.mxu0 %v7541_v3 }
 0x2d8   :  { %7161 = vmatpush3.bf16.msra.mxu0 %v7696_v10 }
 0x2d9   :  { %7168 = vmatprep.subr.bf16.mxu0 %v7541_v3 }
 0x3a6   :  { %v443_v56 = vpop.f32.mrb[2].mxu0 }
 0x3a7   :  { %v465_v57 = vadd.f32 %v443_v56, %v7718_v14  ;;  %v6701_v58 = vpop.f32.mrb[3].mxu0  ;;  %v448_v60 = vrot.slane %v443_v56, 7  ;;  %v452_v61 = vadd.f32 %v443_v56, %v7728_v21 }
 0x3a9   :  { %470 = vrot.lane.b32.xlu1 %v465_v57, %s7544_s23  ;;  %v467_v59 = vrot.slane %v465_v57, 7  ;;  %v451_v62 = vadd.f32 %v448_v60, %v7726_v20  ;;  %v6260_v63 = vmul.f32 -1.442695, %v452_v61 }
 0x3ab   :  { %468 = vrot.lane.b32.xlu0 %v467_v59, %s7544_s23  ;;  %v6259_v0 = vmul.f32 -1.442695, %v451_v62  ;;  %7349 = vpow2.f32 %v6260_v63 }
 0x3ad   :  { %7351 = vpow2.f32 %v6259_v0 }
 0x3b5   :  { %v7350_v1 = vpop.eup %7349 }
 0x3b6   :  { %v460_v5 = vadd.f32 1.0, %v7350_v1 }
 0x3b7   :  { %v7352_v2 = vpop.eup %7351 }
 0x3b8   :  { %v459_v6 = vadd.f32 1.0, %v7352_v2  ;;  %7353 = vrcp.f32 %v460_v5 }
 0x3ba   :  { %7355 = vrcp.f32 %v459_v6 }
 0x3c2   :  { %v7354_v7 = vpop.eup %7353 }
 0x3c3   :  { %v489_v25 = vsub.f32 1.0, %v7354_v7  ;;  %v504_v32 = vmul.f32 %v7354_v7, %v370_v53 }
 0x3c4   :  { %v7356_v12 = vpop.eup %7355 }
 0x3c5   :  { %v488_v26 = vsub.f32 1.0, %v7356_v12  ;;  %v503_v30 = vmul.f32 %v7356_v12, %v500_v27 }
 0x41b   :  { %v471_v8 = vpop.permute.xlu1 %470 }
 0x41c   :  { %v475_v9 = vmul.f32 %v7354_v7, %v471_v8 }
 0x41d   :  { %v469_v13 = vpop.permute.xlu0 %468 }
 0x41e   :  { %v474_v15 = vmul.f32 %v7356_v12, %v469_v13  ;;  %480 = vrot.lane.b32.xlu1 %v475_v9, %s7544_s23 }
 0x420   :  { %478 = vrot.lane.b32.xlu0 %v474_v15, %s7544_s23 }
 0x490   :  { %v481_v16 = vpop.permute.xlu1 %480 }
 0x491   :  { %v485_v17 = vadd.f32 %v481_v16, %v7728_v21 }
 0x492   :  { %v479_v18 = vpop.permute.xlu0 %478 }
 0x493   :  { %7357 = vtanh.f32 %v485_v17  ;;  %v484_v19 = vadd.f32 %v479_v18, %v7726_v20 }
 0x495   :  { %7359 = vtanh.f32 %v484_v19 }
 0x49d   :  { %v7358_v22 = vpop.eup %7357 }
 0x49e   :  { %494 = vrot.lane.b32.xlu1 %v7358_v22, %s7545_s24 }
 0x49f   :  { %v7360_v23 = vpop.eup %7359 }
 0x4a0   :  { %492 = vrot.lane.b32.xlu0 %v7360_v23, %s7545_s24 }
 0x510   :  { %v495_v24 = vpop.permute.xlu1 %494 }
 0x511   :  { %v499_v29 = vmul.f32 %v495_v24, %v489_v25 }
 0x512   :  { %v493_v28 = vpop.permute.xlu0 %492 }
 0x513   :  { %v498_v31 = vmul.f32 %v493_v28, %v488_v26  ;;  %v7767_v34 = vadd.f32 %v504_v32, %v499_v29 }
 0x515   :  { %v7765_v33 = vadd.f32 %v503_v30, %v498_v31  ;;  %v650_v6 = vrot.slane %v7767_v34, 7 }
 0x517   :  { %v518_v35 = vrot.slane %v7765_v33, 1  ;;  %v649_v9 = vrot.slane %v7765_v33, 7 }
 0x519   :  { %v519_v36 = vsel %vm371_vm2, %v7767_v34, %v518_v35 }
 0x51a   :  { %520 = vrot.lane.b32.xlu0 %v519_v36, %s7545_s24 }
 0x58c   :  { %v521_v37 = vpop.permute.xlu0 %520 }
 0x58d   :  { %6711 = vmatmul.mubr.msk.f32.vlgmr.msra.gmra.mrb[2].mxu1 %vm220_vm3, %v521_v37 }
 0x58e   :  { %7164 = vmatpush3.bf16.msra.mxu1 %v7676_v4  ;;  %6732 = vmatprep.mubr.msk.f32.mxu1 %vm7542_vm1, %v7543_v11 }
 0x58f   :  { %7165 = vmatprep.subr.bf16.mxu1 %v7541_v3 }
 0x592   :  { %7167 = vmatpush3.bf16.msra.mxu1 %v7696_v10 }
 0x593   :  { %7174 = vmatprep.subr.bf16.mxu1 %v7541_v3 }
 0x660   :  { %v590_v38 = vpop.f32.mrb[2].mxu1 }
 0x661   :  { %v613_v39 = vadd.f32 %v590_v38, %v7718_v14  ;;  %v6712_v40 = vpop.f32.mrb[3].mxu1  ;;  %v595_v43 = vrot.slane %v590_v38, 6  ;;  %v596_v44 = vrot.slane %v590_v38, 7 }
 0x663   :  { %v616_v41 = vrot.slane %v613_v39, 7  ;;  %v615_v42 = vrot.slane %v613_v39, 6  ;;  %v599_v45 = vadd.f32 %v595_v43, %v7726_v20  ;;  %v600_v46 = vadd.f32 %v596_v44, %v7728_v21 }
 0x665   :  { %619 = vrot.lane.b32.xlu0 %v616_v41, %s7544_s23  ;;  %617 = vrot.lane.b32.xlu1 %v615_v42, %s7544_s23  ;;  %v6262_v47 = vmul.f32 -1.442695, %v599_v45  ;;  %v6263_v48 = vmul.f32 -1.442695, %v600_v46 }
 0x667   :  { %7361 = vpow2.f32 %v6262_v47 }
 0x668   :  { %7363 = vpow2.f32 %v6263_v48 }
 0x671   :  { %v7362_v49 = vpop.eup %7361 }
 0x672   :  { %v7364_v50 = vpop.eup %7363  ;;  %v607_v53 = vadd.f32 1.0, %v7362_v49 }
 0x673   :  { %v608_v54 = vadd.f32 1.0, %v7364_v50 }
 0x674   :  { %7365 = vrcp.f32 %v607_v53 }
 0x675   :  { %7367 = vrcp.f32 %v608_v54 }
 0x67e   :  { %v7366_v55 = vpop.eup %7365 }
 0x67f   :  { %v7368_v56 = vpop.eup %7367  ;;  %v637_v8 = vsub.f32 1.0, %v7366_v55  ;;  %v653_v16 = vmul.f32 %v7366_v55, %v649_v9 }
 0x680   :  { %v638_v5 = vsub.f32 1.0, %v7368_v56  ;;  %v654_v12 = vmul.f32 %v7368_v56, %v650_v6 }
 0x6d7   :  { %v620_v57 = vpop.permute.xlu0 %619  ;;  %v618_v58 = vpop.permute.xlu1 %617 }
 0x6d8   :  { %v624_v59 = vmul.f32 %v7368_v56, %v620_v57  ;;  %v623_v60 = vmul.f32 %v7366_v55, %v618_v58 }
 0x6da   :  { %629 = vrot.lane.b32.xlu0 %v624_v59, %s7544_s23  ;;  %627 = vrot.lane.b32.xlu1 %v623_v60, %s7544_s23 }
 0x74c   :  { %v630_v61 = vpop.permute.xlu0 %629  ;;  %v628_v62 = vpop.permute.xlu1 %627 }
 0x74d   :  { %v634_v63 = vadd.f32 %v630_v61, %v7728_v21  ;;  %v633_v0 = vadd.f32 %v628_v62, %v7726_v20 }
 0x74f   :  { %7369 = vtanh.f32 %v634_v63 }
 0x750   :  { %7371 = vtanh.f32 %v633_v0 }
 0x759   :  { %v7370_v1 = vpop.eup %7369 }
 0x75a   :  { %v7372_v2 = vpop.eup %7371  ;;  %643 = vrot.lane.b32.xlu0 %v7370_v1, %s7545_s24 }
 0x75b   :  { %641 = vrot.lane.b32.xlu1 %v7372_v2, %s7545_s24 }
 0x7cc   :  { %v644_v7 = vpop.permute.xlu0 %643 }
 0x7cd   :  { %v648_v13 = vmul.f32 %v644_v7, %v638_v5  ;;  %v642_v15 = vpop.permute.xlu1 %641 }
 0x7ce   :  { %v647_v17 = vmul.f32 %v642_v15, %v637_v8 }
 0x7cf   :  { %v7793_v18 = vadd.f32 %v654_v12, %v648_v13 }
 0x7d0   :  { %v7795_v19 = vadd.f32 %v653_v16, %v647_v17 }
 0x7d1   :  { %v669_v22 = vrot.slane %v7793_v18, 1  ;;  %v801_v58 = vrot.slane %v7793_v18, 7 }
 0x7d2   :  { %v668_v23 = vrot.slane %v7795_v19, 2  ;;  %v800_v61 = vrot.slane %v7795_v19, 7 }
 0x7d4   :  { %v670_v24 = vsel %vm371_vm2, %v669_v22, %v668_v23 }
 0x7d5   :  { %671 = vrot.lane.b32.xlu1 %v670_v24, %s7545_s24 }
 0x847   :  { %v672_v25 = vpop.permute.xlu1 %671 }
 0x848   :  { %6722 = vmatmul.mubr.msk.f32.vlgmr.msra.gmra.mrb[4].mxu0 %vm220_vm3, %v672_v25 }
 0x849   :  { %7170 = vmatpush3.bf16.msra.mxu0 %v7676_v4  ;;  %6743 = vmatprep.mubr.msk.f32.mxu0 %vm7542_vm1, %v7543_v11 }
 0x84a   :  { %7171 = vmatprep.subr.bf16.mxu0 %v7541_v3 }
 0x84d   :  { %7173 = vmatpush3.bf16.msra.mxu0 %v7696_v10 }
 0x84e   :  { %7180 = vmatprep.subr.bf16.mxu0 %v7541_v3 }
 0x91b   :  { %v741_v26 = vpop.f32.mrb[4].mxu0 }
 0x91c   :  { %v764_v27 = vadd.f32 %v741_v26, %v7718_v14  ;;  %v6723_v28 = vpop.f32.mrb[5].mxu0  ;;  %v746_v31 = vrot.slane %v741_v26, 5  ;;  %v747_v32 = vrot.slane %v741_v26, 6 }
 0x91e   :  { %v767_v29 = vrot.slane %v764_v27, 6  ;;  %v766_v30 = vrot.slane %v764_v27, 5  ;;  %v750_v35 = vadd.f32 %v746_v31, %v7726_v20  ;;  %v751_v36 = vadd.f32 %v747_v32, %v7728_v21 }
 0x920   :  { %770 = vrot.lane.b32.xlu1 %v767_v29, %s7544_s23  ;;  %768 = vrot.lane.b32.xlu0 %v766_v30, %s7544_s23  ;;  %v6265_v37 = vmul.f32 -1.442695, %v750_v35  ;;  %v6266_v38 = vmul.f32 -1.442695, %v751_v36 }
 0x922   :  { %7373 = vpow2.f32 %v6265_v37 }
 0x923   :  { %7375 = vpow2.f32 %v6266_v38 }
 0x92c   :  { %v7374_v39 = vpop.eup %7373 }
 0x92d   :  { %v7376_v40 = vpop.eup %7375  ;;  %v758_v41 = vadd.f32 1.0, %v7374_v39 }
 0x92e   :  { %v759_v42 = vadd.f32 1.0, %v7376_v40 }
 0x92f   :  { %7377 = vrcp.f32 %v758_v41 }
 0x930   :  { %7379 = vrcp.f32 %v759_v42 }
 0x939   :  { %v7378_v43 = vpop.eup %7377 }
 0x93a   :  { %v7380_v44 = vpop.eup %7379  ;;  %v788_v60 = vsub.f32 1.0, %v7378_v43  ;;  %v804_v1 = vmul.f32 %v7378_v43, %v800_v61 }
 0x93b   :  { %v789_v57 = vsub.f32 1.0, %v7380_v44  ;;  %v805_v62 = vmul.f32 %v7380_v44, %v801_v58 }
 0x992   :  { %v771_v45 = vpop.permute.xlu1 %770  ;;  %v769_v46 = vpop.permute.xlu0 %768 }
 0x993   :  { %v775_v47 = vmul.f32 %v7380_v44, %v771_v45  ;;  %v774_v48 = vmul.f32 %v7378_v43, %v769_v46 }
 0x995   :  { %780 = vrot.lane.b32.xlu1 %v775_v47, %s7544_s23  ;;  %778 = vrot.lane.b32.xlu0 %v774_v48, %s7544_s23 }
 0xa07   :  { %v781_v49 = vpop.permute.xlu1 %780  ;;  %v779_v50 = vpop.permute.xlu0 %778 }
 0xa08   :  { %v785_v53 = vadd.f32 %v781_v49, %v7728_v21  ;;  %v784_v54 = vadd.f32 %v779_v50, %v7726_v20 }
 0xa0a   :  { %7381 = vtanh.f32 %v785_v53 }
 0xa0b   :  { %7383 = vtanh.f32 %v784_v54 }
 0xa14   :  { %v7382_v55 = vpop.eup %7381 }
 0xa15   :  { %v7384_v56 = vpop.eup %7383  ;;  %794 = vrot.lane.b32.xlu1 %v7382_v55, %s7545_s24 }
 0xa16   :  { %792 = vrot.lane.b32.xlu0 %v7384_v56, %s7545_s24 }
 0xa87   :  { %v795_v59 = vpop.permute.xlu1 %794 }
 0xa88   :  { %v799_v63 = vmul.f32 %v795_v59, %v789_v57  ;;  %v793_v0 = vpop.permute.xlu0 %792 }
 0xa89   :  { %v798_v2 = vmul.f32 %v793_v0, %v788_v60 }
 0xa8a   :  { %v7821_v5 = vadd.f32 %v805_v62, %v799_v63 }
 0xa8b   :  { %v7823_v6 = vadd.f32 %v804_v1, %v798_v2 }
 0xa8c   :  { %v820_v7 = vrot.slane %v7821_v5, 2  ;;  %v952_v48 = vrot.slane %v7821_v5, 7 }
 0xa8d   :  { %v819_v8 = vrot.slane %v7823_v6, 3  ;;  %v951_v53 = vrot.slane %v7823_v6, 7 }
 0xa8f   :  { %v821_v9 = vsel %vm371_vm2, %v820_v7, %v819_v8 }
 0xa90   :  { %822 = vrot.lane.b32.xlu0 %v821_v9, %s7545_s24 }
 0xb02   :  { %v823_v12 = vpop.permute.xlu0 %822 }
 0xb03   :  { %6733 = vmatmul.mubr.msk.f32.vlgmr.msra.gmra.mrb[4].mxu1 %vm220_vm3, %v823_v12 }
 0xb04   :  { %7176 = vmatpush3.bf16.msra.mxu1 %v7676_v4  ;;  %6754 = vmatprep.mubr.msk.f32.mxu1 %vm7542_vm1, %v7543_v11 }
 0xb05   :  { %7177 = vmatprep.subr.bf16.mxu1 %v7541_v3 }
 0xb08   :  { %7179 = vmatpush3.bf16.msra.mxu1 %v7696_v10 }
 0xbd6   :  { %v892_v13 = vpop.f32.mrb[4].mxu1 }
 0xbd7   :  { %v915_v15 = vadd.f32 %v892_v13, %v7718_v14  ;;  %v6734_v16 = vpop.f32.mrb[5].mxu1  ;;  %v897_v23 = vrot.slane %v892_v13, 4  ;;  %v898_v24 = vrot.slane %v892_v13, 5 }
 0xbd9   :  { %v918_v17 = vrot.slane %v915_v15, 5  ;;  %v917_v22 = vrot.slane %v915_v15, 4  ;;  %v901_v25 = vadd.f32 %v897_v23, %v7726_v20  ;;  %v902_v26 = vadd.f32 %v898_v24, %v7728_v21 }
 0xbdb   :  { %921 = vrot.lane.b32.xlu0 %v918_v17, %s7544_s23  ;;  %919 = vrot.lane.b32.xlu1 %v917_v22, %s7544_s23  ;;  %v6268_v27 = vmul.f32 -1.442695, %v901_v25  ;;  %v6269_v28 = vmul.f32 -1.442695, %v902_v26 }
 0xbdd   :  { %7385 = vpow2.f32 %v6268_v27 }
 0xbde   :  { %7387 = vpow2.f32 %v6269_v28 }
 0xbe7   :  { %v7386_v29 = vpop.eup %7385 }
 0xbe8   :  { %v7388_v30 = vpop.eup %7387  ;;  %v909_v31 = vadd.f32 1.0, %v7386_v29 }
 0xbe9   :  { %v910_v32 = vadd.f32 1.0, %v7388_v30 }
 0xbea   :  { %7389 = vrcp.f32 %v909_v31 }
 0xbeb   :  { %7391 = vrcp.f32 %v910_v32 }
 0xbf4   :  { %v7390_v35 = vpop.eup %7389 }
 0xbf5   :  { %v7392_v36 = vpop.eup %7391  ;;  %v939_v50 = vsub.f32 1.0, %v7390_v35  ;;  %v955_v57 = vmul.f32 %v7390_v35, %v951_v53 }
 0xbf6   :  { %v940_v47 = vsub.f32 1.0, %v7392_v36  ;;  %v956_v54 = vmul.f32 %v7392_v36, %v952_v48 }
 0xc4d   :  { %v922_v37 = vpop.permute.xlu0 %921  ;;  %v920_v38 = vpop.permute.xlu1 %919 }
 0xc4e   :  { %v926_v39 = vmul.f32 %v7392_v36, %v922_v37  ;;  %v925_v40 = vmul.f32 %v7390_v35, %v920_v38 }
 0xc50   :  { %931 = vrot.lane.b32.xlu0 %v926_v39, %s7544_s23  ;;  %929 = vrot.lane.b32.xlu1 %v925_v40, %s7544_s23 }
 0xcc2   :  { %v932_v41 = vpop.permute.xlu0 %931  ;;  %v930_v42 = vpop.permute.xlu1 %929 }
 0xcc3   :  { %v936_v43 = vadd.f32 %v932_v41, %v7728_v21  ;;  %v935_v44 = vadd.f32 %v930_v42, %v7726_v20 }
 0xcc5   :  { %7393 = vtanh.f32 %v936_v43 }
 0xcc6   :  { %7395 = vtanh.f32 %v935_v44 }
 0xccf   :  { %v7394_v45 = vpop.eup %7393 }
 0xcd0   :  { %v7396_v46 = vpop.eup %7395  ;;  %945 = vrot.lane.b32.xlu0 %v7394_v45, %s7545_s24 }
 0xcd1   :  { %943 = vrot.lane.b32.xlu1 %v7396_v46, %s7545_s24 }
 0xd42   :  { %v946_v49 = vpop.permute.xlu0 %945 }
 0xd43   :  { %v950_v55 = vmul.f32 %v946_v49, %v940_v47  ;;  %v944_v56 = vpop.permute.xlu1 %943 }
 0xd44   :  { %v949_v58 = vmul.f32 %v944_v56, %v939_v50 }
 0xd45   :  { %v7848_v59 = vadd.f32 %v956_v54, %v950_v55 }
 0xd46   :  { %v7850_v60 = vadd.f32 %v955_v57, %v949_v58 }
 0xd47   :  { %v971_v61 = vrot.slane %v7848_v59, 3  ;;  %v1103_v40 = vrot.slane %v7848_v59, 7 }
 0xd48   :  { %v970_v62 = vrot.slane %v7850_v60, 4  ;;  %v1102_v43 = vrot.slane %v7850_v60, 7 }
 0xd4a   :  { %v972_v63 = vsel %vm371_vm2, %v971_v61, %v970_v62 }
 0xd4b   :  { %973 = vrot.lane.b32.xlu1 %v972_v63, %s7545_s24 }
 0xdbd   :  { %v974_v0 = vpop.permute.xlu1 %973 }
 0xdbe   :  { %6744 = vmatmul.mubr.msk.f32.vlgmr.msra.gmra.mrb[6].mxu0 %vm220_vm3, %v974_v0 }
 0xdbf   :  { %7182 = vmatpush3.bf16.msra.mxu0 %v7676_v4  ;;  %6765 = vmatprep.mubr.msk.f32.mxu0 %vm7542_vm1, %v7543_v11 }
 0xdc0   :  { %7183 = vmatprep.subr.bf16.mxu0 %v7541_v3 }
 0xdc3   :  { %7185 = vmatpush3.bf16.msra.mxu0 %v7696_v10 }
 0xdc4   :  { %6779 = vmatprep.subr.mxu0 %v7543_v11 }
 0xe91   :  { %v1043_v1 = vpop.f32.mrb[6].mxu0 }
 0xe92   :  { %v1066_v2 = vadd.f32 %v1043_v1, %v7718_v14  ;;  %v6745_v7 = vpop.f32.mrb[7].mxu0  ;;  %v1048_v4 = vrot.slane %v1043_v1, 3  ;;  %v1049_v12 = vrot.slane %v1043_v1, 4 }
 0xe94   :  { %v1069_v8 = vrot.slane %v1066_v2, 4  ;;  %v1068_v9 = vrot.slane %v1066_v2, 3  ;;  %v1052_v13 = vadd.f32 %v1048_v4, %v7726_v20  ;;  %v1053_v15 = vadd.f32 %v1049_v12, %v7728_v21 }
 0xe96   :  { %1072 = vrot.lane.b32.xlu1 %v1069_v8, %s7544_s23  ;;  %1070 = vrot.lane.b32.xlu0 %v1068_v9, %s7544_s23  ;;  %v6271_v16 = vmul.f32 -1.442695, %v1052_v13  ;;  %v6272_v10 = vmul.f32 -1.442695, %v1053_v15 }
 0xe98   :  { %7397 = vpow2.f32 %v6271_v16 }
 0xe99   :  { %7399 = vpow2.f32 %v6272_v10 }
 0xea2   :  { %v7398_v17 = vpop.eup %7397 }
 0xea3   :  { %v7400_v22 = vpop.eup %7399  ;;  %v1060_v23 = vadd.f32 1.0, %v7398_v17 }
 0xea4   :  { %v1061_v24 = vadd.f32 1.0, %v7400_v22 }
 0xea5   :  { %7401 = vrcp.f32 %v1060_v23 }
 0xea6   :  { %7403 = vrcp.f32 %v1061_v24 }
 0xeaf   :  { %v7402_v25 = vpop.eup %7401 }
 0xeb0   :  { %v7404_v26 = vpop.eup %7403  ;;  %v1090_v42 = vsub.f32 1.0, %v7402_v25  ;;  %v1106_v47 = vmul.f32 %v7402_v25, %v1102_v43 }
 0xeb1   :  { %v1091_v39 = vsub.f32 1.0, %v7404_v26  ;;  %v1107_v44 = vmul.f32 %v7404_v26, %v1103_v40 }
 0xf08   :  { %v1073_v27 = vpop.permute.xlu1 %1072  ;;  %v1071_v28 = vpop.permute.xlu0 %1070 }
 0xf09   :  { %v1077_v29 = vmul.f32 %v7404_v26, %v1073_v27  ;;  %v1076_v30 = vmul.f32 %v7402_v25, %v1071_v28 }
 0xf0b   :  { %1082 = vrot.lane.b32.xlu1 %v1077_v29, %s7544_s23  ;;  %1080 = vrot.lane.b32.xlu0 %v1076_v30, %s7544_s23 }
 0xf7d   :  { %v1083_v31 = vpop.permute.xlu1 %1082  ;;  %v1081_v32 = vpop.permute.xlu0 %1080 }
 0xf7e   :  { %v1087_v35 = vadd.f32 %v1083_v31, %v7728_v21  ;;  %v1086_v36 = vadd.f32 %v1081_v32, %v7726_v20 }
 0xf80   :  { %7405 = vtanh.f32 %v1087_v35 }
 0xf81   :  { %7407 = vtanh.f32 %v1086_v36 }
 0xf8a   :  { %v7406_v37 = vpop.eup %7405 }
 0xf8b   :  { %v7408_v38 = vpop.eup %7407  ;;  %1096 = vrot.lane.b32.xlu1 %v7406_v37, %s7545_s24 }
 0xf8c   :  { %1094 = vrot.lane.b32.xlu0 %v7408_v38, %s7545_s24 }
 0xffd   :  { %v1097_v41 = vpop.permute.xlu1 %1096 }
 0xffe   :  { %v1101_v45 = vmul.f32 %v1097_v41, %v1091_v39  ;;  %v1095_v46 = vpop.permute.xlu0 %1094 }
 0xfff   :  { %v1100_v48 = vmul.f32 %v1095_v46, %v1090_v42 }
0x1000   :  { %v7876_v49 = vadd.f32 %v1107_v44, %v1101_v45 }
0x1001   :  { %v7878_v50 = vadd.f32 %v1106_v47, %v1100_v48 }
0x1002   :  { %v1122_v53 = vrot.slane %v7876_v49, 4  ;;  %v1254_v32 = vrot.slane %v7876_v49, 7 }
0x1003   :  { %v1121_v54 = vrot.slane %v7878_v50, 5  ;;  %v1253_v37 = vrot.slane %v7878_v50, 7 }
0x1005   :  { %v1123_v55 = vsel %vm371_vm2, %v1122_v53, %v1121_v54 }
0x1006   :  { %1124 = vrot.lane.b32.xlu0 %v1123_v55, %s7545_s24 }
0x1078   :  { %v1125_v56 = vpop.permute.xlu0 %1124 }
0x1079   :  { %6755 = vmatmul.mubr.msk.f32.vlgmr.msra.gmra.mrb[6].mxu1 %vm220_vm3, %v1125_v56 }
0x114c   :  { %v1194_v57 = vpop.f32.mrb[6].mxu1 }
0x114d   :  { %v1217_v58 = vadd.f32 %v1194_v57, %v7718_v14  ;;  %v6756_v61 = vpop.f32.mrb[7].mxu1  ;;  %v1199_v0 = vrot.slane %v1194_v57, 2  ;;  %v1200_v1 = vrot.slane %v1194_v57, 3 }
0x114f   :  { %v1220_v62 = vrot.slane %v1217_v58, 3  ;;  %v1219_v63 = vrot.slane %v1217_v58, 2  ;;  %v1203_v2 = vadd.f32 %v1199_v0, %v7726_v20  ;;  %v1204_v7 = vadd.f32 %v1200_v1, %v7728_v21 }
0x1151   :  { %1223 = vrot.lane.b32.xlu0 %v1220_v62, %s7544_s23  ;;  %1221 = vrot.lane.b32.xlu1 %v1219_v63, %s7544_s23  ;;  %v6274_v8 = vmul.f32 -1.442695, %v1203_v2  ;;  %v6275_v9 = vmul.f32 -1.442695, %v1204_v7 }
0x1153   :  { %7409 = vpow2.f32 %v6274_v8 }
0x1154   :  { %7411 = vpow2.f32 %v6275_v9 }
0x115d   :  { %v7410_v4 = vpop.eup %7409 }
0x115e   :  { %v7412_v12 = vpop.eup %7411  ;;  %v1211_v13 = vadd.f32 1.0, %v7410_v4 }
0x115f   :  { %v1212_v15 = vadd.f32 1.0, %v7412_v12 }
0x1160   :  { %7413 = vrcp.f32 %v1211_v13 }
0x1161   :  { %7415 = vrcp.f32 %v1212_v15 }
0x116a   :  { %v7414_v16 = vpop.eup %7413 }
0x116b   :  { %v7416_v10 = vpop.eup %7415  ;;  %v1241_v36 = vsub.f32 1.0, %v7414_v16  ;;  %v1257_v41 = vmul.f32 %v7414_v16, %v1253_v37 }
0x116c   :  { %v1242_v31 = vsub.f32 1.0, %v7416_v10  ;;  %v1258_v38 = vmul.f32 %v7416_v10, %v1254_v32 }
0x11c3   :  { %v1224_v17 = vpop.permute.xlu0 %1223  ;;  %v1222_v22 = vpop.permute.xlu1 %1221 }
0x11c4   :  { %v1228_v23 = vmul.f32 %v7416_v10, %v1224_v17  ;;  %v1227_v24 = vmul.f32 %v7414_v16, %v1222_v22 }
0x11c6   :  { %1233 = vrot.lane.b32.xlu0 %v1228_v23, %s7544_s23  ;;  %1231 = vrot.lane.b32.xlu1 %v1227_v24, %s7544_s23 }
0x1238   :  { %v1234_v25 = vpop.permute.xlu0 %1233  ;;  %v1232_v26 = vpop.permute.xlu1 %1231 }
0x1239   :  { %v1238_v27 = vadd.f32 %v1234_v25, %v7728_v21  ;;  %v1237_v28 = vadd.f32 %v1232_v26, %v7726_v20 }
0x123b   :  { %7417 = vtanh.f32 %v1238_v27 }
0x123c   :  { %7419 = vtanh.f32 %v1237_v28 }
0x1245   :  { %v7418_v29 = vpop.eup %7417 }
0x1246   :  { %v7420_v30 = vpop.eup %7419  ;;  %1247 = vrot.lane.b32.xlu0 %v7418_v29, %s7545_s24 }
0x1247   :  { %1245 = vrot.lane.b32.xlu1 %v7420_v30, %s7545_s24 }
0x12b8   :  { %v1248_v35 = vpop.permute.xlu0 %1247 }
0x12b9   :  { %v1252_v39 = vmul.f32 %v1248_v35, %v1242_v31  ;;  %v1246_v40 = vpop.permute.xlu1 %1245 }
0x12ba   :  { %v1251_v42 = vmul.f32 %v1246_v40, %v1241_v36 }
0x12bb   :  { %v7898_v43 = vadd.f32 %v1258_v38, %v1252_v39 }
0x12bc   :  { %v7900_v44 = vadd.f32 %v1257_v41, %v1251_v42 }
0x12bd   :  { %v1273_v45 = vrot.slane %v7898_v43, 5 }
0x12be   :  { %v1272_v46 = vrot.slane %v7900_v44, 6 }
0x12c0   :  { %v1274_v47 = vsel %vm371_vm2, %v1273_v45, %v1272_v46 }
0x12c1   :  { %1275 = vrot.lane.b32.xlu1 %v1274_v47, %s7545_s24 }
0x1333   :  { %v1276_v48 = vpop.permute.xlu1 %1275 }
0x1334   :  { %6766 = vmatmul.mubr.msk.f32.vlgmr.msra.gmra.mrb[8].mxu0 %vm220_vm3, %v1276_v48 }
0x1335   :  { %6781 = vmatprep.mubr.msk.f32.mxu0 %vm7542_vm1, %v7543_v11 }
0x1407   :  { %v1345_v53 = vpop.f32.mrb[8].mxu0 }
0x1408   :  { %v1368_v54 = vadd.f32 %v1345_v53, %v7718_v14  ;;  %v6767_v55 = vpop.f32.mrb[9].mxu0  ;;  %v1350_v58 = vrot.slane %v1345_v53, 1  ;;  %v1351_v61 = vrot.slane %v1345_v53, 2 }
0x1409   :  { %v7546_v55 = vmov 0  }
0x140a   :  { %v1371_v56 = vrot.slane %v1368_v54, 2  ;;  %v1370_v57 = vrot.slane %v1368_v54, 1  ;;  %v1354_v62 = vadd.f32 %v1350_v58, %v7726_v20  ;;  %v1355_v63 = vadd.f32 %v1351_v61, %v7728_v21  ;;  %v6279_v54 = vld [vmem:[%s8624_s7] ss:$0 sm:$0xff]  ;;  %7336 = vset.pattern.permute.xlu0 %v7546_v55 }
0x140c   :  { %1374 = vrot.lane.b32.xlu1 %v1371_v56, %s7544_s23  ;;  %1372 = vrot.lane.b32.xlu0 %v1370_v57, %s7544_s23  ;;  %v6277_v0 = vmul.f32 -1.442695, %v1354_v62  ;;  %v6278_v1 = vmul.f32 -1.442695, %v1355_v63 }
0x140e   :  { %7421 = vpow2.f32 %v6277_v0 }
0x140f   :  { %7423 = vpow2.f32 %v6278_v1  ;;  %v73_v1 = vlaneseq }
0x1418   :  { %v7422_v2 = vpop.eup %7421 }
0x1419   :  { %v7424_v7 = vpop.eup %7423  ;;  %v1362_v14 = vadd.f32 1.0, %v7422_v2  ;;  %v74_v2 = vand.u32 127, %v73_v1 }
0x141a   :  { %v1363_v8 = vadd.f32 1.0, %v7424_v7 }
0x141b   :  { %7425 = vrcp.f32 %v1362_v14  ;;  %v75_v7 = vcvt.s32.f32 %v74_v2 }
0x141c   :  { %7427 = vrcp.f32 %v1363_v8  ;;  %v7548_v8 = vmov 1966171168  }
0x1425   :  { %v7426_v9 = vpop.eup %7425 }
0x1426   :  { %v7428_v4 = vpop.eup %7427 }
0x147e   :  { %v1375_v12 = vpop.permute.xlu1 %1374  ;;  %v1373_v13 = vpop.permute.xlu0 %1372 }
0x147f   :  { %v1379_v15 = vmul.f32 %v7428_v4, %v1375_v12  ;;  %v1378_v16 = vmul.f32 %v7426_v9, %v1373_v13 }
0x1481   :  { %1384 = vrot.lane.b32.xlu1 %v1379_v15, %s7544_s23  ;;  %1382 = vrot.lane.b32.xlu0 %v1378_v16, %s7544_s23  ;;  %v8018_v15 = vshrl.u32 %v73_v1, 7  ;;  %s7550_s23 = smov [#allocation3]  }
0x1482   :  { %s6243_s1 = sshll.u32 %s7550_s23, 4  ;;  %s6244_s1 = int_to_ptr.vmem [resolvable:$true] %s6243_s1 }
0x1483   :  { %p7522_p1 = scmp.lt.s32.totalorder %s6244_s1, %s6244_s1 }
0x14f3   :  { %v1385_v10 = vpop.permute.xlu1 %1384  ;;  %v1383_v17 = vpop.permute.xlu0 %1382 }
0x14f4   :  { %v1389_v22 = vadd.f32 %v1385_v10, %v7728_v21  ;;  %v1388_v23 = vadd.f32 %v1383_v17, %v7726_v20  ;;  %v1426_v20 = vld [vmem:[%s8655_s26] sm:$0xff]  ;;  %v1427_v21 = vld [vmem:[%s8655_s26 + $0x8] sm:$0xff] }
0x14f6   :  { %7429 = vtanh.f32 %v1389_v22 }
0x14f7   :  { %7431 = vtanh.f32 %v1388_v23 }
0x1500   :  { %v7430_v24 = vpop.eup %7429 }
0x1501   :  { %v7432_v25 = vpop.eup %7431  ;;  %1398 = vrot.lane.b32.xlu1 %v7430_v24, %s7545_s24  ;;  %v8022_v24 = vsub.s32 0, %v8018_v15 }
0x1502   :  { %1396 = vrot.lane.b32.xlu0 %v7432_v25, %s7545_s24 }
0x1505   :  { %509 = vrot.lane.b32.xlu1 %v7765_v33, %s7545_s24  ;;  %v1429_v33 = vld [vmem:[%s8655_s26 + $0x18] sm:$0xff] }
0x1506   :  { %361 = vrot.lane.b32.xlu0 %v7740_v52, %s7545_s24  ;;  %v1428_v52 = vld [vmem:[%s8655_s26 + $0x10] sm:$0xff] }
0x1509   :  { %810 = vrot.lane.b32.xlu1 %v7823_v6, %s7545_s24 }
0x150a   :  { %659 = vrot.lane.b32.xlu0 %v7795_v19, %s7545_s24  ;;  %v1392_v19 = vsub.f32 1.0, %v7426_v9 }
0x150d   :  { %1112 = vrot.lane.b32.xlu1 %v7878_v50, %s7545_s24  ;;  %v1405_v50 = vrot.slane %v7898_v43, 7 }
0x150e   :  { %961 = vrot.lane.b32.xlu0 %v7850_v60, %s7545_s24 }
0x150f   :  { %v1409_v30 = vmul.f32 %v7428_v4, %v1405_v50 }
0x1511   :  { %511 = vrot.lane.b32.xlu1 %v7767_v34, %s7545_s24  ;;  %v7190_v34 = vpack.c.bf16 %v1429_v33, %v1428_v52 }
0x1512   :  { %1263 = vrot.lane.b32.xlu0 %v7900_v44, %s7545_s24 }
0x1515   :  { %812 = vrot.lane.b32.xlu1 %v7821_v5, %s7545_s24  ;;  %v1404_v5 = vrot.slane %v7900_v44, 7 }
0x1516   :  { %363 = vrot.lane.b32.xlu0 %v7738_v51, %s7545_s24  ;;  %v7186_v51 = vpack.c.bf16 %v1427_v21, %v1426_v20 }
0x1517   :  { %v1408_v60 = vmul.f32 %v7426_v9, %v1404_v5  ;;  %v88_v9 = vunpack.c.l.s4 %v7548_v8 }
0x1518   :  { %7187 = vmatprep.subr.bf16.mxu1 %v7186_v51 }
0x1519   :  { %1114 = vrot.lane.b32.xlu1 %v7876_v49, %s7545_s24  ;;  %7189 = vmatpush3.bf16.msra.mxu1 %v7186_v51  ;;  %v89_v12 = vunpack.c.0.s8 %v88_v9 }
0x151a   :  { %661 = vrot.lane.b32.xlu0 %v7793_v18, %s7545_s24  ;;  %7191 = vmatprep.subr.bf16.mxu1 %v7190_v34 }
0x151b   :  { %v92_v16 = vsub.s32 %v89_v12, %v8018_v15 }
0x151d   :  { %7193 = vmatpush3.bf16.msra.mxu1 %v7190_v34 }
0x151e   :  { %963 = vrot.lane.b32.xlu0 %v7848_v59, %s7545_s24  ;;  %v1393_v59 = vsub.f32 1.0, %v7428_v4  ;;  %6789 = vmatprep.subr.mxu1 %v7543_v11 }
0x1522   :  { %1265 = vrot.lane.b32.xlu0 %v7898_v43, %s7545_s24 }
0x1573   :  { %v1399_v18 = vpop.permute.xlu1 %1398 }
0x1574   :  { %v1397_v6 = vpop.permute.xlu0 %1396  ;;  %v1403_v26 = vmul.f32 %v1399_v18, %v1393_v59 }
0x1575   :  { %v1402_v49 = vmul.f32 %v1397_v6, %v1392_v19 }
0x1576   :  { %v1411_v31 = vadd.f32 %v1409_v30, %v1403_v26 }
0x1577   :  { %v1410_v27 = vadd.f32 %v1408_v60, %v1402_v49  ;;  %v510_v28 = vpop.permute.xlu1 %509 }
0x1578   :  { %516 = vst.msk [vmem:[#allocation2] sm:$0x2] %vm515_vm4, %v510_v28  ;;  %v362_v29 = vpop.permute.xlu0 %361 }
0x1579   :  { %1414 = vrot.lane.b32.xlu1 %v1410_v27, %s7545_s24  ;;  %368 = vst.msk [vmem:[#allocation2] sm:$0x1] %vm367_vm5, %v362_v29 }
0x157b   :  { %v811_v32 = vpop.permute.xlu1 %810 }
0x157c   :  { %817 = vst.msk [vmem:[#allocation2] sm:$0x8] %vm816_vm6, %v811_v32  ;;  %v660_v35 = vpop.permute.xlu0 %659 }
0x157d   :  { %666 = vst.msk [vmem:[#allocation2] sm:$0x4] %vm665_vm7, %v660_v35  ;;  %1416 = vrot.lane.b32.xlu1 %v1411_v31, %s7545_s24  ;;  %s8656_s24 = sld [smem:[#allocation7_spill]]  ;;  %v6291_v35 = vld [vmem:[%s8655_s26 + $0x20] sm:$0xff] }
0x157f   :  { %v1113_v36 = vpop.permute.xlu1 %1112 }
0x1580   :  { %1119 = vst.msk [vmem:[#allocation2] sm:$0x20] %vm1118_vm8, %v1113_v36  ;;  %v962_v37 = vpop.permute.xlu0 %961  ;;  %v6292_v36 = vld [vmem:[%s8655_s26 + $0x28] sm:$0xff] }
0x1581   :  { %968 = vst.msk [vmem:[#allocation2] sm:$0x10] %vm967_vm9, %v962_v37  ;;  %v7194_v37 = vpack.c.bf16 %v6292_v36, %v6291_v35 }
0x1583   :  { %v512_v38 = vpop.permute.xlu1 %511  ;;  %v72_v62 = vld [vmem:[%s8656_s24] sm:$0x3] }
0x1584   :  { %517 = vst.msk [vmem:[#allocation2 + $0x8] sm:$0x2] %vm515_vm4, %v512_v38  ;;  %v1264_v39 = vpop.permute.xlu0 %1263 }
0x1585   :  { %1270 = vst.msk [vmem:[#allocation2] sm:$0x40] %vm1269_vm10, %v1264_v39 }
0x1587   :  { %v813_v40 = vpop.permute.xlu1 %812 }
0x1588   :  { %818 = vst.msk [vmem:[#allocation2 + $0x8] sm:$0x8] %vm816_vm6, %v813_v40  ;;  %v364_v41 = vpop.permute.xlu0 %363 }
0x1589   :  { %369 = vst.msk [vmem:[#allocation2 + $0x8] sm:$0x1] %vm367_vm5, %v364_v41  ;;  %v6293_v41 = vld [vmem:[%s8655_s26 + $0x30] sm:$0xff] }
0x158b   :  { %v1115_v42 = vpop.permute.xlu1 %1114 }
0x158c   :  { %1120 = vst.msk [vmem:[#allocation2 + $0x8] sm:$0x20] %vm1118_vm8, %v1115_v42  ;;  %v662_v43 = vpop.permute.xlu0 %661  ;;  %v6294_v42 = vld [vmem:[%s8655_s26 + $0x38] sm:$0xff] }
0x158d   :  { %667 = vst.msk [vmem:[#allocation2 + $0x8] sm:$0x4] %vm665_vm7, %v662_v43 }
0x1590   :  { %v964_v44 = vpop.permute.xlu0 %963 }
0x1591   :  { %969 = vst.msk [vmem:[#allocation2 + $0x8] sm:$0x10] %vm967_vm9, %v964_v44 }
0x1594   :  { %v1266_v45 = vpop.permute.xlu0 %1265 }
0x1595   :  { %1271 = vst.msk [vmem:[#allocation2 + $0x8] sm:$0x40] %vm1269_vm10, %v1266_v45  ;;  %v7198_v45 = vpack.c.bf16 %v6294_v42, %v6293_v41  ;;  %v6313_v41 = vld [vmem:[%s8624_s7 + $0x2] ss:$0 sm:$0xff] }
0x15eb   :  { %v1415_v46 = vpop.permute.xlu1 %1414 }
0x15ec   :  { %1421 = vst.msk [vmem:[#allocation2] sm:$0x80] %vm1420_vm11, %v1415_v46 }
0x15ef   :  { %v1417_v47 = vpop.permute.xlu1 %1416 }
0x15f0   :  { %1422 = vst.msk [vmem:[#allocation2 + $0x8] sm:$0x80] %vm1420_vm11, %v1417_v47 }
0x15f3   :  { %v7979_v48 = vld [vmem:[#allocation2] sm:$0xff] }
0x15f4   :  { %6776 = vmatprep.mubr.msk.f32.mxu1 %vm220_vm3, %v7979_v48 }
0x15f7   :  { %v7983_v53 = vld [vmem:[#allocation2 + $0x8] sm:$0xff] }
0x15f8   :  { %6777 = vmatmul.mubr.msk.f32.vlgmr.msra.gmra.mrb[8].mxu1 %vm220_vm3, %v7983_v53 }
0x15f9   :  { %6791 = vmatprep.mubr.msk.f32.mxu1 %vm7542_vm1, %v7543_v11 }
0x16cb   :  { %v6778_v56 = vpop.f32.mrb[8].mxu1 }
0x16cc   :  { %v1515_v57 = vadd.f32 %v6778_v56, %v6279_v54  ;;  %v1509_v58 = vpop.f32.mrb[9].mxu1 }
0x16cd   :  { %v7992_v61 = vadd.f32 %v6279_v54, %v1509_v58  ;;  %v1856_v54 = vld [vmem:[%s8625_s8] sm:$0xff] }
0x16ce   :  { %1606 = vrot.lane.b32.xlu1 %v1515_v57, %s7547_s29 }
0x16cf   :  { %1529 = vrot.lane.b32.xlu0 %v7992_v61, %s7547_s29 }
0x16d3   :  { %78 = vperm.xlu0 %7336, %v72_v62  }
0x1740   :  { %v1607_v0 = vpop.permute.xlu1 %1606 }
0x1741   :  { %v1530_v63 = vpop.permute.xlu0 %1529 }
0x1742   :  { %6780 = vmatpush3.xpose.msk.msra.mxu0 %vm133_vm0, %v1530_v63 }
0x1743   :  { %6784 = vmatprep.subr.mxu0 %v7543_v11 }
0x1745   :  { %6782 = vmatmul.mubr.msk.f32.vlgmr.msra.gmra.mrb[10].mxu0 %vm133_vm0, %v7992_v61 }
0x1746   :  { %6785 = vmatpush3.xpose.msk.msra.mxu0 %vm133_vm0, %v1607_v0  ;;  %6786 = vmatprep.mubr.msk.f32.mxu0 %vm7542_vm1, %v7543_v11 }
0x1747   :  { %6794 = vmatprep.subr.mxu0 %v7543_v11 }
0x1749   :  { %6787 = vmatmul.mubr.msk.f32.vlgmr.msra.gmra.mrb[12].mxu0 %vm133_vm0, %v1515_v57 }
0x174a   :  { %6796 = vmatprep.mubr.msk.f32.mxu0 %vm7542_vm1, %v7543_v11 }
0x1752   :  { %v8011_v14 = vpop.permute.xlu0 %78 }
0x1753   :  { %vm81_vm12 = vcmp.lt.f32.partialorder %v75_v7, %v8011_v14 }
0x1754   :  { %v8015_v4 = vsel %vm81_vm12, 1.0, %v7543_v11 }
0x1755   :  { %v84_v13 = vsub.f32 1.0, %v8015_v4 }
0x1757   :  { %v85_v10 = vmul.f32 -1e+30, %v84_v13 }
0x1759   :  { %v93_v17 = vrot.slane %v85_v10, %v92_v16 }
0x175b   :  { %v94_v22 = vcombine.high %v93_v17, %v93_v17  ;;  %v101_v23 = vrot.slane %v93_v17, %v92_v16 }
0x175d   :  { %v108_v25 = vrot.slane %v94_v22, %v92_v16  ;;  %v8025_v20 = vrot.slane %v101_v23, %v8022_v24 }
0x175f   :  { %v8028_v51 = vrot.slane %v108_v25, %v8022_v24 }
0x1818   :  { %v1601_v21 = vpop.f32.mrb[10].mxu0 }
0x1819   :  { %v1602_v52 = vadd.f32 %v1601_v21, %v8025_v20  ;;  %v6783_v33 = vpop.f32.mrb[11].mxu0 }
0x181b   :  { %v1682_v34 = vsel %vm133_vm0, %v1602_v52, -inf }
0x181c   :  { %v1678_v18 = vpop.f32.mrb[12].mxu0  ;;  %1683 = vmax.xlane.f32.xlu0 %v1682_v34 }
0x181d   :  { %v1679_v19 = vadd.f32 %v1678_v18, %v8028_v51  ;;  %v6788_v5 = vpop.f32.mrb[13].mxu0  ;;  %v6308_v18 = vld [vmem:[%s8655_s26 + $0x40] sm:$0xff] }
0x181f   :  { %v1685_v6 = vsel %vm133_vm0, %v1679_v19, -inf }
0x1820   :  { %1686 = vmax.xlane.f32.xlu1 %v1685_v6 }
0x1832   :  { %1780 = vrot.lane.b32.xlu0 %v1515_v57, %s7549_s6 }
0x18a9   :  { %v1684_v59 = vpop.xlane.xlu0 %1683 }
0x18aa   :  { %v1688_v60 = vsub.f32 %v1602_v52, %v1684_v59 }
0x18ac   :  { %v1690_v27 = vmul.f32 1.442695, %v1688_v60 }
0x18ad   :  { %v1781_v49 = vpop.permute.xlu0 %1780  ;;  %v1687_v50 = vpop.xlane.xlu1 %1686 }
0x18ae   :  { %v1689_v26 = vsub.f32 %v1679_v19, %v1687_v50  ;;  %6795 = vmatpush3.msra.mxu0 %v1781_v49  ;;  %v6309_v19 = vld [vmem:[%s8655_s26 + $0x48] sm:$0xff]  ;;  %v6310_v50 = vld [vmem:[%s8655_s26 + $0x50] sm:$0xff] }
0x18af   :  { %7195 = vmatprep.subr.bf16.mxu0 %v7194_v37  ;;  %v7202_v5 = vpack.c.bf16 %v6309_v19, %v6308_v18  ;;  %v6328_v18 = vld [vmem:[%s8655_s26 + $0x78] sm:$0xff] }
0x18b0   :  { %v1692_v28 = vmul.f32 1.442695, %v1689_v26  ;;  %v6311_v26 = vld [vmem:[%s8655_s26 + $0x58] sm:$0xff] }
0x18b2   :  { %7433 = vpow2.f32 %v1692_v28 }
0x18b3   :  { %7435 = vpow2.f32 %v1690_v27 }
0x18bc   :  { %v7434_v29 = vpop.eup %7433 }
0x18bd   :  { %v1697_v30 = vsel %vm133_vm0, %v7434_v29, 0.0  ;;  %v7436_v31 = vpop.eup %7435 }
0x18be   :  { %1698 = vadd.xlane.f32.xlu1 %v1697_v30  ;;  %v1694_v32 = vsel %vm133_vm0, %v7436_v31, 0.0 }
0x18c2   :  { %1695 = vadd.xlane.f32.xlu1 %v1694_v32 }
0x18d3   :  { %1704 = vrot.lane.b32.xlu1 %v7992_v61, %s7549_s6  ;;  %v6296_v61 = vld [vmem:[%s8624_s7 + $0x1] ss:$0 sm:$0xff] }
0x194b   :  { %v1699_v38 = vpop.xlane.xlu1 %1698 }
0x194c   :  { %7437 = vrcp.f32 %v1699_v38 }
0x194f   :  { %v1696_v39 = vpop.xlane.xlu1 %1695 }
0x1950   :  { %7439 = vrcp.f32 %v1696_v39 }
0x1953   :  { %v1705_v40 = vpop.permute.xlu1 %1704 }
0x1954   :  { %6790 = vmatpush3.msra.mxu1 %v1705_v40  ;;  %v6305_v40 = vld [vmem:[%s8625_s8 + $0x8] sm:$0xff] }
0x1955   :  { %6799 = vmatprep.subr.mxu1 %v1856_v54 }
0x1956   :  { %v7438_v43 = vpop.eup %7437 }
0x1957   :  { %v1703_v44 = vmul.f32 %v7438_v43, %v7434_v29  ;;  %v7206_v29 = vpack.c.bf16 %v6311_v26, %v6310_v50  ;;  %v6322_v26 = vld [vmem:[%s8625_s8 + $0x10] sm:$0xff] }
0x1959   :  { %6797 = vmatmul.mubr.msk.f32.vlgmr.msra.gmra.mrb[14].mxu0 %vm133_vm0, %v1703_v44 }
0x195a   :  { %v7440_v46 = vpop.eup %7439  ;;  %7197 = vmatpush3.bf16.msra.mxu0 %v7194_v37  ;;  %6812 = vmatprep.mubr.msk.f32.mxu0 %vm220_vm3, %v7979_v48 }
0x195b   :  { %v1702_v47 = vmul.f32 %v7440_v46, %v7436_v31  ;;  %7199 = vmatprep.subr.bf16.mxu0 %v7198_v45 }
0x195d   :  { %6792 = vmatmul.mubr.msk.f32.vlgmr.msra.gmra.mrb[10].mxu1 %vm133_vm0, %v1702_v47 }
0x195e   :  { %7201 = vmatpush3.bf16.msra.mxu0 %v7198_v45  ;;  %6800 = vmatpush3.msra.mxu1 %v1856_v54 }
0x195f   :  { %6825 = vmatprep.subr.mxu0 %v7543_v11  ;;  %6815 = vmatprep.subr.mxu1 %v7543_v11 }
0x1961   :  { %6813 = vmatmul.mubr.msk.f32.vlgmr.msra.gmra.mrb[16].mxu0 %vm220_vm3, %v7983_v53 }
0x1962   :  { %6827 = vmatprep.mubr.msk.f32.mxu0 %vm7542_vm1, %v7543_v11 }
0x1a2c   :  { %v1852_v55 = vpop.f32.mrb[14].mxu0 }
0x1a2d   :  { %v6798_v56 = vpop.f32.mrb[15].mxu0 }
0x1a30   :  { %v1776_v57 = vpop.f32.mrb[10].mxu1 }
0x1a31   :  { %v6793_v58 = vpop.f32.mrb[11].mxu1  ;;  %6801 = vmatprep.mubr.msk.f32.mxu1 %vm133_vm0, %v1776_v57 }
0x1a32   :  { %6802 = vmatmul.mubr.msk.f32.vlgmr.msra.gmra.mrb[12].mxu1 %vm133_vm0, %v1852_v55 }
0x1a33   :  { %6817 = vmatprep.mubr.msk.f32.mxu1 %vm7542_vm1, %v7543_v11 }
0x1a34   :  { %v6814_v62 = vpop.f32.mrb[16].mxu0 }
0x1a35   :  { %v2031_v63 = vadd.f32 %v6814_v62, %v6296_v61  ;;  %v2025_v0 = vpop.f32.mrb[17].mxu0 }
0x1a36   :  { %v2026_v1 = vadd.f32 %v6296_v61, %v2025_v0 }
0x1a37   :  { %2112 = vrot.lane.b32.xlu1 %v2031_v63, %s7547_s29 }
0x1a38   :  { %2035 = vrot.lane.b32.xlu0 %v2026_v1, %s7547_s29 }
0x1aa9   :  { %v2113_v7 = vpop.permute.xlu1 %2112 }
0x1aaa   :  { %v2036_v2 = vpop.permute.xlu0 %2035 }
0x1aab   :  { %6816 = vmatpush3.xpose.msk.msra.mxu1 %vm133_vm0, %v2036_v2 }
0x1aac   :  { %6820 = vmatprep.subr.mxu1 %v7543_v11 }
0x1aae   :  { %6818 = vmatmul.mubr.msk.f32.vlgmr.msra.gmra.mrb[14].mxu1 %vm133_vm0, %v2026_v1 }
0x1aaf   :  { %6821 = vmatpush3.xpose.msk.msra.mxu1 %vm133_vm0, %v2113_v7  ;;  %6822 = vmatprep.mubr.msk.f32.mxu1 %vm7542_vm1, %v7543_v11 }
0x1ab0   :  { %6830 = vmatprep.subr.mxu1 %v7543_v11 }
0x1ab2   :  { %6823 = vmatmul.mubr.msk.f32.vlgmr.msra.gmra.mrb[16].mxu1 %vm133_vm0, %v2031_v63 }
0x1ab3   :  { %6832 = vmatprep.mubr.msk.f32.mxu1 %vm7542_vm1, %v7543_v11 }
0x1b81   :  { %v2107_v8 = vpop.f32.mrb[14].mxu1 }
0x1b82   :  { %v2108_v9 = vadd.f32 %v2107_v8, %v8025_v20  ;;  %v6819_v12 = vpop.f32.mrb[15].mxu1 }
0x1b84   :  { %v2188_v13 = vsel %vm133_vm0, %v2108_v9, -inf }
0x1b85   :  { %2189 = vmax.xlane.f32.xlu0 %v2188_v13  ;;  %v2184_v16 = vpop.f32.mrb[16].mxu1 }
0x1b86   :  { %v6824_v10 = vpop.f32.mrb[17].mxu1  ;;  %v2185_v52 = vadd.f32 %v2184_v16, %v8028_v51 }
0x1b88   :  { %v2191_v34 = vsel %vm133_vm0, %v2185_v52, -inf }
0x1b9b   :  { %2210 = vrot.lane.b32.xlu0 %v2026_v1, %s7549_s6 }
0x1c12   :  { %v2190_v17 = vpop.xlane.xlu0 %2189 }
0x1c13   :  { %v2194_v22 = vsub.f32 %v2108_v9, %v2190_v17 }
0x1c15   :  { %v2196_v23 = vmul.f32 1.442695, %v2194_v22 }
0x1c16   :  { %v2211_v25 = vpop.permute.xlu0 %2210 }
0x1c17   :  { %7441 = vpow2.f32 %v2196_v23  ;;  %6826 = vmatpush3.msra.mxu0 %v2211_v25  ;;  %v6325_v23 = vld [vmem:[%s8655_s26 + $0x60] sm:$0xff]  ;;  %v6326_v25 = vld [vmem:[%s8655_s26 + $0x68] sm:$0xff] }
0x1c18   :  { %7203 = vmatprep.subr.bf16.mxu0 %v7202_v5 }
0x1c21   :  { %v7442_v21 = vpop.eup %7441 }
0x1c22   :  { %v2200_v33 = vsel %vm133_vm0, %v7442_v21, 0.0 }
0x1c23   :  { %2201 = vadd.xlane.f32.xlu1 %v2200_v33 }
0x1c27   :  { %2192 = vmax.xlane.f32.xlu1 %v2191_v34  ;;  %v6327_v34 = vld [vmem:[%s8655_s26 + $0x70] sm:$0xff] }
0x1cb0   :  { %v2202_v6 = vpop.xlane.xlu1 %2201 }
0x1cb1   :  { %7443 = vrcp.f32 %v2202_v6  ;;  %v7214_v6 = vpack.c.bf16 %v6328_v18, %v6327_v34 }
0x1cb4   :  { %v2193_v59 = vpop.xlane.xlu1 %2192 }
0x1cb5   :  { %v2195_v60 = vsub.f32 %v2185_v52, %v2193_v59  ;;  %v7210_v52 = vpack.c.bf16 %v6326_v25, %v6325_v23 }
0x1cb7   :  { %v2198_v49 = vmul.f32 1.442695, %v2195_v60 }
0x1cb9   :  { %7445 = vpow2.f32 %v2198_v49 }
0x1cbb   :  { %v7444_v27 = vpop.eup %7443 }
0x1cbc   :  { %v2208_v28 = vmul.f32 %v7444_v27, %v7442_v21 }
0x1cbe   :  { %6828 = vmatmul.mubr.msk.f32.vlgmr.msra.gmra.mrb[18].mxu0 %vm133_vm0, %v2208_v28 }
0x1cbf   :  { %7205 = vmatpush3.bf16.msra.mxu0 %v7202_v5  ;;  %6848 = vmatprep.mubr.msk.f32.mxu0 %vm220_vm3, %v7979_v48 }
0x1cc0   :  { %7207 = vmatprep.subr.bf16.mxu0 %v7206_v29 }
0x1cc3   :  { %v7446_v30 = vpop.eup %7445  ;;  %7209 = vmatpush3.bf16.msra.mxu0 %v7206_v29  ;;  %v6330_v29 = vld [vmem:[%s8624_s7 + $0x3] ss:$0 sm:$0xff] }
0x1cc4   :  { %v2203_v31 = vsel %vm133_vm0, %v7446_v30, 0.0  ;;  %6856 = vmatprep.subr.mxu0 %v7543_v11 }
0x1cc5   :  { %2204 = vadd.xlane.f32.xlu1 %v2203_v31 }
0x1cc6   :  { %6849 = vmatmul.mubr.msk.f32.vlgmr.msra.gmra.mrb[20].mxu0 %vm220_vm3, %v7983_v53 }
0x1cc7   :  { %6858 = vmatprep.mubr.msk.f32.mxu0 %vm7542_vm1, %v7543_v11 }
0x1cd6   :  { %2286 = vrot.lane.b32.xlu1 %v2031_v63, %s7549_s6 }
0x1d52   :  { %v2205_v32 = vpop.xlane.xlu1 %2204 }
0x1d53   :  { %7447 = vrcp.f32 %v2205_v32 }
0x1d56   :  { %v2287_v35 = vpop.permute.xlu1 %2286 }
0x1d57   :  { %6831 = vmatpush3.msra.mxu1 %v2287_v35 }
0x1d58   :  { %6835 = vmatprep.subr.mxu1 %v6305_v40 }
0x1d5d   :  { %v7448_v36 = vpop.eup %7447 }
0x1d5e   :  { %v2209_v37 = vmul.f32 %v7448_v36, %v7446_v30 }
0x1d60   :  { %6833 = vmatmul.mubr.msk.f32.vlgmr.msra.gmra.mrb[18].mxu1 %vm133_vm0, %v2209_v37 }
0x1d61   :  { %6836 = vmatpush3.msra.mxu1 %v6305_v40 }
0x1d62   :  { %6851 = vmatprep.subr.mxu1 %v7543_v11 }
0x1d91   :  { %v2282_v38 = vpop.f32.mrb[18].mxu0 }
0x1d92   :  { %v6829_v39 = vpop.f32.mrb[19].mxu0  ;;  %6837 = vmatprep.mubr.msk.f32.mxu1 %vm133_vm0, %v2282_v38 }
0x1d99   :  { %v6850_v42 = vpop.f32.mrb[20].mxu0 }
0x1d9a   :  { %v2532_v43 = vadd.f32 %v6850_v42, %v6313_v41  ;;  %v2526_v44 = vpop.f32.mrb[21].mxu0 }
0x1d9b   :  { %v2527_v45 = vadd.f32 %v6313_v41, %v2526_v44 }
0x1d9c   :  { %2613 = vrot.lane.b32.xlu0 %v2532_v43, %s7547_s29 }
0x1da0   :  { %2536 = vrot.lane.b32.xlu0 %v2527_v45, %s7547_s29 }
0x1e0e   :  { %v2614_v46 = vpop.permute.xlu0 %2613 }
0x1e0f   :  { %6857 = vmatpush3.xpose.msk.msra.mxu0 %vm133_vm0, %v2614_v46 }
0x1e10   :  { %6866 = vmatprep.subr.mxu0 %v7543_v11 }
0x1e12   :  { %6859 = vmatmul.mubr.msk.f32.vlgmr.msra.gmra.mrb[22].mxu0 %vm133_vm0, %v2532_v43  ;;  %v2537_v54 = vpop.permute.xlu0 %2536 }
0x1e13   :  { %6868 = vmatprep.mubr.msk.f32.mxu0 %vm7542_vm1, %v7543_v11 }
0x1e33   :  { %v2358_v47 = vpop.f32.mrb[18].mxu1 }
0x1e34   :  { %v6834_v55 = vpop.f32.mrb[19].mxu1  ;;  %6838 = vmatmul.mubr.msk.f32.vlgmr.msra.gmra.mrb[12].mxu1 %vm133_vm0, %v2358_v47 }
0x1e35   :  { %6852 = vmatpush3.xpose.msk.msra.mxu1 %vm133_vm0, %v2537_v54  ;;  %6853 = vmatprep.mubr.msk.f32.mxu1 %vm7542_vm1, %v7543_v11 }
0x1e36   :  { %6861 = vmatprep.subr.mxu1 %v7543_v11 }
0x1e38   :  { %6854 = vmatmul.mubr.msk.f32.vlgmr.msra.gmra.mrb[20].mxu1 %vm133_vm0, %v2527_v45 }
0x1e39   :  { %6863 = vmatprep.mubr.msk.f32.mxu1 %vm7542_vm1, %v7543_v11 }
0x1ee5   :  { %v2685_v56 = vpop.f32.mrb[22].mxu0 }
0x1ee6   :  { %v2686_v57 = vadd.f32 %v2685_v56, %v8028_v51  ;;  %v6860_v58 = vpop.f32.mrb[23].mxu0 }
0x1ee8   :  { %v2692_v61 = vsel %vm133_vm0, %v2686_v57, -inf }
0x1ee9   :  { %2693 = vmax.xlane.f32.xlu0 %v2692_v61 }
0x1f0b   :  { %v2608_v62 = vpop.f32.mrb[20].mxu1 }
0x1f0c   :  { %v2609_v63 = vadd.f32 %v2608_v62, %v8025_v20  ;;  %v6855_v0 = vpop.f32.mrb[21].mxu1 }
0x1f0e   :  { %v2689_v1 = vsel %vm133_vm0, %v2609_v63, -inf }
0x1f0f   :  { %2690 = vmax.xlane.f32.xlu1 %v2689_v1 }
0x1f76   :  { %v2694_v2 = vpop.xlane.xlu0 %2693 }
0x1f77   :  { %v2696_v7 = vsub.f32 %v2686_v57, %v2694_v2 }
0x1f79   :  { %v2699_v8 = vmul.f32 1.442695, %v2696_v7 }
0x1f7b   :  { %7449 = vpow2.f32 %v2699_v8 }
0x1f85   :  { %v7450_v9 = vpop.eup %7449 }
0x1f86   :  { %v2704_v12 = vsel %vm133_vm0, %v7450_v9, 0.0 }
0x1f87   :  { %2705 = vadd.xlane.f32.xlu0 %v2704_v12 }
0x1f9c   :  { %v2691_v13 = vpop.xlane.xlu1 %2690 }
0x1f9d   :  { %2787 = vrot.lane.b32.xlu0 %v2532_v43, %s7549_s6  ;;  %v2695_v16 = vsub.f32 %v2609_v63, %v2691_v13 }
0x1f9f   :  { %v2697_v10 = vmul.f32 1.442695, %v2695_v16 }
0x1fa1   :  { %7451 = vpow2.f32 %v2697_v10 }
0x1fab   :  { %v7452_v17 = vpop.eup %7451 }
0x1fac   :  { %v2701_v22 = vsel %vm133_vm0, %v7452_v17, 0.0 }
0x1fad   :  { %2702 = vadd.xlane.f32.xlu1 %v2701_v22 }
0x1fbe   :  { %2711 = vrot.lane.b32.xlu1 %v2527_v45, %s7549_s6 }
0x2014   :  { %v2706_v21 = vpop.xlane.xlu0 %2705 }
0x2015   :  { %7453 = vrcp.f32 %v2706_v21 }
0x2018   :  { %v2788_v33 = vpop.permute.xlu0 %2787 }
0x2019   :  { %6867 = vmatpush3.msra.mxu0 %v2788_v33 }
0x201a   :  { %7211 = vmatprep.subr.bf16.mxu0 %v7210_v52 }
0x201f   :  { %v7454_v19 = vpop.eup %7453 }
0x2020   :  { %v2710_v5 = vmul.f32 %v7454_v19, %v7450_v9 }
0x2022   :  { %6869 = vmatmul.mubr.msk.f32.vlgmr.msra.gmra.mrb[24].mxu0 %vm133_vm0, %v2710_v5 }
0x2023   :  { %7213 = vmatpush3.bf16.msra.mxu0 %v7210_v52  ;;  %6884 = vmatprep.mubr.msk.f32.mxu0 %vm220_vm3, %v7979_v48  ;;  %v6290_v52 = vld [vmem:[%s8626_s9] ss:$0 sm:$0xff] }
0x2024   :  { %7215 = vmatprep.subr.bf16.mxu0 %v7214_v6 }
0x2027   :  { %7217 = vmatpush3.bf16.msra.mxu0 %v7214_v6 }
0x2028   :  { %6897 = vmatprep.subr.mxu0 %v7543_v11 }
0x202a   :  { %6885 = vmatmul.mubr.msk.f32.vlgmr.msra.gmra.mrb[26].mxu0 %vm220_vm3, %v7983_v53 }
0x202b   :  { %6899 = vmatprep.mubr.msk.f32.mxu0 %vm7542_vm1, %v7543_v11 }
0x203a   :  { %v2703_v59 = vpop.xlane.xlu1 %2702 }
0x203b   :  { %7455 = vrcp.f32 %v2703_v59 }
0x203e   :  { %v2712_v60 = vpop.permute.xlu1 %2711 }
0x203f   :  { %6862 = vmatpush3.msra.mxu1 %v2712_v60 }
0x2040   :  { %6871 = vmatprep.subr.mxu1 %v6322_v26 }
0x2045   :  { %v7456_v49 = vpop.eup %7455 }
0x2046   :  { %v2709_v50 = vmul.f32 %v7456_v49, %v7452_v17  ;;  %v6339_v17 = vld [vmem:[%s8625_s8 + $0x18] sm:$0xff] }
0x2048   :  { %6864 = vmatmul.mubr.msk.f32.vlgmr.msra.gmra.mrb[22].mxu1 %vm133_vm0, %v2709_v50 }
0x2049   :  { %6872 = vmatpush3.msra.mxu1 %v6322_v26 }
0x204a   :  { %6887 = vmatprep.subr.mxu1 %v7543_v11 }
0x20f5   :  { %v2859_v27 = vpop.f32.mrb[24].mxu0 }
0x20f6   :  { %v6870_v28 = vpop.f32.mrb[25].mxu0 }
0x20fd   :  { %v6886_v30 = vpop.f32.mrb[26].mxu0 }
0x20fe   :  { %v3033_v31 = vadd.f32 %v6886_v30, %v6330_v29  ;;  %v3027_v32 = vpop.f32.mrb[27].mxu0 }
0x20ff   :  { %v3028_v35 = vadd.f32 %v6330_v29, %v3027_v32 }
0x2100   :  { %3114 = vrot.lane.b32.xlu1 %v3033_v31, %s7547_s29 }
0x2101   :  { %3037 = vrot.lane.b32.xlu0 %v3028_v35, %s7547_s29 }
0x211b   :  { %v2783_v36 = vpop.f32.mrb[22].mxu1 }
0x211c   :  { %v6865_v37 = vpop.f32.mrb[23].mxu1  ;;  %6873 = vmatprep.mubr.msk.f32.mxu1 %vm133_vm0, %v2783_v36 }
0x211d   :  { %6874 = vmatmul.mubr.msk.f32.vlgmr.msra.gmra.mrb[12].mxu1 %vm133_vm0, %v2859_v27  ;;  %v3498_v37 = vld [vmem:[%s8629_s12 + $0x10] sm:$0xff] }
0x211e   :  { %6889 = vmatprep.mubr.msk.f32.mxu1 %vm7542_vm1, %v7543_v11 }
0x2172   :  { %v3115_v39 = vpop.permute.xlu1 %3114 }
0x2173   :  { %v3038_v38 = vpop.permute.xlu0 %3037 }
0x2174   :  { %6888 = vmatpush3.xpose.msk.msra.mxu1 %vm133_vm0, %v3038_v38  ;;  %v3499_v38 = vld [vmem:[%s8629_s12 + $0x18] sm:$0xff] }
0x2175   :  { %6892 = vmatprep.subr.mxu1 %v7543_v11 }
0x2177   :  { %6890 = vmatmul.mubr.msk.f32.vlgmr.msra.gmra.mrb[24].mxu1 %vm133_vm0, %v3028_v35 }
0x2178   :  { %6893 = vmatpush3.xpose.msk.msra.mxu1 %vm133_vm0, %v3115_v39  ;;  %6894 = vmatprep.mubr.msk.f32.mxu1 %vm7542_vm1, %v7543_v11  ;;  %v7222_v39 = vpack.c.bf16 %v3499_v38, %v3498_v37  ;;  %v6353_v38 = vld [vmem:[%s8655_s26 + $0x80] sm:$0xff] }
0x2179   :  { %6902 = vmatprep.subr.mxu1 %v7543_v11 }
0x217b   :  { %6895 = vmatmul.mubr.msk.f32.vlgmr.msra.gmra.mrb[26].mxu1 %vm133_vm0, %v3033_v31 }
0x217c   :  { %6904 = vmatprep.mubr.msk.f32.mxu1 %vm7542_vm1, %v7543_v11 }
0x224a   :  { %v3109_v40 = vpop.f32.mrb[24].mxu1 }
0x224b   :  { %v3110_v41 = vadd.f32 %v3109_v40, %v8025_v20  ;;  %v6891_v42 = vpop.f32.mrb[25].mxu1  ;;  %v3590_v40 = vld [vmem:[%s8631_s14] sm:$0xff] }
0x224c   :  { %v3592_v42 = vld [vmem:[%s8631_s14 + $0x10] sm:$0xff] }
0x224d   :  { %v3190_v43 = vsel %vm133_vm0, %v3110_v41, -inf }
0x224e   :  { %3191 = vmax.xlane.f32.xlu0 %v3190_v43  ;;  %v3186_v44 = vpop.f32.mrb[26].mxu1 }
0x224f   :  { %v3187_v45 = vadd.f32 %v3186_v44, %v8028_v51  ;;  %v6896_v46 = vpop.f32.mrb[27].mxu1  ;;  %v3593_v44 = vld [vmem:[%s8631_s14 + $0x18] sm:$0xff] }
0x2250   :  { %v3594_v46 = vld [vmem:[%s8631_s14 + $0x20] sm:$0xff] }
0x2251   :  { %v3193_v47 = vsel %vm133_vm0, %v3187_v45, -inf }
0x2252   :  { %3194 = vmax.xlane.f32.xlu1 %v3193_v47  ;;  %v3595_v47 = vld [vmem:[%s8631_s14 + $0x28] sm:$0xff] }
0x2263   :  { %3212 = vrot.lane.b32.xlu1 %v3028_v35, %s7549_s6  ;;  %v3497_v35 = vld [vmem:[%s8629_s12 + $0x8] sm:$0xff] }
0x22db   :  { %v3192_v54 = vpop.xlane.xlu0 %3191 }
0x22dc   :  { %v3196_v55 = vsub.f32 %v3110_v41, %v3192_v54  ;;  %v3591_v41 = vld [vmem:[%s8631_s14 + $0x8] sm:$0xff]  ;;  %v7234_v54 = vpack.c.bf16 %v3595_v47, %v3594_v46 }
0x22dd   :  { %v7226_v43 = vpack.c.bf16 %v3591_v41, %v3590_v40  ;;  %v6355_v41 = vld [vmem:[%s8655_s26 + $0x90] sm:$0xff] }
0x22de   :  { %v3198_v56 = vmul.f32 1.442695, %v3196_v55 }
0x22df   :  { %v3195_v57 = vpop.xlane.xlu1 %3194 }
0x22e0   :  { %7457 = vpow2.f32 %v3198_v56  ;;  %v3197_v58 = vsub.f32 %v3187_v45, %v3195_v57  ;;  %v7230_v45 = vpack.c.bf16 %v3593_v44, %v3592_v42  ;;  %v6356_v42 = vld [vmem:[%s8655_s26 + $0x98] sm:$0xff] }
0x22e2   :  { %v3200_v61 = vmul.f32 1.442695, %v3197_v58 }
0x22e3   :  { %v3213_v62 = vpop.permute.xlu1 %3212 }
0x22e4   :  { %7459 = vpow2.f32 %v3200_v61  ;;  %6898 = vmatpush3.msra.mxu0 %v3213_v62 }
0x22ea   :  { %v7458_v63 = vpop.eup %7457 }
0x22eb   :  { %v3202_v0 = vsel %vm133_vm0, %v7458_v63, 0.0 }
0x22ec   :  { %3203 = vadd.xlane.f32.xlu0 %v3202_v0  ;;  %v6342_v0 = vld [vmem:[%s8627_s10] ss:$0 sm:$0xff] }
0x22ee   :  { %v7460_v1 = vpop.eup %7459 }
0x22ef   :  { %v3205_v2 = vsel %vm133_vm0, %v7460_v1, 0.0 }
0x22f0   :  { %3206 = vadd.xlane.f32.xlu0 %v3205_v2 }
0x2306   :  { %3288 = vrot.lane.b32.xlu0 %v3033_v31, %s7549_s6 }
0x2379   :  { %v3204_v7 = vpop.xlane.xlu0 %3203 }
0x237a   :  { %7461 = vrcp.f32 %v3204_v7 }
0x237d   :  { %v3207_v8 = vpop.xlane.xlu0 %3206 }
0x237e   :  { %7463 = vrcp.f32 %v3207_v8  ;;  %v6343_v8 = vld [vmem:[%s8628_s11] ss:$0 sm:$0xff] }
0x2381   :  { %v3289_v9 = vpop.permute.xlu0 %3288 }
0x2382   :  { %6903 = vmatpush3.msra.mxu1 %v3289_v9 }
0x2383   :  { %6907 = vmatprep.subr.mxu1 %v6339_v17 }
0x2384   :  { %v7462_v12 = vpop.eup %7461 }
0x2385   :  { %v3210_v13 = vmul.f32 %v7462_v12, %v7458_v63 }
0x2387   :  { %6900 = vmatmul.mubr.msk.f32.vlgmr.msra.gmra.mrb[28].mxu0 %vm133_vm0, %v3210_v13 }
0x2388   :  { %v7464_v16 = vpop.eup %7463 }
0x2389   :  { %v3211_v10 = vmul.f32 %v7464_v16, %v7460_v1 }
0x238b   :  { %6905 = vmatmul.mubr.msk.f32.vlgmr.msra.gmra.mrb[28].mxu1 %vm133_vm0, %v3211_v10  ;;  %v3596_v10 = vld [vmem:[%s8631_s14 + $0x30] sm:$0xff] }
0x238c   :  { %6908 = vmatpush3.msra.mxu1 %v6339_v17  ;;  %v3597_v17 = vld [vmem:[%s8631_s14 + $0x38] sm:$0xff] }
0x238d   :  { %7227 = vmatprep.subr.bf16.mxu1 %v7226_v43 }
0x245a   :  { %v3284_v22 = vpop.f32.mrb[28].mxu0 }
0x245b   :  { %v6901_v23 = vpop.f32.mrb[29].mxu0  ;;  %6909 = vmatprep.mubr.msk.f32.mxu1 %vm133_vm0, %v3284_v22  ;;  %v7238_v22 = vpack.c.bf16 %v3597_v17, %v3596_v10 }
0x245c   :  { %v6344_v23 = vld [vmem:[%s8630_s13] ss:$0 sm:$0xff] }
0x245e   :  { %v3360_v25 = vpop.f32.mrb[28].mxu1 }
0x245f   :  { %v6906_v21 = vpop.f32.mrb[29].mxu1  ;;  %6910 = vmatmul.mubr.msk.f32.vlgmr.msra.gmra.mrb[12].mxu1 %vm133_vm0, %v3360_v25 }
0x2460   :  { %7229 = vmatpush3.bf16.msra.mxu1 %v7226_v43  ;;  %v7246_v43 = vpack.c.bf16 %v6356_v42, %v6355_v41 }
0x2461   :  { %7231 = vmatprep.subr.bf16.mxu1 %v7230_v45 }
0x2464   :  { %7233 = vmatpush3.bf16.msra.mxu1 %v7230_v45 }
0x2465   :  { %7235 = vmatprep.subr.bf16.mxu1 %v7234_v54 }
0x2468   :  { %7237 = vmatpush3.bf16.msra.mxu1 %v7234_v54 }
0x2469   :  { %7239 = vmatprep.subr.bf16.mxu1 %v7238_v22 }
0x246c   :  { %7241 = vmatpush3.bf16.msra.mxu1 %v7238_v22 }
0x246d   :  { %6963 = vmatprep.subr.mxu1 %v7543_v11 }
0x2532   :  { %v6911_v33 = vpop.f32.mrb[12].mxu1 }
0x2533   :  { %v7310_v34 = vadd.f32 %v6911_v33, %v6290_v52  ;;  %v3438_v18 = vpop.f32.mrb[13].mxu1 }
0x2534   :  { %v7311_v19 = vadd.f32 %v6290_v52, %v3438_v18 }
0x2535   :  { %v3450_v5 = vadd.f32 %v7310_v34, %v7983_v53 }
0x2536   :  { %v3449_v6 = vadd.f32 %v7311_v19, %v7979_v48  ;;  %v3496_v48 = vld [vmem:[%s8629_s12] sm:$0xff] }
0x2537   :  { %v3456_v59 = vsel %vm220_vm3, %v3450_v5, 0.0  ;;  %v7218_v36 = vpack.c.bf16 %v3497_v35, %v3496_v48  ;;  %v6347_v19 = vld [vmem:[%s8632_s15] ss:$0 sm:$0xff] }
0x2538   :  { %3457 = vadd.xlane.f32.xlu0 %v3456_v59  ;;  %v3453_v60 = vsel %vm220_vm3, %v3449_v6, 0.0 }
0x2539   :  { %3454 = vadd.xlane.f32.xlu1 %v3453_v60  ;;  %7219 = vmatprep.subr.bf16.mxu0 %v7218_v36 }
0x253a   :  { %7221 = vmatpush3.bf16.msra.mxu0 %v7218_v36 }
0x253b   :  { %7223 = vmatprep.subr.bf16.mxu0 %v7222_v39 }
0x253e   :  { %7225 = vmatpush3.bf16.msra.mxu0 %v7222_v39  ;;  %v6354_v39 = vld [vmem:[%s8655_s26 + $0x88] sm:$0xff] }
0x253f   :  { %v7242_v40 = vpack.c.bf16 %v6354_v39, %v6353_v38 }
0x2541   :  { %7243 = vmatprep.subr.bf16.mxu0 %v7242_v40 }
0x25c5   :  { %v3458_v49 = vpop.xlane.xlu0 %3457 }
0x25c6   :  { %v3461_v50 = vmul.f32 0.03125, %v3458_v49  ;;  %v3455_v26 = vpop.xlane.xlu1 %3454 }
0x25c7   :  { %v3460_v27 = vmul.f32 0.03125, %v3455_v26 }
0x25c8   :  { %v3463_v28 = vsub.f32 %v3450_v5, %v3461_v50 }
0x25c9   :  { %v3462_v29 = vsub.f32 %v3449_v6, %v3460_v27 }
0x25ca   :  { %v3465_v30 = vmul.f32 %v3463_v28, %v3463_v28 }
0x25cb   :  { %v3464_v31 = vmul.f32 %v3462_v29, %v3462_v29 }
0x25cc   :  { %v3469_v32 = vsel %vm220_vm3, %v3465_v30, 0.0 }
0x25cd   :  { %3470 = vadd.xlane.f32.xlu0 %v3469_v32  ;;  %v3466_v53 = vsel %vm220_vm3, %v3464_v31, 0.0 }
0x25ce   :  { %3467 = vadd.xlane.f32.xlu1 %v3466_v53 }
0x265a   :  { %v3471_v55 = vpop.xlane.xlu0 %3470 }
0x265b   :  { %v3473_v56 = vmul.f32 0.03125, %v3471_v55  ;;  %v3468_v57 = vpop.xlane.xlu1 %3467 }
0x265c   :  { %v3472_v58 = vmul.f32 0.03125, %v3468_v57  ;;  %v6350_v57 = vld [vmem:[%s8633_s16] ss:$0 sm:$0xff] }
0x265d   :  { %v3475_v61 = vadd.f32 1e-05, %v3473_v56 }
0x265e   :  { %v3474_v62 = vadd.f32 1e-05, %v3472_v58 }
0x265f   :  { %7465 = vrsqrt.f32 %v3475_v61 }
0x2660   :  { %7467 = vrsqrt.f32 %v3474_v62 }
0x2669   :  { %v7466_v63 = vpop.eup %7465 }
0x266a   :  { %v7468_v1 = vpop.eup %7467  ;;  %v3479_v2 = vmul.f32 %v7466_v63, %v3463_v28  ;;  %v6351_v63 = vld [vmem:[%s8634_s17] ss:$0 sm:$0xff] }
0x266b   :  { %v3478_v7 = vmul.f32 %v7468_v1, %v3462_v29 }
0x266c   :  { %v3487_v9 = vmul.f32 %v6342_v0, %v3479_v2 }
0x266d   :  { %v3486_v12 = vmul.f32 %v6342_v0, %v3478_v7 }
0x266e   :  { %v3495_v16 = vadd.f32 %v6343_v8, %v3487_v9 }
0x266f   :  { %v3494_v13 = vadd.f32 %v6343_v8, %v3486_v12  ;;  %v6358_v8 = vld [vmem:[%s8624_s7 + $0x4] ss:$0 sm:$0xff] }
0x2671   :  { %6920 = vmatprep.mubr.msk.f32.mxu0 %vm220_vm3, %v3494_v13 }
0x2672   :  { %6921 = vmatmul.mubr.msk.f32.vlgmr.msra.gmra.mrb[30].mxu0 %vm220_vm3, %v3495_v16 }
0x2673   :  { %7245 = vmatpush3.bf16.msra.mxu0 %v7242_v40 }
0x2674   :  { %7247 = vmatprep.subr.bf16.mxu0 %v7246_v43 }
0x2677   :  { %7249 = vmatpush3.bf16.msra.mxu0 %v7246_v43  ;;  %v6367_v43 = vld [vmem:[%s8625_s8 + $0x20] sm:$0xff] }
0x2678   :  { %6953 = vmatprep.subr.mxu0 %v7543_v11 }
0x2745   :  { %v6922_v25 = vpop.f32.mrb[30].mxu0 }
0x2746   :  { %v3585_v21 = vadd.f32 %v6922_v25, %v6344_v23  ;;  %v3579_v52 = vpop.f32.mrb[31].mxu0 }
0x2747   :  { %v3580_v33 = vadd.f32 %v6344_v23, %v3579_v52 }
0x2748   :  { %v3589_v18 = vmax.f32 %v3585_v21, 0.0 }
0x2749   :  { %v3588_v34 = vmax.f32 %v3580_v33, 0.0 }
0x274b   :  { %6939 = vmatprep.mubr.msk.f32.mxu1 %vm3605_vm13, %v3588_v34 }
0x274c   :  { %6940 = vmatmul.mubr.msk.f32.vlgmr.msra.gmra.mrb[30].mxu1 %vm3605_vm13, %v3589_v18 }
0x274d   :  { %6965 = vmatprep.mubr.msk.f32.mxu1 %vm7542_vm1, %v7543_v11 }
0x281f   :  { %v6941_v5 = vpop.f32.mrb[30].mxu1 }
0x2820   :  { %v3684_v6 = vadd.f32 %v6941_v5, %v6347_v19  ;;  %v3678_v59 = vpop.f32.mrb[31].mxu1 }
0x2821   :  { %v3679_v60 = vadd.f32 %v6347_v19, %v3678_v59 }
0x2822   :  { %v3688_v49 = vadd.f32 %v3684_v6, %v3495_v16 }
0x2823   :  { %v3687_v50 = vadd.f32 %v3679_v60, %v3494_v13 }
0x2824   :  { %v3694_v26 = vsel %vm220_vm3, %v3688_v49, 0.0 }
0x2825   :  { %3695 = vadd.xlane.f32.xlu0 %v3694_v26  ;;  %v3691_v27 = vsel %vm220_vm3, %v3687_v50, 0.0 }
0x2826   :  { %3692 = vadd.xlane.f32.xlu1 %v3691_v27 }
0x28b2   :  { %v3696_v28 = vpop.xlane.xlu0 %3695 }
0x28b3   :  { %v3698_v29 = vmul.f32 0.03125, %v3696_v28  ;;  %v3693_v30 = vpop.xlane.xlu1 %3692 }
0x28b4   :  { %v3697_v31 = vmul.f32 0.03125, %v3693_v30  ;;  %v6371_v30 = vld [vmem:[%s8655_s26 + $0xa0] sm:$0xff] }
0x28b5   :  { %v3700_v32 = vsub.f32 %v3688_v49, %v3698_v29 }
0x28b6   :  { %v3699_v53 = vsub.f32 %v3687_v50, %v3697_v31  ;;  %v6372_v31 = vld [vmem:[%s8655_s26 + $0xa8] sm:$0xff] }
0x28b7   :  { %v3702_v48 = vmul.f32 %v3700_v32, %v3700_v32 }
0x28b8   :  { %v3701_v35 = vmul.f32 %v3699_v53, %v3699_v53 }
0x28b9   :  { %v3706_v36 = vsel %vm220_vm3, %v3702_v48, 0.0 }
0x28ba   :  { %3707 = vadd.xlane.f32.xlu0 %v3706_v36  ;;  %v3703_v37 = vsel %vm220_vm3, %v3701_v35, 0.0  ;;  %v6373_v36 = vld [vmem:[%s8655_s26 + $0xb0] sm:$0xff] }
0x28bb   :  { %3704 = vadd.xlane.f32.xlu1 %v3703_v37  ;;  %v6374_v37 = vld [vmem:[%s8655_s26 + $0xb8] sm:$0xff] }
0x28bc   :  { %v7254_v40 = vpack.c.bf16 %v6374_v37, %v6373_v36  ;;  %v6393_v36 = vld [vmem:[%s8624_s7 + $0x6] ss:$0 sm:$0xff] }
0x2947   :  { %v3708_v44 = vpop.xlane.xlu0 %3707 }
0x2948   :  { %v3710_v45 = vmul.f32 0.03125, %v3708_v44  ;;  %v3705_v46 = vpop.xlane.xlu1 %3704 }
0x2949   :  { %v3709_v47 = vmul.f32 0.03125, %v3705_v46 }
0x294a   :  { %v3712_v54 = vadd.f32 1e-05, %v3710_v45 }
0x294b   :  { %v3711_v55 = vadd.f32 1e-05, %v3709_v47 }
0x294c   :  { %7469 = vrsqrt.f32 %v3712_v54  ;;  %v6376_v54 = vld [vmem:[%s8624_s7 + $0x5] ss:$0 sm:$0xff] }
0x294d   :  { %7471 = vrsqrt.f32 %v3711_v55 }
0x2956   :  { %v7470_v56 = vpop.eup %7469 }
0x2957   :  { %v7472_v58 = vpop.eup %7471  ;;  %v3716_v61 = vmul.f32 %v7470_v56, %v3700_v32  ;;  %v7250_v32 = vpack.c.bf16 %v6372_v31, %v6371_v30 }
0x2958   :  { %v3715_v62 = vmul.f32 %v7472_v58, %v3699_v53 }
0x2959   :  { %v3724_v0 = vmul.f32 %v6350_v57, %v3716_v61 }
0x295a   :  { %v3723_v1 = vmul.f32 %v6350_v57, %v3715_v62 }
0x295b   :  { %v8291_v7 = vadd.f32 %v6351_v63, %v3724_v0 }
0x295c   :  { %v8289_v2 = vadd.f32 %v6351_v63, %v3723_v1 }
0x295e   :  { %6950 = vmatprep.mubr.msk.f32.mxu0 %vm220_vm3, %v8289_v2 }
0x295f   :  { %6951 = vmatmul.mubr.msk.f32.vlgmr.msra.gmra.mrb[32].mxu0 %vm220_vm3, %v8291_v7 }
0x2960   :  { %6955 = vmatprep.mubr.msk.f32.mxu0 %vm7542_vm1, %v7543_v11 }
0x2a32   :  { %v6952_v9 = vpop.f32.mrb[32].mxu0 }
0x2a33   :  { %v3826_v12 = vadd.f32 %v6952_v9, %v6358_v8  ;;  %v3820_v13 = vpop.f32.mrb[33].mxu0 }
0x2a34   :  { %v3821_v16 = vadd.f32 %v6358_v8, %v3820_v13 }
0x2a35   :  { %3907 = vrot.lane.b32.xlu0 %v3826_v12, %s7547_s29 }
0x2a36   :  { %3830 = vrot.lane.b32.xlu1 %v3821_v16, %s7547_s29 }
0x2aa7   :  { %v3908_v17 = vpop.permute.xlu0 %3907 }
0x2aa8   :  { %v3831_v10 = vpop.permute.xlu1 %3830 }
0x2aa9   :  { %6954 = vmatpush3.xpose.msk.msra.mxu0 %vm133_vm0, %v3831_v10 }
0x2aaa   :  { %6958 = vmatprep.subr.mxu0 %v7543_v11 }
0x2aac   :  { %6956 = vmatmul.mubr.msk.f32.vlgmr.msra.gmra.mrb[34].mxu0 %vm133_vm0, %v3821_v16 }
0x2aad   :  { %6959 = vmatpush3.xpose.msk.msra.mxu0 %vm133_vm0, %v3908_v17  ;;  %6960 = vmatprep.mubr.msk.f32.mxu0 %vm7542_vm1, %v7543_v11 }
0x2aae   :  { %6968 = vmatprep.subr.mxu0 %v7543_v11 }
0x2ab0   :  { %6961 = vmatmul.mubr.msk.f32.vlgmr.msra.gmra.mrb[36].mxu0 %vm133_vm0, %v3826_v12 }
0x2ab1   :  { %6970 = vmatprep.mubr.msk.f32.mxu0 %vm7542_vm1, %v7543_v11 }
0x2b7f   :  { %v3902_v22 = vpop.f32.mrb[34].mxu0 }
0x2b80   :  { %v3903_v23 = vadd.f32 %v3902_v22, %v8025_v20  ;;  %v6957_v25 = vpop.f32.mrb[35].mxu0 }
0x2b82   :  { %v3983_v21 = vsel %vm133_vm0, %v3903_v23, -inf }
0x2b83   :  { %3984 = vmax.xlane.f32.xlu0 %v3983_v21  ;;  %v3979_v52 = vpop.f32.mrb[36].mxu0 }
0x2b84   :  { %v3980_v33 = vadd.f32 %v3979_v52, %v8028_v51  ;;  %v6962_v34 = vpop.f32.mrb[37].mxu0  ;;  %v6388_v52 = vld [vmem:[%s8655_s26 + $0xc0] sm:$0xff] }
0x2b86   :  { %v3986_v18 = vsel %vm133_vm0, %v3980_v33, -inf }
0x2b87   :  { %3987 = vmax.xlane.f32.xlu1 %v3986_v18 }
0x2b99   :  { %4081 = vrot.lane.b32.xlu0 %v3826_v12, %s7549_s6 }
0x2c10   :  { %v3985_v19 = vpop.xlane.xlu0 %3984 }
0x2c11   :  { %v3989_v5 = vsub.f32 %v3903_v23, %v3985_v19 }
0x2c13   :  { %v3991_v49 = vmul.f32 1.442695, %v3989_v5 }
0x2c14   :  { %v4082_v6 = vpop.permute.xlu0 %4081  ;;  %v3988_v59 = vpop.xlane.xlu1 %3987 }
0x2c15   :  { %v3990_v60 = vsub.f32 %v3980_v33, %v3988_v59  ;;  %6969 = vmatpush3.msra.mxu0 %v4082_v6  ;;  %v6389_v33 = vld [vmem:[%s8655_s26 + $0xc8] sm:$0xff]  ;;  %v6390_v59 = vld [vmem:[%s8655_s26 + $0xd0] sm:$0xff] }
0x2c16   :  { %7251 = vmatprep.subr.bf16.mxu0 %v7250_v32  ;;  %v7258_v34 = vpack.c.bf16 %v6389_v33, %v6388_v52  ;;  %v6408_v52 = vld [vmem:[%s8655_s26 + $0xf8] sm:$0xff] }
0x2c17   :  { %v3993_v50 = vmul.f32 1.442695, %v3990_v60  ;;  %v6391_v60 = vld [vmem:[%s8655_s26 + $0xd8] sm:$0xff] }
0x2c19   :  { %7473 = vpow2.f32 %v3993_v50 }
0x2c1a   :  { %7475 = vpow2.f32 %v3991_v49 }
0x2c23   :  { %v7474_v26 = vpop.eup %7473 }
0x2c24   :  { %v3998_v27 = vsel %vm133_vm0, %v7474_v26, 0.0  ;;  %v7476_v28 = vpop.eup %7475 }
0x2c25   :  { %3999 = vadd.xlane.f32.xlu1 %v3998_v27  ;;  %v3995_v29 = vsel %vm133_vm0, %v7476_v28, 0.0 }
0x2c29   :  { %3996 = vadd.xlane.f32.xlu1 %v3995_v29 }
0x2c3a   :  { %4005 = vrot.lane.b32.xlu1 %v3821_v16, %s7549_s6 }
0x2cb2   :  { %v4000_v53 = vpop.xlane.xlu1 %3999 }
0x2cb3   :  { %7477 = vrcp.f32 %v4000_v53 }
0x2cb6   :  { %v3997_v48 = vpop.xlane.xlu1 %3996 }
0x2cb7   :  { %7479 = vrcp.f32 %v3997_v48 }
0x2cba   :  { %v4006_v35 = vpop.permute.xlu1 %4005 }
0x2cbb   :  { %6964 = vmatpush3.msra.mxu1 %v4006_v35  ;;  %v6385_v35 = vld [vmem:[%s8625_s8 + $0x28] sm:$0xff] }
0x2cbc   :  { %6973 = vmatprep.subr.mxu1 %v6367_v43 }
0x2cbd   :  { %v7478_v38 = vpop.eup %7477 }
0x2cbe   :  { %v4004_v39 = vmul.f32 %v7478_v38, %v7474_v26  ;;  %v7262_v26 = vpack.c.bf16 %v6391_v60, %v6390_v59  ;;  %v6402_v60 = vld [vmem:[%s8625_s8 + $0x30] sm:$0xff] }
0x2cc0   :  { %6971 = vmatmul.mubr.msk.f32.vlgmr.msra.gmra.mrb[38].mxu0 %vm133_vm0, %v4004_v39 }
0x2cc1   :  { %v7480_v41 = vpop.eup %7479  ;;  %7253 = vmatpush3.bf16.msra.mxu0 %v7250_v32  ;;  %6986 = vmatprep.mubr.msk.f32.mxu0 %vm220_vm3, %v8289_v2 }
0x2cc2   :  { %v4003_v42 = vmul.f32 %v7480_v41, %v7476_v28  ;;  %7255 = vmatprep.subr.bf16.mxu0 %v7254_v40 }
0x2cc4   :  { %6966 = vmatmul.mubr.msk.f32.vlgmr.msra.gmra.mrb[32].mxu1 %vm133_vm0, %v4003_v42 }
0x2cc5   :  { %7257 = vmatpush3.bf16.msra.mxu0 %v7254_v40  ;;  %6974 = vmatpush3.msra.mxu1 %v6367_v43 }
0x2cc6   :  { %6999 = vmatprep.subr.mxu0 %v7543_v11  ;;  %6989 = vmatprep.subr.mxu1 %v7543_v11 }
0x2cc8   :  { %6987 = vmatmul.mubr.msk.f32.vlgmr.msra.gmra.mrb[40].mxu0 %vm220_vm3, %v8291_v7 }
0x2cc9   :  { %7001 = vmatprep.mubr.msk.f32.mxu0 %vm7542_vm1, %v7543_v11 }
0x2d93   :  { %v4153_v44 = vpop.f32.mrb[38].mxu0 }
0x2d94   :  { %v6972_v45 = vpop.f32.mrb[39].mxu0 }
0x2d97   :  { %v4077_v46 = vpop.f32.mrb[32].mxu1 }
0x2d98   :  { %v6967_v47 = vpop.f32.mrb[33].mxu1  ;;  %6975 = vmatprep.mubr.msk.f32.mxu1 %vm133_vm0, %v4077_v46 }
0x2d99   :  { %6976 = vmatmul.mubr.msk.f32.vlgmr.msra.gmra.mrb[34].mxu1 %vm133_vm0, %v4153_v44 }
0x2d9a   :  { %6991 = vmatprep.mubr.msk.f32.mxu1 %vm7542_vm1, %v7543_v11 }
0x2d9b   :  { %v6988_v55 = vpop.f32.mrb[40].mxu0 }
0x2d9c   :  { %v4333_v56 = vadd.f32 %v6988_v55, %v6376_v54  ;;  %v4327_v57 = vpop.f32.mrb[41].mxu0 }
0x2d9d   :  { %v4328_v58 = vadd.f32 %v6376_v54, %v4327_v57 }
0x2d9e   :  { %4414 = vrot.lane.b32.xlu1 %v4333_v56, %s7547_s29 }
0x2d9f   :  { %4337 = vrot.lane.b32.xlu0 %v4328_v58, %s7547_s29 }
0x2e10   :  { %v4415_v62 = vpop.permute.xlu1 %4414 }
0x2e11   :  { %v4338_v61 = vpop.permute.xlu0 %4337 }
0x2e12   :  { %6990 = vmatpush3.xpose.msk.msra.mxu1 %vm133_vm0, %v4338_v61 }
0x2e13   :  { %6994 = vmatprep.subr.mxu1 %v7543_v11 }
0x2e15   :  { %6992 = vmatmul.mubr.msk.f32.vlgmr.msra.gmra.mrb[36].mxu1 %vm133_vm0, %v4328_v58 }
0x2e16   :  { %6995 = vmatpush3.xpose.msk.msra.mxu1 %vm133_vm0, %v4415_v62  ;;  %6996 = vmatprep.mubr.msk.f32.mxu1 %vm7542_vm1, %v7543_v11 }
0x2e17   :  { %7004 = vmatprep.subr.mxu1 %v7543_v11 }
0x2e19   :  { %6997 = vmatmul.mubr.msk.f32.vlgmr.msra.gmra.mrb[38].mxu1 %vm133_vm0, %v4333_v56 }
0x2e1a   :  { %7006 = vmatprep.mubr.msk.f32.mxu1 %vm7542_vm1, %v7543_v11 }
0x2ee8   :  { %v4409_v63 = vpop.f32.mrb[36].mxu1 }
0x2ee9   :  { %v4410_v0 = vadd.f32 %v4409_v63, %v8025_v20  ;;  %v6993_v1 = vpop.f32.mrb[37].mxu1 }
0x2eeb   :  { %v4490_v8 = vsel %vm133_vm0, %v4410_v0, -inf }
0x2eec   :  { %4491 = vmax.xlane.f32.xlu0 %v4490_v8  ;;  %v4486_v9 = vpop.f32.mrb[38].mxu1 }
0x2eed   :  { %v6998_v12 = vpop.f32.mrb[39].mxu1  ;;  %v4487_v23 = vadd.f32 %v4486_v9, %v8028_v51 }
0x2eef   :  { %v4493_v21 = vsel %vm133_vm0, %v4487_v23, -inf }
0x2f02   :  { %4512 = vrot.lane.b32.xlu0 %v4328_v58, %s7549_s6 }
0x2f79   :  { %v4492_v13 = vpop.xlane.xlu0 %4491 }
0x2f7a   :  { %v4496_v16 = vsub.f32 %v4410_v0, %v4492_v13 }
0x2f7c   :  { %v4498_v10 = vmul.f32 1.442695, %v4496_v16 }
0x2f7d   :  { %v4513_v17 = vpop.permute.xlu0 %4512 }
0x2f7e   :  { %7481 = vpow2.f32 %v4498_v10  ;;  %7000 = vmatpush3.msra.mxu0 %v4513_v17  ;;  %v6405_v10 = vld [vmem:[%s8655_s26 + $0xe0] sm:$0xff]  ;;  %v6406_v17 = vld [vmem:[%s8655_s26 + $0xe8] sm:$0xff] }
0x2f7f   :  { %7259 = vmatprep.subr.bf16.mxu0 %v7258_v34 }
0x2f88   :  { %v7482_v22 = vpop.eup %7481 }
0x2f89   :  { %v4502_v25 = vsel %vm133_vm0, %v7482_v22, 0.0 }
0x2f8a   :  { %4503 = vadd.xlane.f32.xlu1 %v4502_v25 }
0x2f8e   :  { %4494 = vmax.xlane.f32.xlu1 %v4493_v21  ;;  %v6407_v21 = vld [vmem:[%s8655_s26 + $0xf0] sm:$0xff] }
0x3017   :  { %v4504_v18 = vpop.xlane.xlu1 %4503 }
0x3018   :  { %7483 = vrcp.f32 %v4504_v18  ;;  %v7270_v18 = vpack.c.bf16 %v6408_v52, %v6407_v21 }
0x301b   :  { %v4495_v19 = vpop.xlane.xlu1 %4494 }
0x301c   :  { %v4497_v5 = vsub.f32 %v4487_v23, %v4495_v19  ;;  %v7266_v23 = vpack.c.bf16 %v6406_v17, %v6405_v10  ;;  %v6370_v17 = vld [vmem:[%s8626_s9 + $0x1] ss:$0 sm:$0xff] }
0x301e   :  { %v4500_v6 = vmul.f32 1.442695, %v4497_v5 }
0x3020   :  { %7485 = vpow2.f32 %v4500_v6 }
0x3022   :  { %v7484_v49 = vpop.eup %7483 }
0x3023   :  { %v4510_v50 = vmul.f32 %v7484_v49, %v7482_v22 }
0x3025   :  { %7002 = vmatmul.mubr.msk.f32.vlgmr.msra.gmra.mrb[42].mxu0 %vm133_vm0, %v4510_v50 }
0x3026   :  { %7261 = vmatpush3.bf16.msra.mxu0 %v7258_v34  ;;  %7022 = vmatprep.mubr.msk.f32.mxu0 %vm220_vm3, %v8289_v2 }
0x3027   :  { %7263 = vmatprep.subr.bf16.mxu0 %v7262_v26 }
0x302a   :  { %v7486_v27 = vpop.eup %7485  ;;  %7265 = vmatpush3.bf16.msra.mxu0 %v7262_v26  ;;  %v6410_v26 = vld [vmem:[%s8624_s7 + $0x7] ss:$0 sm:$0xff] }
0x302b   :  { %v4505_v28 = vsel %vm133_vm0, %v7486_v27, 0.0  ;;  %7030 = vmatprep.subr.mxu0 %v7543_v11 }
0x302c   :  { %4506 = vadd.xlane.f32.xlu1 %v4505_v28 }
0x302d   :  { %7023 = vmatmul.mubr.msk.f32.vlgmr.msra.gmra.mrb[44].mxu0 %vm220_vm3, %v8291_v7 }
0x302e   :  { %7032 = vmatprep.mubr.msk.f32.mxu0 %vm7542_vm1, %v7543_v11 }
0x303d   :  { %4588 = vrot.lane.b32.xlu1 %v4333_v56, %s7549_s6 }
0x30b9   :  { %v4507_v29 = vpop.xlane.xlu1 %4506 }
0x30ba   :  { %7487 = vrcp.f32 %v4507_v29 }
0x30bd   :  { %v4589_v30 = vpop.permute.xlu1 %4588 }
0x30be   :  { %7005 = vmatpush3.msra.mxu1 %v4589_v30 }
0x30bf   :  { %7009 = vmatprep.subr.mxu1 %v6385_v35 }
0x30c4   :  { %v7488_v31 = vpop.eup %7487 }
0x30c5   :  { %v4511_v32 = vmul.f32 %v7488_v31, %v7486_v27 }
0x30c7   :  { %7007 = vmatmul.mubr.msk.f32.vlgmr.msra.gmra.mrb[40].mxu1 %vm133_vm0, %v4511_v32 }
0x30c8   :  { %7010 = vmatpush3.msra.mxu1 %v6385_v35 }
0x30c9   :  { %7025 = vmatprep.subr.mxu1 %v7543_v11 }
0x30f8   :  { %v4584_v53 = vpop.f32.mrb[42].mxu0 }
0x30f9   :  { %v7003_v48 = vpop.f32.mrb[43].mxu0  ;;  %7011 = vmatprep.mubr.msk.f32.mxu1 %vm133_vm0, %v4584_v53 }
0x3100   :  { %v7024_v37 = vpop.f32.mrb[44].mxu0 }
0x3101   :  { %v4834_v38 = vadd.f32 %v7024_v37, %v6393_v36  ;;  %v4828_v39 = vpop.f32.mrb[45].mxu0 }
0x3102   :  { %v4829_v40 = vadd.f32 %v6393_v36, %v4828_v39 }
0x3103   :  { %4915 = vrot.lane.b32.xlu0 %v4834_v38, %s7547_s29 }
0x3107   :  { %4838 = vrot.lane.b32.xlu0 %v4829_v40, %s7547_s29 }
0x3175   :  { %v4916_v41 = vpop.permute.xlu0 %4915 }
0x3176   :  { %7031 = vmatpush3.xpose.msk.msra.mxu0 %vm133_vm0, %v4916_v41 }
0x3177   :  { %7040 = vmatprep.subr.mxu0 %v7543_v11 }
0x3179   :  { %7033 = vmatmul.mubr.msk.f32.vlgmr.msra.gmra.mrb[46].mxu0 %vm133_vm0, %v4834_v38  ;;  %v4839_v43 = vpop.permute.xlu0 %4838 }
0x317a   :  { %7042 = vmatprep.mubr.msk.f32.mxu0 %vm7542_vm1, %v7543_v11 }
0x319a   :  { %v4660_v42 = vpop.f32.mrb[40].mxu1 }
0x319b   :  { %v7008_v44 = vpop.f32.mrb[41].mxu1  ;;  %7012 = vmatmul.mubr.msk.f32.vlgmr.msra.gmra.mrb[34].mxu1 %vm133_vm0, %v4660_v42 }
0x319c   :  { %7026 = vmatpush3.xpose.msk.msra.mxu1 %vm133_vm0, %v4839_v43  ;;  %7027 = vmatprep.mubr.msk.f32.mxu1 %vm7542_vm1, %v7543_v11 }
0x319d   :  { %7035 = vmatprep.subr.mxu1 %v7543_v11 }
0x319f   :  { %7028 = vmatmul.mubr.msk.f32.vlgmr.msra.gmra.mrb[42].mxu1 %vm133_vm0, %v4829_v40 }
0x31a0   :  { %7037 = vmatprep.mubr.msk.f32.mxu1 %vm7542_vm1, %v7543_v11 }
0x324c   :  { %v4987_v45 = vpop.f32.mrb[46].mxu0 }
0x324d   :  { %v4988_v46 = vadd.f32 %v4987_v45, %v8028_v51  ;;  %v7034_v47 = vpop.f32.mrb[47].mxu0 }
0x324f   :  { %v4994_v54 = vsel %vm133_vm0, %v4988_v46, -inf }
0x3250   :  { %4995 = vmax.xlane.f32.xlu0 %v4994_v54 }
0x3272   :  { %v4910_v55 = vpop.f32.mrb[42].mxu1 }
0x3273   :  { %v4911_v56 = vadd.f32 %v4910_v55, %v8025_v20  ;;  %v7029_v57 = vpop.f32.mrb[43].mxu1 }
0x3275   :  { %v4991_v58 = vsel %vm133_vm0, %v4911_v56, -inf }
0x3276   :  { %4992 = vmax.xlane.f32.xlu1 %v4991_v58 }
0x32dd   :  { %v4996_v61 = vpop.xlane.xlu0 %4995 }
0x32de   :  { %v4998_v62 = vsub.f32 %v4988_v46, %v4996_v61 }
0x32e0   :  { %v5001_v63 = vmul.f32 1.442695, %v4998_v62 }
0x32e2   :  { %7489 = vpow2.f32 %v5001_v63 }
0x32ec   :  { %v7490_v0 = vpop.eup %7489 }
0x32ed   :  { %v5006_v1 = vsel %vm133_vm0, %v7490_v0, 0.0 }
0x32ee   :  { %5007 = vadd.xlane.f32.xlu0 %v5006_v1 }
0x3303   :  { %v4993_v8 = vpop.xlane.xlu1 %4992 }
0x3304   :  { %5089 = vrot.lane.b32.xlu0 %v4834_v38, %s7549_s6  ;;  %v4997_v9 = vsub.f32 %v4911_v56, %v4993_v8 }
0x3306   :  { %v4999_v12 = vmul.f32 1.442695, %v4997_v9  ;;  %v6419_v9 = vld [vmem:[%s8625_s8 + $0x38] sm:$0xff] }
0x3308   :  { %7491 = vpow2.f32 %v4999_v12 }
0x3312   :  { %v7492_v13 = vpop.eup %7491 }
0x3313   :  { %v5003_v16 = vsel %vm133_vm0, %v7492_v13, 0.0 }
0x3314   :  { %5004 = vadd.xlane.f32.xlu1 %v5003_v16 }
0x3325   :  { %5013 = vrot.lane.b32.xlu1 %v4829_v40, %s7549_s6 }
0x337b   :  { %v5008_v22 = vpop.xlane.xlu0 %5007 }
0x337c   :  { %7493 = vrcp.f32 %v5008_v22 }
0x337f   :  { %v5090_v25 = vpop.permute.xlu0 %5089 }
0x3380   :  { %7041 = vmatpush3.msra.mxu0 %v5090_v25 }
0x3381   :  { %7267 = vmatprep.subr.bf16.mxu0 %v7266_v23 }
0x3386   :  { %v7494_v33 = vpop.eup %7493 }
0x3387   :  { %v5012_v34 = vmul.f32 %v7494_v33, %v7490_v0 }
0x3389   :  { %7043 = vmatmul.mubr.msk.f32.vlgmr.msra.gmra.mrb[48].mxu0 %vm133_vm0, %v5012_v34 }
0x338a   :  { %7269 = vmatpush3.bf16.msra.mxu0 %v7266_v23  ;;  %7058 = vmatprep.mubr.msk.f32.mxu0 %vm220_vm3, %v8289_v2 }
0x338b   :  { %7271 = vmatprep.subr.bf16.mxu0 %v7270_v18 }
0x338e   :  { %7273 = vmatpush3.bf16.msra.mxu0 %v7270_v18 }
0x338f   :  { %7071 = vmatprep.subr.mxu0 %v7543_v11 }
0x3391   :  { %7059 = vmatmul.mubr.msk.f32.vlgmr.msra.gmra.mrb[50].mxu0 %vm220_vm3, %v8291_v7 }
0x3392   :  { %7073 = vmatprep.mubr.msk.f32.mxu0 %vm7542_vm1, %v7543_v11 }
0x33a1   :  { %v5005_v19 = vpop.xlane.xlu1 %5004 }
0x33a2   :  { %7495 = vrcp.f32 %v5005_v19 }
0x33a5   :  { %v5014_v5 = vpop.permute.xlu1 %5013 }
0x33a6   :  { %7036 = vmatpush3.msra.mxu1 %v5014_v5 }
0x33a7   :  { %7045 = vmatprep.subr.mxu1 %v6402_v60 }
0x33ac   :  { %v7496_v6 = vpop.eup %7495 }
0x33ad   :  { %v5011_v59 = vmul.f32 %v7496_v6, %v7492_v13 }
0x33af   :  { %7038 = vmatmul.mubr.msk.f32.vlgmr.msra.gmra.mrb[44].mxu1 %vm133_vm0, %v5011_v59 }
0x33b0   :  { %7046 = vmatpush3.msra.mxu1 %v6402_v60 }
0x33b1   :  { %7061 = vmatprep.subr.mxu1 %v7543_v11 }
0x345c   :  { %v5161_v49 = vpop.f32.mrb[48].mxu0 }
0x345d   :  { %v7044_v50 = vpop.f32.mrb[49].mxu0 }
0x3464   :  { %v7060_v27 = vpop.f32.mrb[50].mxu0 }
0x3465   :  { %v5335_v28 = vadd.f32 %v7060_v27, %v6410_v26  ;;  %v5329_v29 = vpop.f32.mrb[51].mxu0 }
0x3466   :  { %v5330_v30 = vadd.f32 %v6410_v26, %v5329_v29 }
0x3467   :  { %5416 = vrot.lane.b32.xlu1 %v5335_v28, %s7547_s29 }
0x3468   :  { %5339 = vrot.lane.b32.xlu0 %v5330_v30, %s7547_s29 }
0x3482   :  { %v5085_v31 = vpop.f32.mrb[44].mxu1 }
0x3483   :  { %v7039_v32 = vpop.f32.mrb[45].mxu1  ;;  %7047 = vmatprep.mubr.msk.f32.mxu1 %vm133_vm0, %v5085_v31  ;;  %v6429_v31 = vld [vmem:[%s8629_s12 + $0x38] sm:$0xff] }
0x3484   :  { %7048 = vmatmul.mubr.msk.f32.vlgmr.msra.gmra.mrb[34].mxu1 %vm133_vm0, %v5161_v49 }
0x3485   :  { %7063 = vmatprep.mubr.msk.f32.mxu1 %vm7542_vm1, %v7543_v11 }
0x34d9   :  { %v5417_v48 = vpop.permute.xlu1 %5416 }
0x34da   :  { %v5340_v53 = vpop.permute.xlu0 %5339 }
0x34db   :  { %7062 = vmatpush3.xpose.msk.msra.mxu1 %vm133_vm0, %v5340_v53  ;;  %v6434_v53 = vld [vmem:[%s8631_s14 + $0x40] sm:$0xff] }
0x34dc   :  { %7066 = vmatprep.subr.mxu1 %v7543_v11 }
0x34de   :  { %7064 = vmatmul.mubr.msk.f32.vlgmr.msra.gmra.mrb[46].mxu1 %vm133_vm0, %v5330_v30 }
0x34df   :  { %7067 = vmatpush3.xpose.msk.msra.mxu1 %vm133_vm0, %v5417_v48  ;;  %7068 = vmatprep.mubr.msk.f32.mxu1 %vm7542_vm1, %v7543_v11  ;;  %v6435_v48 = vld [vmem:[%s8631_s14 + $0x48] sm:$0xff] }
0x34e0   :  { %7076 = vmatprep.subr.mxu1 %v7543_v11 }
0x34e2   :  { %7069 = vmatmul.mubr.msk.f32.vlgmr.msra.gmra.mrb[48].mxu1 %vm133_vm0, %v5335_v28 }
0x34e3   :  { %7078 = vmatprep.mubr.msk.f32.mxu1 %vm7542_vm1, %v7543_v11 }
0x35b1   :  { %v5411_v35 = vpop.f32.mrb[46].mxu1 }
0x35b2   :  { %v5412_v36 = vadd.f32 %v5411_v35, %v8025_v20  ;;  %v7065_v37 = vpop.f32.mrb[47].mxu1  ;;  %v6436_v35 = vld [vmem:[%s8631_s14 + $0x50] sm:$0xff] }
0x35b3   :  { %v6437_v37 = vld [vmem:[%s8631_s14 + $0x58] sm:$0xff] }
0x35b4   :  { %v5492_v38 = vsel %vm133_vm0, %v5412_v36, -inf }
0x35b5   :  { %5493 = vmax.xlane.f32.xlu0 %v5492_v38  ;;  %v5488_v39 = vpop.f32.mrb[48].mxu1  ;;  %v7286_v38 = vpack.c.bf16 %v6437_v37, %v6436_v35 }
0x35b6   :  { %v5489_v40 = vadd.f32 %v5488_v39, %v8028_v51  ;;  %v7070_v41 = vpop.f32.mrb[49].mxu1  ;;  %v6438_v39 = vld [vmem:[%s8631_s14 + $0x60] sm:$0xff] }
0x35b8   :  { %v5495_v42 = vsel %vm133_vm0, %v5489_v40, -inf }
0x35b9   :  { %5496 = vmax.xlane.f32.xlu1 %v5495_v42 }
0x35ca   :  { %5514 = vrot.lane.b32.xlu1 %v5330_v30, %s7549_s6  ;;  %v6428_v30 = vld [vmem:[%s8629_s12 + $0x30] sm:$0xff] }
0x35cb   :  { %v7278_v32 = vpack.c.bf16 %v6429_v31, %v6428_v30  ;;  %v112_v31 = vrot.slane %v8015_v4, %v8022_v24 }
0x3642   :  { %v5494_v43 = vpop.xlane.xlu0 %5493 }
0x3643   :  { %v5498_v44 = vsub.f32 %v5412_v36, %v5494_v43  ;;  %v7282_v36 = vpack.c.bf16 %v6435_v48, %v6434_v53  ;;  %v6064_v53 = vld [vmem:[%s8635_s18 + $0x8] sm:$0xff] }
0x3645   :  { %v5500_v45 = vmul.f32 1.442695, %v5498_v44 }
0x3646   :  { %v5497_v46 = vpop.xlane.xlu1 %5496 }
0x3647   :  { %7497 = vpow2.f32 %v5500_v45  ;;  %v5499_v47 = vsub.f32 %v5489_v40, %v5497_v46  ;;  %v6439_v40 = vld [vmem:[%s8631_s14 + $0x68] sm:$0xff] }
0x3648   :  { %v7290_v41 = vpack.c.bf16 %v6439_v40, %v6438_v39 }
0x3649   :  { %v5502_v20 = vmul.f32 1.442695, %v5499_v47 }
0x364a   :  { %v5515_v54 = vpop.permute.xlu1 %5514 }
0x364b   :  { %7499 = vpow2.f32 %v5502_v20  ;;  %7072 = vmatpush3.msra.mxu0 %v5515_v54  ;;  %v6424_v54 = vld [vmem:[%s8627_s10 + $0x1] ss:$0 sm:$0xff] }
0x3651   :  { %v7498_v55 = vpop.eup %7497 }
0x3652   :  { %v5504_v56 = vsel %vm133_vm0, %v7498_v55, 0.0 }
0x3653   :  { %5505 = vadd.xlane.f32.xlu0 %v5504_v56 }
0x3655   :  { %v7500_v51 = vpop.eup %7499 }
0x3656   :  { %v5507_v57 = vsel %vm133_vm0, %v7500_v51, 0.0 }
0x3657   :  { %5508 = vadd.xlane.f32.xlu0 %v5507_v57  ;;  %v6425_v57 = vld [vmem:[%s8628_s11 + $0x1] ss:$0 sm:$0xff] }
0x366d   :  { %5590 = vrot.lane.b32.xlu0 %v5335_v28, %s7549_s6  ;;  %v6427_v28 = vld [vmem:[%s8629_s12 + $0x28] sm:$0xff] }
0x36e0   :  { %v5506_v58 = vpop.xlane.xlu0 %5505 }
0x36e1   :  { %7501 = vrcp.f32 %v5506_v58 }
0x36e4   :  { %v5509_v61 = vpop.xlane.xlu0 %5508 }
0x36e5   :  { %7503 = vrcp.f32 %v5509_v61 }
0x36e8   :  { %v5591_v62 = vpop.permute.xlu0 %5590 }
0x36e9   :  { %7077 = vmatpush3.msra.mxu1 %v5591_v62 }
0x36ea   :  { %7081 = vmatprep.subr.mxu1 %v6419_v9 }
0x36eb   :  { %v7502_v63 = vpop.eup %7501 }
0x36ec   :  { %v5512_v0 = vmul.f32 %v7502_v63, %v7498_v55 }
0x36ee   :  { %7074 = vmatmul.mubr.msk.f32.vlgmr.msra.gmra.mrb[52].mxu0 %vm133_vm0, %v5512_v0  ;;  %v6440_v0 = vld [vmem:[%s8631_s14 + $0x70] sm:$0xff] }
0x36ef   :  { %v7504_v1 = vpop.eup %7503 }
0x36f0   :  { %v5513_v8 = vmul.f32 %v7504_v1, %v7500_v51  ;;  %v6441_v1 = vld [vmem:[%s8631_s14 + $0x78] sm:$0xff] }
0x36f2   :  { %7079 = vmatmul.mubr.msk.f32.vlgmr.msra.gmra.mrb[50].mxu1 %vm133_vm0, %v5513_v8  ;;  %v7294_v8 = vpack.c.bf16 %v6441_v1, %v6440_v0 }
0x36f3   :  { %7082 = vmatpush3.msra.mxu1 %v6419_v9  ;;  %v6431_v9 = vld [vmem:[%s8630_s13 + $0x1] ss:$0 sm:$0xff] }
0x36f4   :  { %7283 = vmatprep.subr.bf16.mxu1 %v7282_v36 }
0x37c1   :  { %v5586_v12 = vpop.f32.mrb[52].mxu0 }
0x37c2   :  { %v7075_v13 = vpop.f32.mrb[53].mxu0  ;;  %7083 = vmatprep.mubr.msk.f32.mxu1 %vm133_vm0, %v5586_v12 }
0x37c5   :  { %v5662_v16 = vpop.f32.mrb[50].mxu1 }
0x37c6   :  { %v7080_v10 = vpop.f32.mrb[51].mxu1  ;;  %7084 = vmatmul.mubr.msk.f32.vlgmr.msra.gmra.mrb[34].mxu1 %vm133_vm0, %v5662_v16 }
0x37c7   :  { %7285 = vmatpush3.bf16.msra.mxu1 %v7282_v36 }
0x37c8   :  { %7287 = vmatprep.subr.bf16.mxu1 %v7286_v38 }
0x37cb   :  { %7289 = vmatpush3.bf16.msra.mxu1 %v7286_v38 }
0x37cc   :  { %7291 = vmatprep.subr.bf16.mxu1 %v7290_v41 }
0x37cf   :  { %7293 = vmatpush3.bf16.msra.mxu1 %v7290_v41 }
0x37d0   :  { %7295 = vmatprep.subr.bf16.mxu1 %v7294_v8 }
0x37d3   :  { %7297 = vmatpush3.bf16.msra.mxu1 %v7294_v8 }
0x3899   :  { %v7085_v22 = vpop.f32.mrb[34].mxu1 }
0x389a   :  { %v7312_v23 = vadd.f32 %v7085_v22, %v6370_v17  ;;  %v5740_v25 = vpop.f32.mrb[35].mxu1 }
0x389b   :  { %v7313_v21 = vadd.f32 %v6370_v17, %v5740_v25 }
0x389c   :  { %v5752_v52 = vadd.f32 %v7312_v23, %v8291_v7  ;;  %v6443_v23 = vld [vmem:[%s8632_s15 + $0x1] ss:$0 sm:$0xff] }
0x389d   :  { %v5751_v33 = vadd.f32 %v7313_v21, %v8289_v2  ;;  %v6426_v2 = vld [vmem:[%s8629_s12 + $0x20] sm:$0xff] }
0x389e   :  { %v5760_v34 = vsel %vm220_vm3, %v5752_v52, 0.0  ;;  %v7274_v29 = vpack.c.bf16 %v6427_v28, %v6426_v2 }
0x389f   :  { %5761 = vadd.xlane.f32.xlu0 %v5760_v34  ;;  %v5757_v18 = vsel %vm220_vm3, %v5751_v33, 0.0 }
0x38a0   :  { %5758 = vadd.xlane.f32.xlu1 %v5757_v18  ;;  %7275 = vmatprep.subr.bf16.mxu0 %v7274_v29 }
0x38a1   :  { %7277 = vmatpush3.bf16.msra.mxu0 %v7274_v29  ;;  %v118_v29 = vsub.s32 1, %v8018_v15  ;;  %v6065_v15 = vld [vmem:[%s8635_s18 + $0x10] sm:$0xff] }
0x38a2   :  { %7279 = vmatprep.subr.bf16.mxu0 %v7278_v32 }
0x38a3   :  { %v119_v30 = vrot.slane %v8015_v4, %v118_v29  ;;  %v6066_v4 = vld [vmem:[%s8635_s18 + $0x18] sm:$0xff] }
0x38a4   :  { %v7302_v24 = vpack.c.bf16 %v6066_v4, %v6065_v15 }
0x38a5   :  { %7281 = vmatpush3.bf16.msra.mxu0 %v7278_v32  ;;  %v6063_v32 = vld [vmem:[%s8635_s18] sm:$0xff] }
0x38a6   :  { %7298 = vmatprep.subr.bf16.mxu0 %v7541_v3  ;;  %v7299_v48 = vpack.c.bf16 %v6064_v53, %v6063_v32 }
0x392c   :  { %v5762_v19 = vpop.xlane.xlu0 %5761 }
0x392d   :  { %v5764_v5 = vmul.f32 0.03125, %v5762_v19  ;;  %v5759_v6 = vpop.xlane.xlu1 %5758 }
0x392e   :  { %v5763_v59 = vmul.f32 0.03125, %v5759_v6 }
0x392f   :  { %v5766_v60 = vsub.f32 %v5752_v52, %v5764_v5 }
0x3930   :  { %v5765_v49 = vsub.f32 %v5751_v33, %v5763_v59 }
0x3931   :  { %v5768_v50 = vmul.f32 %v5766_v60, %v5766_v60 }
0x3932   :  { %v5767_v26 = vmul.f32 %v5765_v49, %v5765_v49 }
0x3933   :  { %v5772_v27 = vsel %vm220_vm3, %v5768_v50, 0.0 }
0x3934   :  { %5773 = vadd.xlane.f32.xlu0 %v5772_v27  ;;  %v5769_v7 = vsel %vm220_vm3, %v5767_v26, 0.0 }
0x3935   :  { %5770 = vadd.xlane.f32.xlu1 %v5769_v7 }
0x39c1   :  { %v5774_v42 = vpop.xlane.xlu0 %5773 }
0x39c2   :  { %v5776_v43 = vmul.f32 0.03125, %v5774_v42  ;;  %v5771_v44 = vpop.xlane.xlu1 %5770  ;;  %v6448_v42 = vld [vmem:[%s8633_s16 + $0x1] ss:$0 sm:$0xff] }
0x39c3   :  { %v5775_v45 = vmul.f32 0.03125, %v5771_v44 }
0x39c4   :  { %v5778_v46 = vadd.f32 1e-05, %v5776_v43 }
0x39c5   :  { %v5777_v47 = vadd.f32 1e-05, %v5775_v45  ;;  %v6449_v45 = vld [vmem:[%s8634_s17 + $0x1] ss:$0 sm:$0xff] }
0x39c6   :  { %7505 = vrsqrt.f32 %v5778_v46 }
0x39c7   :  { %7507 = vrsqrt.f32 %v5777_v47 }
0x39d0   :  { %v7506_v20 = vpop.eup %7505 }
0x39d1   :  { %v7508_v55 = vpop.eup %7507  ;;  %v5782_v56 = vmul.f32 %v7506_v20, %v5766_v60 }
0x39d2   :  { %v5781_v51 = vmul.f32 %v7508_v55, %v5765_v49 }
0x39d3   :  { %v5790_v58 = vmul.f32 %v6424_v54, %v5782_v56 }
0x39d4   :  { %v5789_v61 = vmul.f32 %v6424_v54, %v5781_v51  ;;  %v6057_v51 = vrot.slane %v8011_v14, 1 }
0x39d5   :  { %v5798_v63 = vadd.f32 %v6425_v57, %v5790_v58 }
0x39d6   :  { %v5797_v62 = vadd.f32 %v6425_v57, %v5789_v61 }
0x39d8   :  { %7094 = vmatprep.mubr.msk.f32.mxu0 %vm220_vm3, %v5797_v62 }
0x39d9   :  { %7095 = vmatmul.mubr.msk.f32.vlgmr.msra.gmra.mrb[54].mxu0 %vm220_vm3, %v5798_v63 }
0x39da   :  { %7124 = vmatprep.mubr.msk.f32.mxu0 %vm7542_vm1, %v7543_v11  ;;  %7300 = vmatpush3.bf16.msra.mxu0 %v7299_v48 }
0x39db   :  { %7301 = vmatprep.subr.bf16.mxu0 %v7541_v3 }
0x39de   :  { %7303 = vmatpush3.bf16.msra.mxu0 %v7302_v24 }
0x39df   :  { %7304 = vmatprep.subr.bf16.mxu0 %v7541_v3 }
0x3aac   :  { %v7096_v12 = vpop.f32.mrb[54].mxu0 }
0x3aad   :  { %v5890_v13 = vadd.f32 %v7096_v12, %v6431_v9  ;;  %v5884_v16 = vpop.f32.mrb[55].mxu0 }
0x3aae   :  { %v5885_v10 = vadd.f32 %v6431_v9, %v5884_v16 }
0x3aaf   :  { %v5894_v22 = vmax.f32 %v5890_v13, 0.0 }
0x3ab0   :  { %v5893_v17 = vmax.f32 %v5885_v10, 0.0 }
0x3ab2   :  { %7113 = vmatprep.mubr.msk.f32.mxu1 %vm3605_vm13, %v5893_v17 }
0x3ab3   :  { %7114 = vmatmul.mubr.msk.f32.vlgmr.msra.gmra.mrb[52].mxu1 %vm3605_vm13, %v5894_v22 }
0x3b86   :  { %v7115_v25 = vpop.f32.mrb[52].mxu1 }
0x3b87   :  { %v5990_v21 = vadd.f32 %v7115_v25, %v6443_v23  ;;  %v5984_v52 = vpop.f32.mrb[53].mxu1 }
0x3b88   :  { %v5985_v33 = vadd.f32 %v6443_v23, %v5984_v52  ;;  %v6151_v52 = vld [vmem:[%s8637_s20] sm:$0xff] }
0x3b89   :  { %v5994_v34 = vadd.f32 %v5990_v21, %v5798_v63 }
0x3b8a   :  { %v5993_v18 = vadd.f32 %v5985_v33, %v5797_v62  ;;  %v6152_v33 = vld [vmem:[%s8637_s20 + $0x8] sm:$0xff] }
0x3b8b   :  { %v6002_v19 = vsel %vm220_vm3, %v5994_v34, 0.0 }
0x3b8c   :  { %6003 = vadd.xlane.f32.xlu1 %v6002_v19  ;;  %v5999_v5 = vsel %vm220_vm3, %v5993_v18, 0.0 }
0x3b8d   :  { %6000 = vadd.xlane.f32.xlu0 %v5999_v5  ;;  %v7305_v5 = vpack.c.bf16 %v6152_v33, %v6151_v52 }
0x3c19   :  { %v6004_v6 = vpop.xlane.xlu1 %6003 }
0x3c1a   :  { %v6006_v59 = vmul.f32 0.03125, %v6004_v6  ;;  %v6001_v60 = vpop.xlane.xlu0 %6000 }
0x3c1b   :  { %v6005_v49 = vmul.f32 0.03125, %v6001_v60  ;;  %v6154_v60 = vld [vmem:[%s8637_s20 + $0x18] sm:$0xff] }
0x3c1c   :  { %v6008_v50 = vsub.f32 %v5994_v34, %v6006_v59  ;;  %v6153_v59 = vld [vmem:[%s8637_s20 + $0x10] sm:$0xff]  ;;  %s7517_s20 = scalar_lea.vmem %s6244_s1, 32 }
0x3c1d   :  { %v6007_v26 = vsub.f32 %v5993_v18, %v6005_v49  ;;  %v7308_v49 = vpack.c.bf16 %v6154_v60, %v6153_v59  ;;  %p7518_p0 = scmp.ne.s32.totalorder %s6244_s1, %s7517_s20  ;;  %p7523_p2 = scmp.lt.s32.totalorder %s7517_s20, %s7517_s20 }
0x3c1e   :  { %v6010_v27 = vmul.f32 %v6008_v50, %v6008_v50 }
0x3c1f   :  { %v6009_v7 = vmul.f32 %v6007_v26, %v6007_v26  ;;  %p7524_p3 = por %p7523_p2, %p7522_p1 }
0x3c20   :  { %v6014_v2 = vsel %vm220_vm3, %v6010_v27, 0.0 }
0x3c21   :  { %6015 = vadd.xlane.f32.xlu1 %v6014_v2  ;;  %v6011_v28 = vsel %vm220_vm3, %v6009_v7, 0.0  ;;  %p7525_p4 = pnand %p7524_p3, %p7518_p0 }
0x3c22   :  { %6012 = vadd.xlane.f32.xlu0 %v6011_v28 }
0x3c32   :  { %121 = vbcast.lane.b32.xlu1 %v119_v30, 256 }
0x3c38   :  { %114 = vbcast.lane.b32.xlu0 %v112_v31, 256 }
0x3cae   :  { %v6016_v35 = vpop.xlane.xlu1 %6015 }
0x3caf   :  { %v6018_v36 = vmul.f32 0.03125, %v6016_v35  ;;  %v6013_v37 = vpop.xlane.xlu0 %6012 }
0x3cb0   :  { %v6017_v38 = vmul.f32 0.03125, %v6013_v37 }
0x3cb1   :  { %v6020_v39 = vadd.f32 1e-05, %v6018_v36 }
0x3cb2   :  { %v6019_v40 = vadd.f32 1e-05, %v6017_v38  ;;  %v122_v55 = vpop.permute.xlu1 %121 }
0x3cb3   :  { %7509 = vrsqrt.f32 %v6020_v39  ;;  %v115_v58 = vpop.permute.xlu0 %114 }
0x3cb4   :  { %7511 = vrsqrt.f32 %v6019_v40 }
0x3cb5   :  { %7513 = vrcp.f32 %v6057_v51 }
0x3cb6   :  { %7515 = vrcp.f32 %v8011_v14 }
0x3cbd   :  { %v7510_v41 = vpop.eup %7509 }
0x3cbe   :  { %v7512_v43 = vpop.eup %7511  ;;  %v6024_v44 = vmul.f32 %v7510_v41, %v6008_v50  ;;  %v6450_v50 = vld [vmem:[%s8636_s19] ss:$0 sm:$0xff] }
0x3cbf   :  { %v6023_v46 = vmul.f32 %v7512_v43, %v6007_v26  ;;  %v7514_v25 = vpop.eup %7513 }
0x3cc0   :  { %v6032_v47 = vmul.f32 %v6448_v42, %v6024_v44  ;;  %v7516_v14 = vpop.eup %7515 }
0x3cc1   :  { %v6031_v20 = vmul.f32 %v6448_v42, %v6023_v46 }
0x3cc2   :  { %v6040_v54 = vadd.f32 %v6449_v45, %v6032_v47 }
0x3cc3   :  { %v6039_v56 = vadd.f32 %v6449_v45, %v6031_v20 }
0x3cc4   :  { %v6042_v57 = vmul.f32 %v6040_v54, %v122_v55 }
0x3cc5   :  { %v6041_v61 = vmul.f32 %v6039_v56, %v115_v58 }
0x3cc6   :  { %v6050_v62 = vsel %vm220_vm3, %v6042_v57, 0.0 }
0x3cc7   :  { %v6051_v63 = vrot.slane %v6050_v62, 4  ;;  %v6043_v0 = vsel %vm220_vm3, %v6041_v61, 0.0 }
0x3cc8   :  { %v6044_v1 = vrot.slane %v6043_v0, 4 }
0x3cc9   :  { %v6052_v8 = vadd.f32 %v6051_v63, %v6050_v62 }
0x3cca   :  { %v6045_v9 = vadd.f32 %v6044_v1, %v6043_v0 }
0x3ccb   :  { %v6053_v12 = vrot.slane %v6052_v8, 2 }
0x3ccc   :  { %v6046_v13 = vrot.slane %v6045_v9, 2 }
0x3ccd   :  { %v6054_v16 = vadd.f32 %v6053_v12, %v6052_v8 }
0x3cce   :  { %v6047_v10 = vadd.f32 %v6046_v13, %v6045_v9 }
0x3ccf   :  { %v6055_v17 = vrot.slane %v6054_v16, 1 }
0x3cd0   :  { %v6048_v22 = vrot.slane %v6047_v10, 1 }
0x3cd1   :  { %v6056_v23 = vadd.f32 %v6055_v17, %v6054_v16 }
0x3cd2   :  { %v6049_v21 = vadd.f32 %v6048_v22, %v6047_v10 }
0x3cd3   :  { %v6062_v34 = vmul.f32 %v7514_v25, %v6056_v23 }
0x3cd4   :  { %v6060_v18 = vmul.f32 %v7516_v14, %v6049_v21 }
0x3cd5   :  { %v6076_v19 = vrot.slane %v6062_v34, 7 }
0x3cd7   :  { %v6077_v6 = vsel %vm371_vm2, %v6076_v19, %v6060_v18 }
0x3cd8   :  { %7125 = vmatmul.mubr.msk.f32.vlgmr.msra.gmra.mrb[56].mxu0 %vm220_vm3, %v6077_v6 }
0x3cd9   :  { %7306 = vmatpush3.bf16.msra.mxu0 %v7305_v5  ;;  %7135 = vmatprep.mubr.msk.f32.mxu0 %vm7542_vm1, %v7543_v11 }
0x3cda   :  { %7307 = vmatprep.subr.bf16.mxu0 %v7541_v3  ;;  %v6452_v3 = vld [vmem:[%s8638_s21] ss:$0 sm:$0xff] }
0x3cdd   :  { %7309 = vmatpush3.bf16.msra.mxu0 %v7308_v49 }
0x3dab   :  { %v6146_v26 = vpop.f32.mrb[56].mxu0 }
0x3dac   :  { %v6147_v27 = vadd.f32 %v6450_v50, %v6146_v26  ;;  %v7126_v7 = vpop.f32.mrb[57].mxu0 }
0x3dae   :  { %v6150_v11 = vmax.f32 %v6147_v27, 0.0 }
0x3db0   :  { %7136 = vmatmul.mubr.msk.f32.vlgmr.msra.gmra.mrb[58].mxu0 %vm220_vm3, %v6150_v11 }
0x3e83   :  { %v6231_v2 = vpop.f32.mrb[58].mxu0 }
0x3e84   :  { %v6232_v28 = vadd.f32 %v6452_v3, %v6231_v2  ;;  %v7137_v29 = vpop.f32.mrb[59].mxu0 }
0x3e86   :  { %6236 = vst.msk [vmem:[#allocation3] sm:$0x3] %vm6235_vm14, %v6232_v28 }
0x3e87   :  { %7528 = shalt.err (!%p7525_p4)
}
0x3e88   :  { %s7529_s13 = scalar_lea.hbm %s8639_s22, 32 }
0x3e89   :  { %p7530_p5 = scmp.ne.s32.totalorder %s8639_s22, %s7529_s13  ;;  %p7533_p6 = scmp.lt.u32.totalorder %s7529_s13, %s8639_s22 }
0x3e8b   :  { %p7535_p7 = pnand %p7533_p6, %p7530_p5 }
0x3e8d   :  { %7538 = shalt.err (!%p7535_p7)
}
0x3e8e   :  { %6246 = dma.vmem_to_hbm [thread:$0]  %s6244_s1, 32, %s8639_s22, [#allocation4]  }
0x3e8f   :  { %7539 = dma.done.wait [#allocation4], 32  }
0x3e90   :  { %7540 = vsyncadd [#allocation4], 4294967264 }
0x3e91   :  { %6250 = vsyncpa [#allocation4], 1 }

</bundles_post_ra>
